<compile_context>
chip_gen: v6e
topology: v6e:2x2x1
jax: 0.10.0
libtpu: 0.0.40
codegen_flags: <defaults>
</compile_context>

<pallas_src>
import functools

import jax
import jax.numpy as jnp
from jax.experimental import pallas as pl
from jax.experimental.pallas import tpu as pltpu


_VMEM_LIMIT_BYTES = 32 * 1024 * 1024       # safe on v5e / v6e / v7x
_RESIDENT_TABLE_BYTES = 8 * 1024 * 1024    # fast-path threshold (x2 once double-buffered)
_GATHER_BUFFER_BYTES = 16 * 1024 * 1024    # cap for the (tb, D) DMA gather buffers


def _round_up(x, m):
    return ((x + m - 1) // m) * m


# ---------------------------------------------------------------------------
# General path: tables stay in HBM; rows are gathered with per-row DMAs.
# ---------------------------------------------------------------------------
def _line_second_hbm_kernel(i_idx_ref, j_idx_ref, node_hbm, ctx_hbm, out_ref,
                            vi_buf, vj_buf, sem, *, tb):
    """One grid step handles `tb` (i, j) pairs.

    i_idx_ref, j_idx_ref : (B_pad,) int32 in SMEM (scalar prefetch).
    node_hbm, ctx_hbm    : (N, D) embedding tables, memory_space=pl.ANY.
    out_ref              : (1, 1, tb) f32 lane-dense output tile.
    vi_buf, vj_buf       : (tb, D) VMEM gather buffers.
    sem                  : (2,) DMA semaphores (one per table).
    """
    base = pl.program_id(0) * tb

    # Issue all 2*tb row-gather DMAs; they all overlap in flight.
    @pl.loop(0, tb)
    def _issue(r):
        gi = i_idx_ref[base + r]
        gj = j_idx_ref[base + r]
        pltpu.make_async_copy(node_hbm.at[gi], vi_buf.at[r], sem.at[0]).start()
        pltpu.make_async_copy(ctx_hbm.at[gj], vj_buf.at[r], sem.at[1]).start()

    # One wait per issued copy.  The descriptors are shape-matched; the
    # placeholder source index 0 is only used for its shape (same pattern as
    # the reference paged-attention kernel).
    @pl.loop(0, tb)
    def _wait(r):
        pltpu.make_async_copy(node_hbm.at[0], vi_buf.at[r], sem.at[0]).wait()
        pltpu.make_async_copy(ctx_hbm.at[0], vj_buf.at[r], sem.at[1]).wait()

    # Dense (tb, D) multiply + row-reduce, one lane-dense store per tile.
    vi = vi_buf[...].astype(jnp.float32)
    vj = vj_buf[...].astype(jnp.float32)
    dots = jnp.sum(vi * vj, axis=-1)            # (tb,)
    out_ref[...] = dots.reshape(1, 1, tb)


# ---------------------------------------------------------------------------
# Fast path: tables fully resident in VMEM; rows gathered with dynamic loads.
# ---------------------------------------------------------------------------
def _line_second_vmem_kernel(i_idx_ref, j_idx_ref, node_ref, ctx_ref, out_ref,
                             prod_buf, *, tb):
    """node_ref, ctx_ref: (N, D) tables resident in VMEM.
    prod_buf: (tb, D) f32 scratch holding vi * vj for the current tile."""
    base = pl.program_id(0) * tb
    # Static unroll keeps every store index static; only the table-row loads
    # carry dynamic (second-minor) indices, which Mosaic supports natively.
    for r in range(tb):
        gi = i_idx_ref[base + r]
        gj = j_idx_ref[base + r]
        prod_buf[r] = (node_ref[gi].astype(jnp.float32) *
                       ctx_ref[gj].astype(jnp.float32))
    dots = jnp.sum(prod_buf[...], axis=-1)      # (tb,)
    out_ref[...] = dots.reshape(1, 1, tb)


# ---------------------------------------------------------------------------
# Wrapper / dispatch
# ---------------------------------------------------------------------------
def line_second_forward(I, J, node_emb, context_emb, *,
                        batch_tile=512,
                        vmem_table_budget=_RESIDENT_TABLE_BYTES):
    """Pallas implementation of LINE_SECOND.forward.

    Args:
      I, J: integer index arrays of shape (B,).
      node_emb, context_emb: (num_nodes, output_dim) embedding tables.
      batch_tile: target number of (i, j) pairs per grid step (HBM path).
      vmem_table_budget: keep the tables VMEM-resident when
        2 * N * D * itemsize <= vmem_table_budget (set 0 to force the HBM path).
    Returns:
      float32 array of shape (B,): (node_emb[I] * context_emb[J]).sum(-1).
    """
    B = I.shape[0]
    N, D = node_emb.shape
    assert context_emb.shape == (N, D)
    itemsize = jnp.dtype(node_emb.dtype).itemsize

    table_bytes = 2 * N * D * itemsize
    use_vmem_tables = table_bytes <= vmem_table_budget

    if use_vmem_tables:
        tb = 128                              # bounded static unroll in-kernel
    else:
        tb = min(max(128, (batch_tile // 128) * 128), max(128, _round_up(B, 128)))
        # Keep the two (tb, D) gather buffers well inside scoped VMEM.
        while tb > 128 and 2 * tb * D * itemsize > _GATHER_BUFFER_BYTES:
            tb -= 128

    nt = pl.cdiv(B, tb)
    b_pad = nt * tb

    # nn.Embedding raises on out-of-range indices; a DMA / dynamic-slice
    # gather would silently read OOB, so clamp.  Padded batch slots gather
    # row 0 and their (discarded) results are sliced off below.
    i_idx = jnp.pad(jnp.clip(I.astype(jnp.int32), 0, N - 1), (0, b_pad - B))
    j_idx = jnp.pad(jnp.clip(J.astype(jnp.int32), 0, N - 1), (0, b_pad - B))
    # TODO(synk): for very large B the (B_pad,) SMEM index arrays may exceed
    #   SMEM capacity; chunk the batch at this level if that ever matters.

    out_shape = jax.ShapeDtypeStruct((nt, 1, tb), jnp.float32)
    out_spec = pl.BlockSpec((1, 1, tb), lambda t, i_ref, j_ref: (t, 0, 0))

    if use_vmem_tables:
        kernel = functools.partial(_line_second_vmem_kernel, tb=tb)
        in_specs = [
            pl.BlockSpec((N, D), lambda t, i_ref, j_ref: (0, 0)),
            pl.BlockSpec((N, D), lambda t, i_ref, j_ref: (0, 0)),
        ]
        scratch_shapes = [pltpu.VMEM((tb, D), jnp.float32)]
    else:
        kernel = functools.partial(_line_second_hbm_kernel, tb=tb)
        in_specs = [
            pl.BlockSpec(memory_space=pl.ANY),
            pl.BlockSpec(memory_space=pl.ANY),
        ]
        scratch_shapes = [
            pltpu.VMEM((tb, D), node_emb.dtype),
            pltpu.VMEM((tb, D), context_emb.dtype),
            pltpu.SemaphoreType.DMA((2,)),
        ]

    out = pl.pallas_call(
        kernel,
        out_shape=out_shape,
        grid_spec=pltpu.PrefetchScalarGridSpec(
            num_scalar_prefetch=2,           # I and J -> SMEM
            grid=(nt,),
            in_specs=in_specs,
            out_specs=out_spec,
            scratch_shapes=scratch_shapes,
        ),
        compiler_params=pltpu.CompilerParams(
            dimension_semantics=("parallel",),     # megacore-shardable on v7x
            vmem_limit_bytes=_VMEM_LIMIT_BYTES,
        ),
    )(i_idx, j_idx, node_emb, context_emb)

    return out.reshape(b_pad)[:B]


if __name__ == "__main__":
    # Small, deterministic configuration consistent with the module:
    #   num_nodes=64, output_dim=32, batch of B=16 index pairs.
    num_nodes = 64
    output_dim = 32
    B = 16

    key = jax.random.PRNGKey(0)
    k_node, k_ctx, k_i, k_j = jax.random.split(key, 4)

    # nn.Embedding default init ~ N(0, 1)
    node_emb = jax.random.normal(k_node, (num_nodes, output_dim), dtype=jnp.float32)
    context_emb = jax.random.normal(k_ctx, (num_nodes, output_dim), dtype=jnp.float32)

    I = jax.random.randint(k_i, (B,), 0, num_nodes, dtype=jnp.int32)
    J = jax.random.randint(k_j, (B,), 0, num_nodes, dtype=jnp.int32)

    # Pure-JAX reference.
    ref = jnp.sum(node_emb[I] * context_emb[J], axis=-1)

    # Fast path (auto-dispatch: 2 * 64 * 32 * 4 B = 16 KiB of tables -> VMEM).
    out_fast = jax.block_until_ready(line_second_forward(I, J, node_emb, context_emb))
    # General path (force tables to stay in HBM, manual DMA row gather).
    out_hbm = jax.block_until_ready(
        line_second_forward(I, J, node_emb, context_emb, vmem_table_budget=0))

    assert out_fast.shape == (B,)
    assert out_hbm.shape == (B,)
    assert jnp.allclose(out_fast, ref, atol=1e-5, rtol=1e-5), "VMEM path mismatch"
    assert jnp.allclose(out_hbm, ref, atol=1e-5, rtol=1e-5), "HBM path mismatch"

    print("KERNEL_OK")
</pallas_src>

<mosaic_0001>
module attributes {stable_mosaic.version = 11 : i64} {
  func.func @_line_second_vmem_kernel(%arg0: i32, %arg1: memref<128xi32, #tpu.memory_space<smem>>, %arg2: memref<128xi32, #tpu.memory_space<smem>>, %arg3: memref<64x32xf32, #tpu.memory_space<vmem>>, %arg4: memref<64x32xf32, #tpu.memory_space<vmem>>, %arg5: memref<1x1x128xf32, #tpu.memory_space<vmem>>, %arg6: memref<128x32xf32, #tpu.memory_space<vmem>>) attributes {dimension_semantics = [#tpu.dimension_semantics<parallel>], iteration_bounds = array<i64: 1>, scalar_prefetch = 2 : i64, scratch_operands = 1 : i64, tpu.core_type = #tpu.core_type<tc>, window_params = [{pipeline_mode = #tpu.pipeline_mode<synchronous>, transform_indices = @transform_0, window_bounds = array<i64: 64, 32>}, {pipeline_mode = #tpu.pipeline_mode<synchronous>, transform_indices = @transform_1, window_bounds = array<i64: 64, 32>}, {transform_indices = @transform_2, window_bounds = array<i64: 1, 1, 128>}]} {
    %c128_i32 = arith.constant 128 : i32
    %0 = arith.muli %arg0, %c128_i32 : i32
    %c0_i32 = arith.constant 0 : i32
    %1 = arith.addi %0, %c0_i32 : i32
    %2 = arith.index_cast %1 : i32 to index
    %3 = memref.load %arg1[%2] : memref<128xi32, #tpu.memory_space<smem>>
    %c0_i32_0 = arith.constant 0 : i32
    %4 = arith.addi %0, %c0_i32_0 : i32
    %5 = arith.index_cast %4 : i32 to index
    %6 = memref.load %arg2[%5] : memref<128xi32, #tpu.memory_space<smem>>
    %7 = arith.index_cast %3 : i32 to index
    %c0 = arith.constant 0 : index
    %8 = vector.load %arg3[%7, %c0] : memref<64x32xf32, #tpu.memory_space<vmem>>, vector<1x32xf32>
    %9 = vector.shape_cast %8 : vector<1x32xf32> to vector<32xf32>
    %10 = arith.index_cast %6 : i32 to index
    %c0_1 = arith.constant 0 : index
    %11 = vector.load %arg4[%10, %c0_1] : memref<64x32xf32, #tpu.memory_space<vmem>>, vector<1x32xf32>
    %12 = vector.shape_cast %11 : vector<1x32xf32> to vector<32xf32>
    %13 = arith.mulf %9, %12 : vector<32xf32>
    %c0_2 = arith.constant 0 : index
    %c0_3 = arith.constant 0 : index
    %14 = vector.load %arg6[%c0_2, %c0_3] : memref<128x32xf32, #tpu.memory_space<vmem>>, vector<1x32xf32>
    %15 = vector.shape_cast %14 : vector<1x32xf32> to vector<32xf32>
    %16 = vector.shape_cast %13 : vector<32xf32> to vector<1x32xf32>
    tpu.vector_store %arg6[%c0_2, %c0_3], %16 {strides = array<i32>} : memref<128x32xf32, #tpu.memory_space<vmem>>, vector<1x32xf32>,
    %c1_i32 = arith.constant 1 : i32
    %17 = arith.addi %0, %c1_i32 : i32
    %18 = arith.index_cast %17 : i32 to index
    %19 = memref.load %arg1[%18] : memref<128xi32, #tpu.memory_space<smem>>
    %c1_i32_4 = arith.constant 1 : i32
    %20 = arith.addi %0, %c1_i32_4 : i32
    %21 = arith.index_cast %20 : i32 to index
    %22 = memref.load %arg2[%21] : memref<128xi32, #tpu.memory_space<smem>>
    %23 = arith.index_cast %19 : i32 to index
    %c0_5 = arith.constant 0 : index
    %24 = vector.load %arg3[%23, %c0_5] : memref<64x32xf32, #tpu.memory_space<vmem>>, vector<1x32xf32>
    %25 = vector.shape_cast %24 : vector<1x32xf32> to vector<32xf32>
    %26 = arith.index_cast %22 : i32 to index
    %c0_6 = arith.constant 0 : index
    %27 = vector.load %arg4[%26, %c0_6] : memref<64x32xf32, #tpu.memory_space<vmem>>, vector<1x32xf32>
    %28 = vector.shape_cast %27 : vector<1x32xf32> to vector<32xf32>
    %29 = arith.mulf %25, %28 : vector<32xf32>
    %c1 = arith.constant 1 : index
    %c0_7 = arith.constant 0 : index
    %30 = vector.load %arg6[%c1, %c0_7] : memref<128x32xf32, #tpu.memory_space<vmem>>, vector<1x32xf32>
    %31 = vector.shape_cast %30 : vector<1x32xf32> to vector<32xf32>
    %32 = vector.shape_cast %29 : vector<32xf32> to vector<1x32xf32>
    tpu.vector_store %arg6[%c1, %c0_7], %32 {strides = array<i32>} : memref<128x32xf32, #tpu.memory_space<vmem>>, vector<1x32xf32>,
    %c2_i32 = arith.constant 2 : i32
    %33 = arith.addi %0, %c2_i32 : i32
    %34 = arith.index_cast %33 : i32 to index
    %35 = memref.load %arg1[%34] : memref<128xi32, #tpu.memory_space<smem>>
    %c2_i32_8 = arith.constant 2 : i32
    %36 = arith.addi %0, %c2_i32_8 : i32
    %37 = arith.index_cast %36 : i32 to index
    %38 = memref.load %arg2[%37] : memref<128xi32, #tpu.memory_space<smem>>
    %39 = arith.index_cast %35 : i32 to index
    %c0_9 = arith.constant 0 : index
    %40 = vector.load %arg3[%39, %c0_9] : memref<64x32xf32, #tpu.memory_space<vmem>>, vector<1x32xf32>
    %41 = vector.shape_cast %40 : vector<1x32xf32> to vector<32xf32>
    %42 = arith.index_cast %38 : i32 to index
    %c0_10 = arith.constant 0 : index
    %43 = vector.load %arg4[%42, %c0_10] : memref<64x32xf32, #tpu.memory_space<vmem>>, vector<1x32xf32>
    %44 = vector.shape_cast %43 : vector<1x32xf32> to vector<32xf32>
    %45 = arith.mulf %41, %44 : vector<32xf32>
    %c2 = arith.constant 2 : index
    %c0_11 = arith.constant 0 : index
    %46 = vector.load %arg6[%c2, %c0_11] : memref<128x32xf32, #tpu.memory_space<vmem>>, vector<1x32xf32>
    %47 = vector.shape_cast %46 : vector<1x32xf32> to vector<32xf32>
    %48 = vector.shape_cast %45 : vector<32xf32> to vector<1x32xf32>
    tpu.vector_store %arg6[%c2, %c0_11], %48 {strides = array<i32>} : memref<128x32xf32, #tpu.memory_space<vmem>>, vector<1x32xf32>,
    %c3_i32 = arith.constant 3 : i32
    %49 = arith.addi %0, %c3_i32 : i32
    %50 = arith.index_cast %49 : i32 to index
    %51 = memref.load %arg1[%50] : memref<128xi32, #tpu.memory_space<smem>>
    %c3_i32_12 = arith.constant 3 : i32
    %52 = arith.addi %0, %c3_i32_12 : i32
    %53 = arith.index_cast %52 : i32 to index
    %54 = memref.load %arg2[%53] : memref<128xi32, #tpu.memory_space<smem>>
    %55 = arith.index_cast %51 : i32 to index
    %c0_13 = arith.constant 0 : index
    %56 = vector.load %arg3[%55, %c0_13] : memref<64x32xf32, #tpu.memory_space<vmem>>, vector<1x32xf32>
    %57 = vector.shape_cast %56 : vector<1x32xf32> to vector<32xf32>
    %58 = arith.index_cast %54 : i32 to index
    %c0_14 = arith.constant 0 : index
    %59 = vector.load %arg4[%58, %c0_14] : memref<64x32xf32, #tpu.memory_space<vmem>>, vector<1x32xf32>
    %60 = vector.shape_cast %59 : vector<1x32xf32> to vector<32xf32>
    %61 = arith.mulf %57, %60 : vector<32xf32>
    %c3 = arith.constant 3 : index
    %c0_15 = arith.constant 0 : index
    %62 = vector.load %arg6[%c3, %c0_15] : memref<128x32xf32, #tpu.memory_space<vmem>>, vector<1x32xf32>
    %63 = vector.shape_cast %62 : vector<1x32xf32> to vector<32xf32>
    %64 = vector.shape_cast %61 : vector<32xf32> to vector<1x32xf32>
    tpu.vector_store %arg6[%c3, %c0_15], %64 {strides = array<i32>} : memref<128x32xf32, #tpu.memory_space<vmem>>, vector<1x32xf32>,
    %c4_i32 = arith.constant 4 : i32
    %65 = arith.addi %0, %c4_i32 : i32
    %66 = arith.index_cast %65 : i32 to index
    %67 = memref.load %arg1[%66] : memref<128xi32, #tpu.memory_space<smem>>
    %c4_i32_16 = arith.constant 4 : i32
    %68 = arith.addi %0, %c4_i32_16 : i32
    %69 = arith.index_cast %68 : i32 to index
    %70 = memref.load %arg2[%69] : memref<128xi32, #tpu.memory_space<smem>>
    %71 = arith.index_cast %67 : i32 to index
    %c0_17 = arith.constant 0 : index
    %72 = vector.load %arg3[%71, %c0_17] : memref<64x32xf32, #tpu.memory_space<vmem>>, vector<1x32xf32>
    %73 = vector.shape_cast %72 : vector<1x32xf32> to vector<32xf32>
    %74 = arith.index_cast %70 : i32 to index
    %c0_18 = arith.constant 0 : index
    %75 = vector.load %arg4[%74, %c0_18] : memref<64x32xf32, #tpu.memory_space<vmem>>, vector<1x32xf32>
    %76 = vector.shape_cast %75 : vector<1x32xf32> to vector<32xf32>
    %77 = arith.mulf %73, %76 : vector<32xf32>
    %c4 = arith.constant 4 : index
    %c0_19 = arith.constant 0 : index
    %78 = vector.load %arg6[%c4, %c0_19] : memref<128x32xf32, #tpu.memory_space<vmem>>, vector<1x32xf32>
    %79 = vector.shape_cast %78 : vector<1x32xf32> to vector<32xf32>
    %80 = vector.shape_cast %77 : vector<32xf32> to vector<1x32xf32>
    tpu.vector_store %arg6[%c4, %c0_19], %80 {strides = array<i32>} : memref<128x32xf32, #tpu.memory_space<vmem>>, vector<1x32xf32>,
    %c5_i32 = arith.constant 5 : i32
    %81 = arith.addi %0, %c5_i32 : i32
    %82 = arith.index_cast %81 : i32 to index
    %83 = memref.load %arg1[%82] : memref<128xi32, #tpu.memory_space<smem>>
    %c5_i32_20 = arith.constant 5 : i32
    %84 = arith.addi %0, %c5_i32_20 : i32
    %85 = arith.index_cast %84 : i32 to index
    %86 = memref.load %arg2[%85] : memref<128xi32, #tpu.memory_space<smem>>
    %87 = arith.index_cast %83 : i32 to index
    %c0_21 = arith.constant 0 : index
    %88 = vector.load %arg3[%87, %c0_21] : memref<64x32xf32, #tpu.memory_space<vmem>>, vector<1x32xf32>
    %89 = vector.shape_cast %88 : vector<1x32xf32> to vector<32xf32>
    %90 = arith.index_cast %86 : i32 to index
    %c0_22 = arith.constant 0 : index
    %91 = vector.load %arg4[%90, %c0_22] : memref<64x32xf32, #tpu.memory_space<vmem>>, vector<1x32xf32>
    %92 = vector.shape_cast %91 : vector<1x32xf32> to vector<32xf32>
    %93 = arith.mulf %89, %92 : vector<32xf32>
    %c5 = arith.constant 5 : index
    %c0_23 = arith.constant 0 : index
    %94 = vector.load %arg6[%c5, %c0_23] : memref<128x32xf32, #tpu.memory_space<vmem>>, vector<1x32xf32>
    %95 = vector.shape_cast %94 : vector<1x32xf32> to vector<32xf32>
    %96 = vector.shape_cast %93 : vector<32xf32> to vector<1x32xf32>
    tpu.vector_store %arg6[%c5, %c0_23], %96 {strides = array<i32>} : memref<128x32xf32, #tpu.memory_space<vmem>>, vector<1x32xf32>,
    %c6_i32 = arith.constant 6 : i32
    %97 = arith.addi %0, %c6_i32 : i32
    %98 = arith.index_cast %97 : i32 to index
    %99 = memref.load %arg1[%98] : memref<128xi32, #tpu.memory_space<smem>>
    %c6_i32_24 = arith.constant 6 : i32
    %100 = arith.addi %0, %c6_i32_24 : i32
    %101 = arith.index_cast %100 : i32 to index
    %102 = memref.load %arg2[%101] : memref<128xi32, #tpu.memory_space<smem>>
    %103 = arith.index_cast %99 : i32 to index
    %c0_25 = arith.constant 0 : index
    %104 = vector.load %arg3[%103, %c0_25] : memref<64x32xf32, #tpu.memory_space<vmem>>, vector<1x32xf32>
    %105 = vector.shape_cast %104 : vector<1x32xf32> to vector<32xf32>
    %106 = arith.index_cast %102 : i32 to index
    %c0_26 = arith.constant 0 : index
    %107 = vector.load %arg4[%106, %c0_26] : memref<64x32xf32, #tpu.memory_space<vmem>>, vector<1x32xf32>
    %108 = vector.shape_cast %107 : vector<1x32xf32> to vector<32xf32>
    %109 = arith.mulf %105, %108 : vector<32xf32>
    %c6 = arith.constant 6 : index
    %c0_27 = arith.constant 0 : index
    %110 = vector.load %arg6[%c6, %c0_27] : memref<128x32xf32, #tpu.memory_space<vmem>>, vector<1x32xf32>
    %111 = vector.shape_cast %110 : vector<1x32xf32> to vector<32xf32>
    %112 = vector.shape_cast %109 : vector<32xf32> to vector<1x32xf32>
    tpu.vector_store %arg6[%c6, %c0_27], %112 {strides = array<i32>} : memref<128x32xf32, #tpu.memory_space<vmem>>, vector<1x32xf32>,
    %c7_i32 = arith.constant 7 : i32
    %113 = arith.addi %0, %c7_i32 : i32
    %114 = arith.index_cast %113 : i32 to index
    %115 = memref.load %arg1[%114] : memref<128xi32, #tpu.memory_space<smem>>
    %c7_i32_28 = arith.constant 7 : i32
    %116 = arith.addi %0, %c7_i32_28 : i32
    %117 = arith.index_cast %116 : i32 to index
    %118 = memref.load %arg2[%117] : memref<128xi32, #tpu.memory_space<smem>>
    %119 = arith.index_cast %115 : i32 to index
    %c0_29 = arith.constant 0 : index
    %120 = vector.load %arg3[%119, %c0_29] : memref<64x32xf32, #tpu.memory_space<vmem>>, vector<1x32xf32>
    %121 = vector.shape_cast %120 : vector<1x32xf32> to vector<32xf32>
    %122 = arith.index_cast %118 : i32 to index
    %c0_30 = arith.constant 0 : index
    %123 = vector.load %arg4[%122, %c0_30] : memref<64x32xf32, #tpu.memory_space<vmem>>, vector<1x32xf32>
    %124 = vector.shape_cast %123 : vector<1x32xf32> to vector<32xf32>
    %125 = arith.mulf %121, %124 : vector<32xf32>
    %c7 = arith.constant 7 : index
    %c0_31 = arith.constant 0 : index
    %126 = vector.load %arg6[%c7, %c0_31] : memref<128x32xf32, #tpu.memory_space<vmem>>, vector<1x32xf32>
    %127 = vector.shape_cast %126 : vector<1x32xf32> to vector<32xf32>
    %128 = vector.shape_cast %125 : vector<32xf32> to vector<1x32xf32>
    tpu.vector_store %arg6[%c7, %c0_31], %128 {strides = array<i32>} : memref<128x32xf32, #tpu.memory_space<vmem>>, vector<1x32xf32>,
    %c8_i32 = arith.constant 8 : i32
    %129 = arith.addi %0, %c8_i32 : i32
    %130 = arith.index_cast %129 : i32 to index
    %131 = memref.load %arg1[%130] : memref<128xi32, #tpu.memory_space<smem>>
    %c8_i32_32 = arith.constant 8 : i32
    %132 = arith.addi %0, %c8_i32_32 : i32
    %133 = arith.index_cast %132 : i32 to index
    %134 = memref.load %arg2[%133] : memref<128xi32, #tpu.memory_space<smem>>
    %135 = arith.index_cast %131 : i32 to index
    %c0_33 = arith.constant 0 : index
    %136 = vector.load %arg3[%135, %c0_33] : memref<64x32xf32, #tpu.memory_space<vmem>>, vector<1x32xf32>
    %137 = vector.shape_cast %136 : vector<1x32xf32> to vector<32xf32>
    %138 = arith.index_cast %134 : i32 to index
    %c0_34 = arith.constant 0 : index
    %139 = vector.load %arg4[%138, %c0_34] : memref<64x32xf32, #tpu.memory_space<vmem>>, vector<1x32xf32>
    %140 = vector.shape_cast %139 : vector<1x32xf32> to vector<32xf32>
    %141 = arith.mulf %137, %140 : vector<32xf32>
    %c8 = arith.constant 8 : index
    %c0_35 = arith.constant 0 : index
    %142 = vector.load %arg6[%c8, %c0_35] : memref<128x32xf32, #tpu.memory_space<vmem>>, vector<1x32xf32>
    %143 = vector.shape_cast %142 : vector<1x32xf32> to vector<32xf32>
    %144 = vector.shape_cast %141 : vector<32xf32> to vector<1x32xf32>
    tpu.vector_store %arg6[%c8, %c0_35], %144 {strides = array<i32>} : memref<128x32xf32, #tpu.memory_space<vmem>>, vector<1x32xf32>,
    %c9_i32 = arith.constant 9 : i32
    %145 = arith.addi %0, %c9_i32 : i32
    %146 = arith.index_cast %145 : i32 to index
    %147 = memref.load %arg1[%146] : memref<128xi32, #tpu.memory_space<smem>>
    %c9_i32_36 = arith.constant 9 : i32
    %148 = arith.addi %0, %c9_i32_36 : i32
    %149 = arith.index_cast %148 : i32 to index
    %150 = memref.load %arg2[%149] : memref<128xi32, #tpu.memory_space<smem>>
    %151 = arith.index_cast %147 : i32 to index
    %c0_37 = arith.constant 0 : index
    %152 = vector.load %arg3[%151, %c0_37] : memref<64x32xf32, #tpu.memory_space<vmem>>, vector<1x32xf32>
    %153 = vector.shape_cast %152 : vector<1x32xf32> to vector<32xf32>
    %154 = arith.index_cast %150 : i32 to index
    %c0_38 = arith.constant 0 : index
    %155 = vector.load %arg4[%154, %c0_38] : memref<64x32xf32, #tpu.memory_space<vmem>>, vector<1x32xf32>
    %156 = vector.shape_cast %155 : vector<1x32xf32> to vector<32xf32>
    %157 = arith.mulf %153, %156 : vector<32xf32>
    %c9 = arith.constant 9 : index
    %c0_39 = arith.constant 0 : index
    %158 = vector.load %arg6[%c9, %c0_39] : memref<128x32xf32, #tpu.memory_space<vmem>>, vector<1x32xf32>
    %159 = vector.shape_cast %158 : vector<1x32xf32> to vector<32xf32>
    %160 = vector.shape_cast %157 : vector<32xf32> to vector<1x32xf32>
    tpu.vector_store %arg6[%c9, %c0_39], %160 {strides = array<i32>} : memref<128x32xf32, #tpu.memory_space<vmem>>, vector<1x32xf32>,
    %c10_i32 = arith.constant 10 : i32
    %161 = arith.addi %0, %c10_i32 : i32
    %162 = arith.index_cast %161 : i32 to index
    %163 = memref.load %arg1[%162] : memref<128xi32, #tpu.memory_space<smem>>
    %c10_i32_40 = arith.constant 10 : i32
    %164 = arith.addi %0, %c10_i32_40 : i32
    %165 = arith.index_cast %164 : i32 to index
    %166 = memref.load %arg2[%165] : memref<128xi32, #tpu.memory_space<smem>>
    %167 = arith.index_cast %163 : i32 to index
    %c0_41 = arith.constant 0 : index
    %168 = vector.load %arg3[%167, %c0_41] : memref<64x32xf32, #tpu.memory_space<vmem>>, vector<1x32xf32>
    %169 = vector.shape_cast %168 : vector<1x32xf32> to vector<32xf32>
    %170 = arith.index_cast %166 : i32 to index
    %c0_42 = arith.constant 0 : index
    %171 = vector.load %arg4[%170, %c0_42] : memref<64x32xf32, #tpu.memory_space<vmem>>, vector<1x32xf32>
    %172 = vector.shape_cast %171 : vector<1x32xf32> to vector<32xf32>
    %173 = arith.mulf %169, %172 : vector<32xf32>
    %c10 = arith.constant 10 : index
    %c0_43 = arith.constant 0 : index
    %174 = vector.load %arg6[%c10, %c0_43] : memref<128x32xf32, #tpu.memory_space<vmem>>, vector<1x32xf32>
    %175 = vector.shape_cast %174 : vector<1x32xf32> to vector<32xf32>
    %176 = vector.shape_cast %173 : vector<32xf32> to vector<1x32xf32>
    tpu.vector_store %arg6[%c10, %c0_43], %176 {strides = array<i32>} : memref<128x32xf32, #tpu.memory_space<vmem>>, vector<1x32xf32>,
    %c11_i32 = arith.constant 11 : i32
    %177 = arith.addi %0, %c11_i32 : i32
    %178 = arith.index_cast %177 : i32 to index
    %179 = memref.load %arg1[%178] : memref<128xi32, #tpu.memory_space<smem>>
    %c11_i32_44 = arith.constant 11 : i32
    %180 = arith.addi %0, %c11_i32_44 : i32
    %181 = arith.index_cast %180 : i32 to index
    %182 = memref.load %arg2[%181] : memref<128xi32, #tpu.memory_space<smem>>
    %183 = arith.index_cast %179 : i32 to index
    %c0_45 = arith.constant 0 : index
    %184 = vector.load %arg3[%183, %c0_45] : memref<64x32xf32, #tpu.memory_space<vmem>>, vector<1x32xf32>
    %185 = vector.shape_cast %184 : vector<1x32xf32> to vector<32xf32>
    %186 = arith.index_cast %182 : i32 to index
    %c0_46 = arith.constant 0 : index
    %187 = vector.load %arg4[%186, %c0_46] : memref<64x32xf32, #tpu.memory_space<vmem>>, vector<1x32xf32>
    %188 = vector.shape_cast %187 : vector<1x32xf32> to vector<32xf32>
    %189 = arith.mulf %185, %188 : vector<32xf32>
    %c11 = arith.constant 11 : index
    %c0_47 = arith.constant 0 : index
    %190 = vector.load %arg6[%c11, %c0_47] : memref<128x32xf32, #tpu.memory_space<vmem>>, vector<1x32xf32>
    %191 = vector.shape_cast %190 : vector<1x32xf32> to vector<32xf32>
    %192 = vector.shape_cast %189 : vector<32xf32> to vector<1x32xf32>
    tpu.vector_store %arg6[%c11, %c0_47], %192 {strides = array<i32>} : memref<128x32xf32, #tpu.memory_space<vmem>>, vector<1x32xf32>,
    %c12_i32 = arith.constant 12 : i32
    %193 = arith.addi %0, %c12_i32 : i32
    %194 = arith.index_cast %193 : i32 to index
    %195 = memref.load %arg1[%194] : memref<128xi32, #tpu.memory_space<smem>>
    %c12_i32_48 = arith.constant 12 : i32
    %196 = arith.addi %0, %c12_i32_48 : i32
    %197 = arith.index_cast %196 : i32 to index
    %198 = memref.load %arg2[%197] : memref<128xi32, #tpu.memory_space<smem>>
    %199 = arith.index_cast %195 : i32 to index
    %c0_49 = arith.constant 0 : index
    %200 = vector.load %arg3[%199, %c0_49] : memref<64x32xf32, #tpu.memory_space<vmem>>, vector<1x32xf32>
    %201 = vector.shape_cast %200 : vector<1x32xf32> to vector<32xf32>
    %202 = arith.index_cast %198 : i32 to index
    %c0_50 = arith.constant 0 : index
    %203 = vector.load %arg4[%202, %c0_50] : memref<64x32xf32, #tpu.memory_space<vmem>>, vector<1x32xf32>
    %204 = vector.shape_cast %203 : vector<1x32xf32> to vector<32xf32>
    %205 = arith.mulf %201, %204 : vector<32xf32>
    %c12 = arith.constant 12 : index
    %c0_51 = arith.constant 0 : index
    %206 = vector.load %arg6[%c12, %c0_51] : memref<128x32xf32, #tpu.memory_space<vmem>>, vector<1x32xf32>
    %207 = vector.shape_cast %206 : vector<1x32xf32> to vector<32xf32>
    %208 = vector.shape_cast %205 : vector<32xf32> to vector<1x32xf32>
    tpu.vector_store %arg6[%c12, %c0_51], %208 {strides = array<i32>} : memref<128x32xf32, #tpu.memory_space<vmem>>, vector<1x32xf32>,
    %c13_i32 = arith.constant 13 : i32
    %209 = arith.addi %0, %c13_i32 : i32
    %210 = arith.index_cast %209 : i32 to index
    %211 = memref.load %arg1[%210] : memref<128xi32, #tpu.memory_space<smem>>
    %c13_i32_52 = arith.constant 13 : i32
    %212 = arith.addi %0, %c13_i32_52 : i32
    %213 = arith.index_cast %212 : i32 to index
    %214 = memref.load %arg2[%213] : memref<128xi32, #tpu.memory_space<smem>>
    %215 = arith.index_cast %211 : i32 to index
    %c0_53 = arith.constant 0 : index
    %216 = vector.load %arg3[%215, %c0_53] : memref<64x32xf32, #tpu.memory_space<vmem>>, vector<1x32xf32>
    %217 = vector.shape_cast %216 : vector<1x32xf32> to vector<32xf32>
    %218 = arith.index_cast %214 : i32 to index
    %c0_54 = arith.constant 0 : index
    %219 = vector.load %arg4[%218, %c0_54] : memref<64x32xf32, #tpu.memory_space<vmem>>, vector<1x32xf32>
    %220 = vector.shape_cast %219 : vector<1x32xf32> to vector<32xf32>
    %221 = arith.mulf %217, %220 : vector<32xf32>
    %c13 = arith.constant 13 : index
    %c0_55 = arith.constant 0 : index
    %222 = vector.load %arg6[%c13, %c0_55] : memref<128x32xf32, #tpu.memory_space<vmem>>, vector<1x32xf32>
    %223 = vector.shape_cast %222 : vector<1x32xf32> to vector<32xf32>
    %224 = vector.shape_cast %221 : vector<32xf32> to vector<1x32xf32>
    tpu.vector_store %arg6[%c13, %c0_55], %224 {strides = array<i32>} : memref<128x32xf32, #tpu.memory_space<vmem>>, vector<1x32xf32>,
    %c14_i32 = arith.constant 14 : i32
    %225 = arith.addi %0, %c14_i32 : i32
    %226 = arith.index_cast %225 : i32 to index
    %227 = memref.load %arg1[%226] : memref<128xi32, #tpu.memory_space<smem>>
    %c14_i32_56 = arith.constant 14 : i32
    %228 = arith.addi %0, %c14_i32_56 : i32
    %229 = arith.index_cast %228 : i32 to index
    %230 = memref.load %arg2[%229] : memref<128xi32, #tpu.memory_space<smem>>
    %231 = arith.index_cast %227 : i32 to index
    %c0_57 = arith.constant 0 : index
    %232 = vector.load %arg3[%231, %c0_57] : memref<64x32xf32, #tpu.memory_space<vmem>>, vector<1x32xf32>
    %233 = vector.shape_cast %232 : vector<1x32xf32> to vector<32xf32>
    %234 = arith.index_cast %230 : i32 to index
    %c0_58 = arith.constant 0 : index
    %235 = vector.load %arg4[%234, %c0_58] : memref<64x32xf32, #tpu.memory_space<vmem>>, vector<1x32xf32>
    %236 = vector.shape_cast %235 : vector<1x32xf32> to vector<32xf32>
    %237 = arith.mulf %233, %236 : vector<32xf32>
    %c14 = arith.constant 14 : index
    %c0_59 = arith.constant 0 : index
    %238 = vector.load %arg6[%c14, %c0_59] : memref<128x32xf32, #tpu.memory_space<vmem>>, vector<1x32xf32>
    %239 = vector.shape_cast %238 : vector<1x32xf32> to vector<32xf32>
    %240 = vector.shape_cast %237 : vector<32xf32> to vector<1x32xf32>
    tpu.vector_store %arg6[%c14, %c0_59], %240 {strides = array<i32>} : memref<128x32xf32, #tpu.memory_space<vmem>>, vector<1x32xf32>,
    %c15_i32 = arith.constant 15 : i32
    %241 = arith.addi %0, %c15_i32 : i32
    %242 = arith.index_cast %241 : i32 to index
    %243 = memref.load %arg1[%242] : memref<128xi32, #tpu.memory_space<smem>>
    %c15_i32_60 = arith.constant 15 : i32
    %244 = arith.addi %0, %c15_i32_60 : i32
    %245 = arith.index_cast %244 : i32 to index
    %246 = memref.load %arg2[%245] : memref<128xi32, #tpu.memory_space<smem>>
    %247 = arith.index_cast %243 : i32 to index
    %c0_61 = arith.constant 0 : index
    %248 = vector.load %arg3[%247, %c0_61] : memref<64x32xf32, #tpu.memory_space<vmem>>, vector<1x32xf32>
    %249 = vector.shape_cast %248 : vector<1x32xf32> to vector<32xf32>
    %250 = arith.index_cast %246 : i32 to index
    %c0_62 = arith.constant 0 : index
    %251 = vector.load %arg4[%250, %c0_62] : memref<64x32xf32, #tpu.memory_space<vmem>>, vector<1x32xf32>
    %252 = vector.shape_cast %251 : vector<1x32xf32> to vector<32xf32>
    %253 = arith.mulf %249, %252 : vector<32xf32>
    %c15 = arith.constant 15 : index
    %c0_63 = arith.constant 0 : index
    %254 = vector.load %arg6[%c15, %c0_63] : memref<128x32xf32, #tpu.memory_space<vmem>>, vector<1x32xf32>
    %255 = vector.shape_cast %254 : vector<1x32xf32> to vector<32xf32>
    %256 = vector.shape_cast %253 : vector<32xf32> to vector<1x32xf32>
    tpu.vector_store %arg6[%c15, %c0_63], %256 {strides = array<i32>} : memref<128x32xf32, #tpu.memory_space<vmem>>, vector<1x32xf32>,
    %c16_i32 = arith.constant 16 : i32
    %257 = arith.addi %0, %c16_i32 : i32
    %258 = arith.index_cast %257 : i32 to index
    %259 = memref.load %arg1[%258] : memref<128xi32, #tpu.memory_space<smem>>
    %c16_i32_64 = arith.constant 16 : i32
    %260 = arith.addi %0, %c16_i32_64 : i32
    %261 = arith.index_cast %260 : i32 to index
    %262 = memref.load %arg2[%261] : memref<128xi32, #tpu.memory_space<smem>>
    %263 = arith.index_cast %259 : i32 to index
    %c0_65 = arith.constant 0 : index
    %264 = vector.load %arg3[%263, %c0_65] : memref<64x32xf32, #tpu.memory_space<vmem>>, vector<1x32xf32>
    %265 = vector.shape_cast %264 : vector<1x32xf32> to vector<32xf32>
    %266 = arith.index_cast %262 : i32 to index
    %c0_66 = arith.constant 0 : index
    %267 = vector.load %arg4[%266, %c0_66] : memref<64x32xf32, #tpu.memory_space<vmem>>, vector<1x32xf32>
    %268 = vector.shape_cast %267 : vector<1x32xf32> to vector<32xf32>
    %269 = arith.mulf %265, %268 : vector<32xf32>
    %c16 = arith.constant 16 : index
    %c0_67 = arith.constant 0 : index
    %270 = vector.load %arg6[%c16, %c0_67] : memref<128x32xf32, #tpu.memory_space<vmem>>, vector<1x32xf32>
    %271 = vector.shape_cast %270 : vector<1x32xf32> to vector<32xf32>
    %272 = vector.shape_cast %269 : vector<32xf32> to vector<1x32xf32>
    tpu.vector_store %arg6[%c16, %c0_67], %272 {strides = array<i32>} : memref<128x32xf32, #tpu.memory_space<vmem>>, vector<1x32xf32>,
    %c17_i32 = arith.constant 17 : i32
    %273 = arith.addi %0, %c17_i32 : i32
    %274 = arith.index_cast %273 : i32 to index
    %275 = memref.load %arg1[%274] : memref<128xi32, #tpu.memory_space<smem>>
    %c17_i32_68 = arith.constant 17 : i32
    %276 = arith.addi %0, %c17_i32_68 : i32
    %277 = arith.index_cast %276 : i32 to index
    %278 = memref.load %arg2[%277] : memref<128xi32, #tpu.memory_space<smem>>
    %279 = arith.index_cast %275 : i32 to index
    %c0_69 = arith.constant 0 : index
    %280 = vector.load %arg3[%279, %c0_69] : memref<64x32xf32, #tpu.memory_space<vmem>>, vector<1x32xf32>
    %281 = vector.shape_cast %280 : vector<1x32xf32> to vector<32xf32>
    %282 = arith.index_cast %278 : i32 to index
    %c0_70 = arith.constant 0 : index
    %283 = vector.load %arg4[%282, %c0_70] : memref<64x32xf32, #tpu.memory_space<vmem>>, vector<1x32xf32>
    %284 = vector.shape_cast %283 : vector<1x32xf32> to vector<32xf32>
    %285 = arith.mulf %281, %284 : vector<32xf32>
    %c17 = arith.constant 17 : index
    %c0_71 = arith.constant 0 : index
    %286 = vector.load %arg6[%c17, %c0_71] : memref<128x32xf32, #tpu.memory_space<vmem>>, vector<1x32xf32>
    %287 = vector.shape_cast %286 : vector<1x32xf32> to vector<32xf32>
    %288 = vector.shape_cast %285 : vector<32xf32> to vector<1x32xf32>
    tpu.vector_store %arg6[%c17, %c0_71], %288 {strides = array<i32>} : memref<128x32xf32, #tpu.memory_space<vmem>>, vector<1x32xf32>,
    %c18_i32 = arith.constant 18 : i32
    %289 = arith.addi %0, %c18_i32 : i32
    %290 = arith.index_cast %289 : i32 to index
    %291 = memref.load %arg1[%290] : memref<128xi32, #tpu.memory_space<smem>>
    %c18_i32_72 = arith.constant 18 : i32
    %292 = arith.addi %0, %c18_i32_72 : i32
    %293 = arith.index_cast %292 : i32 to index
    %294 = memref.load %arg2[%293] : memref<128xi32, #tpu.memory_space<smem>>
    %295 = arith.index_cast %291 : i32 to index
    %c0_73 = arith.constant 0 : index
    %296 = vector.load %arg3[%295, %c0_73] : memref<64x32xf32, #tpu.memory_space<vmem>>, vector<1x32xf32>
    %297 = vector.shape_cast %296 : vector<1x32xf32> to vector<32xf32>
    %298 = arith.index_cast %294 : i32 to index
    %c0_74 = arith.constant 0 : index
    %299 = vector.load %arg4[%298, %c0_74] : memref<64x32xf32, #tpu.memory_space<vmem>>, vector<1x32xf32>
    %300 = vector.shape_cast %299 : vector<1x32xf32> to vector<32xf32>
    %301 = arith.mulf %297, %300 : vector<32xf32>
    %c18 = arith.constant 18 : index
    %c0_75 = arith.constant 0 : index
    %302 = vector.load %arg6[%c18, %c0_75] : memref<128x32xf32, #tpu.memory_space<vmem>>, vector<1x32xf32>
    %303 = vector.shape_cast %302 : vector<1x32xf32> to vector<32xf32>
    %304 = vector.shape_cast %301 : vector<32xf32> to vector<1x32xf32>
    tpu.vector_store %arg6[%c18, %c0_75], %304 {strides = array<i32>} : memref<128x32xf32, #tpu.memory_space<vmem>>, vector<1x32xf32>,
    %c19_i32 = arith.constant 19 : i32
    %305 = arith.addi %0, %c19_i32 : i32
    %306 = arith.index_cast %305 : i32 to index
    %307 = memref.load %arg1[%306] : memref<128xi32, #tpu.memory_space<smem>>
    %c19_i32_76 = arith.constant 19 : i32
    %308 = arith.addi %0, %c19_i32_76 : i32
    %309 = arith.index_cast %308 : i32 to index
    %310 = memref.load %arg2[%309] : memref<128xi32, #tpu.memory_space<smem>>
    %311 = arith.index_cast %307 : i32 to index
    %c0_77 = arith.constant 0 : index
    %312 = vector.load %arg3[%311, %c0_77] : memref<64x32xf32, #tpu.memory_space<vmem>>, vector<1x32xf32>
    %313 = vector.shape_cast %312 : vector<1x32xf32> to vector<32xf32>
    %314 = arith.index_cast %310 : i32 to index
    %c0_78 = arith.constant 0 : index
    %315 = vector.load %arg4[%314, %c0_78] : memref<64x32xf32, #tpu.memory_space<vmem>>, vector<1x32xf32>
    %316 = vector.shape_cast %315 : vector<1x32xf32> to vector<32xf32>
    %317 = arith.mulf %313, %316 : vector<32xf32>
    %c19 = arith.constant 19 : index
    %c0_79 = arith.constant 0 : index
    %318 = vector.load %arg6[%c19, %c0_79] : memref<128x32xf32, #tpu.memory_space<vmem>>, vector<1x32xf32>
    %319 = vector.shape_cast %318 : vector<1x32xf32> to vector<32xf32>
    %320 = vector.shape_cast %317 : vector<32xf32> to vector<1x32xf32>
    tpu.vector_store %arg6[%c19, %c0_79], %320 {strides = array<i32>} : memref<128x32xf32, #tpu.memory_space<vmem>>, vector<1x32xf32>,
    %c20_i32 = arith.constant 20 : i32
    %321 = arith.addi %0, %c20_i32 : i32
    %322 = arith.index_cast %321 : i32 to index
    %323 = memref.load %arg1[%322] : memref<128xi32, #tpu.memory_space<smem>>
    %c20_i32_80 = arith.constant 20 : i32
    %324 = arith.addi %0, %c20_i32_80 : i32
    %325 = arith.index_cast %324 : i32 to index
    %326 = memref.load %arg2[%325] : memref<128xi32, #tpu.memory_space<smem>>
    %327 = arith.index_cast %323 : i32 to index
    %c0_81 = arith.constant 0 : index
    %328 = vector.load %arg3[%327, %c0_81] : memref<64x32xf32, #tpu.memory_space<vmem>>, vector<1x32xf32>
    %329 = vector.shape_cast %328 : vector<1x32xf32> to vector<32xf32>
    %330 = arith.index_cast %326 : i32 to index
    %c0_82 = arith.constant 0 : index
    %331 = vector.load %arg4[%330, %c0_82] : memref<64x32xf32, #tpu.memory_space<vmem>>, vector<1x32xf32>
    %332 = vector.shape_cast %331 : vector<1x32xf32> to vector<32xf32>
    %333 = arith.mulf %329, %332 : vector<32xf32>
    %c20 = arith.constant 20 : index
    %c0_83 = arith.constant 0 : index
    %334 = vector.load %arg6[%c20, %c0_83] : memref<128x32xf32, #tpu.memory_space<vmem>>, vector<1x32xf32>
    %335 = vector.shape_cast %334 : vector<1x32xf32> to vector<32xf32>
    %336 = vector.shape_cast %333 : vector<32xf32> to vector<1x32xf32>
    tpu.vector_store %arg6[%c20, %c0_83], %336 {strides = array<i32>} : memref<128x32xf32, #tpu.memory_space<vmem>>, vector<1x32xf32>,
    %c21_i32 = arith.constant 21 : i32
    %337 = arith.addi %0, %c21_i32 : i32
    %338 = arith.index_cast %337 : i32 to index
    %339 = memref.load %arg1[%338] : memref<128xi32, #tpu.memory_space<smem>>
    %c21_i32_84 = arith.constant 21 : i32
    %340 = arith.addi %0, %c21_i32_84 : i32
    %341 = arith.index_cast %340 : i32 to index
    %342 = memref.load %arg2[%341] : memref<128xi32, #tpu.memory_space<smem>>
    %343 = arith.index_cast %339 : i32 to index
    %c0_85 = arith.constant 0 : index
    %344 = vector.load %arg3[%343, %c0_85] : memref<64x32xf32, #tpu.memory_space<vmem>>, vector<1x32xf32>
    %345 = vector.shape_cast %344 : vector<1x32xf32> to vector<32xf32>
    %346 = arith.index_cast %342 : i32 to index
    %c0_86 = arith.constant 0 : index
    %347 = vector.load %arg4[%346, %c0_86] : memref<64x32xf32, #tpu.memory_space<vmem>>, vector<1x32xf32>
    %348 = vector.shape_cast %347 : vector<1x32xf32> to vector<32xf32>
    %349 = arith.mulf %345, %348 : vector<32xf32>
    %c21 = arith.constant 21 : index
    %c0_87 = arith.constant 0 : index
    %350 = vector.load %arg6[%c21, %c0_87] : memref<128x32xf32, #tpu.memory_space<vmem>>, vector<1x32xf32>
    %351 = vector.shape_cast %350 : vector<1x32xf32> to vector<32xf32>
    %352 = vector.shape_cast %349 : vector<32xf32> to vector<1x32xf32>
    tpu.vector_store %arg6[%c21, %c0_87], %352 {strides = array<i32>} : memref<128x32xf32, #tpu.memory_space<vmem>>, vector<1x32xf32>,
    %c22_i32 = arith.constant 22 : i32
    %353 = arith.addi %0, %c22_i32 : i32
    %354 = arith.index_cast %353 : i32 to index
    %355 = memref.load %arg1[%354] : memref<128xi32, #tpu.memory_space<smem>>
    %c22_i32_88 = arith.constant 22 : i32
    %356 = arith.addi %0, %c22_i32_88 : i32
    %357 = arith.index_cast %356 : i32 to index
    %358 = memref.load %arg2[%357] : memref<128xi32, #tpu.memory_space<smem>>
    %359 = arith.index_cast %355 : i32 to index
    %c0_89 = arith.constant 0 : index
    %360 = vector.load %arg3[%359, %c0_89] : memref<64x32xf32, #tpu.memory_space<vmem>>, vector<1x32xf32>
    %361 = vector.shape_cast %360 : vector<1x32xf32> to vector<32xf32>
    %362 = arith.index_cast %358 : i32 to index
    %c0_90 = arith.constant 0 : index
    %363 = vector.load %arg4[%362, %c0_90] : memref<64x32xf32, #tpu.memory_space<vmem>>, vector<1x32xf32>
    %364 = vector.shape_cast %363 : vector<1x32xf32> to vector<32xf32>
    %365 = arith.mulf %361, %364 : vector<32xf32>
    %c22 = arith.constant 22 : index
    %c0_91 = arith.constant 0 : index
    %366 = vector.load %arg6[%c22, %c0_91] : memref<128x32xf32, #tpu.memory_space<vmem>>, vector<1x32xf32>
    %367 = vector.shape_cast %366 : vector<1x32xf32> to vector<32xf32>
    %368 = vector.shape_cast %365 : vector<32xf32> to vector<1x32xf32>
    tpu.vector_store %arg6[%c22, %c0_91], %368 {strides = array<i32>} : memref<128x32xf32, #tpu.memory_space<vmem>>, vector<1x32xf32>,
    %c23_i32 = arith.constant 23 : i32
    %369 = arith.addi %0, %c23_i32 : i32
    %370 = arith.index_cast %369 : i32 to index
    %371 = memref.load %arg1[%370] : memref<128xi32, #tpu.memory_space<smem>>
    %c23_i32_92 = arith.constant 23 : i32
    %372 = arith.addi %0, %c23_i32_92 : i32
    %373 = arith.index_cast %372 : i32 to index
    %374 = memref.load %arg2[%373] : memref<128xi32, #tpu.memory_space<smem>>
    %375 = arith.index_cast %371 : i32 to index
    %c0_93 = arith.constant 0 : index
    %376 = vector.load %arg3[%375, %c0_93] : memref<64x32xf32, #tpu.memory_space<vmem>>, vector<1x32xf32>
    %377 = vector.shape_cast %376 : vector<1x32xf32> to vector<32xf32>
    %378 = arith.index_cast %374 : i32 to index
    %c0_94 = arith.constant 0 : index
    %379 = vector.load %arg4[%378, %c0_94] : memref<64x32xf32, #tpu.memory_space<vmem>>, vector<1x32xf32>
    %380 = vector.shape_cast %379 : vector<1x32xf32> to vector<32xf32>
    %381 = arith.mulf %377, %380 : vector<32xf32>
    %c23 = arith.constant 23 : index
    %c0_95 = arith.constant 0 : index
    %382 = vector.load %arg6[%c23, %c0_95] : memref<128x32xf32, #tpu.memory_space<vmem>>, vector<1x32xf32>
    %383 = vector.shape_cast %382 : vector<1x32xf32> to vector<32xf32>
    %384 = vector.shape_cast %381 : vector<32xf32> to vector<1x32xf32>
    tpu.vector_store %arg6[%c23, %c0_95], %384 {strides = array<i32>} : memref<128x32xf32, #tpu.memory_space<vmem>>, vector<1x32xf32>,
    %c24_i32 = arith.constant 24 : i32
    %385 = arith.addi %0, %c24_i32 : i32
    %386 = arith.index_cast %385 : i32 to index
    %387 = memref.load %arg1[%386] : memref<128xi32, #tpu.memory_space<smem>>
    %c24_i32_96 = arith.constant 24 : i32
    %388 = arith.addi %0, %c24_i32_96 : i32
    %389 = arith.index_cast %388 : i32 to index
    %390 = memref.load %arg2[%389] : memref<128xi32, #tpu.memory_space<smem>>
    %391 = arith.index_cast %387 : i32 to index
    %c0_97 = arith.constant 0 : index
    %392 = vector.load %arg3[%391, %c0_97] : memref<64x32xf32, #tpu.memory_space<vmem>>, vector<1x32xf32>
    %393 = vector.shape_cast %392 : vector<1x32xf32> to vector<32xf32>
    %394 = arith.index_cast %390 : i32 to index
    %c0_98 = arith.constant 0 : index
    %395 = vector.load %arg4[%394, %c0_98] : memref<64x32xf32, #tpu.memory_space<vmem>>, vector<1x32xf32>
    %396 = vector.shape_cast %395 : vector<1x32xf32> to vector<32xf32>
    %397 = arith.mulf %393, %396 : vector<32xf32>
    %c24 = arith.constant 24 : index
    %c0_99 = arith.constant 0 : index
    %398 = vector.load %arg6[%c24, %c0_99] : memref<128x32xf32, #tpu.memory_space<vmem>>, vector<1x32xf32>
    %399 = vector.shape_cast %398 : vector<1x32xf32> to vector<32xf32>
    %400 = vector.shape_cast %397 : vector<32xf32> to vector<1x32xf32>
    tpu.vector_store %arg6[%c24, %c0_99], %400 {strides = array<i32>} : memref<128x32xf32, #tpu.memory_space<vmem>>, vector<1x32xf32>,
    %c25_i32 = arith.constant 25 : i32
    %401 = arith.addi %0, %c25_i32 : i32
    %402 = arith.index_cast %401 : i32 to index
    %403 = memref.load %arg1[%402] : memref<128xi32, #tpu.memory_space<smem>>
    %c25_i32_100 = arith.constant 25 : i32
    %404 = arith.addi %0, %c25_i32_100 : i32
    %405 = arith.index_cast %404 : i32 to index
    %406 = memref.load %arg2[%405] : memref<128xi32, #tpu.memory_space<smem>>
    %407 = arith.index_cast %403 : i32 to index
    %c0_101 = arith.constant 0 : index
    %408 = vector.load %arg3[%407, %c0_101] : memref<64x32xf32, #tpu.memory_space<vmem>>, vector<1x32xf32>
    %409 = vector.shape_cast %408 : vector<1x32xf32> to vector<32xf32>
    %410 = arith.index_cast %406 : i32 to index
    %c0_102 = arith.constant 0 : index
    %411 = vector.load %arg4[%410, %c0_102] : memref<64x32xf32, #tpu.memory_space<vmem>>, vector<1x32xf32>
    %412 = vector.shape_cast %411 : vector<1x32xf32> to vector<32xf32>
    %413 = arith.mulf %409, %412 : vector<32xf32>
    %c25 = arith.constant 25 : index
    %c0_103 = arith.constant 0 : index
    %414 = vector.load %arg6[%c25, %c0_103] : memref<128x32xf32, #tpu.memory_space<vmem>>, vector<1x32xf32>
    %415 = vector.shape_cast %414 : vector<1x32xf32> to vector<32xf32>
    %416 = vector.shape_cast %413 : vector<32xf32> to vector<1x32xf32>
    tpu.vector_store %arg6[%c25, %c0_103], %416 {strides = array<i32>} : memref<128x32xf32, #tpu.memory_space<vmem>>, vector<1x32xf32>,
    %c26_i32 = arith.constant 26 : i32
    %417 = arith.addi %0, %c26_i32 : i32
    %418 = arith.index_cast %417 : i32 to index
    %419 = memref.load %arg1[%418] : memref<128xi32, #tpu.memory_space<smem>>
    %c26_i32_104 = arith.constant 26 : i32
    %420 = arith.addi %0, %c26_i32_104 : i32
    %421 = arith.index_cast %420 : i32 to index
    %422 = memref.load %arg2[%421] : memref<128xi32, #tpu.memory_space<smem>>
    %423 = arith.index_cast %419 : i32 to index
    %c0_105 = arith.constant 0 : index
    %424 = vector.load %arg3[%423, %c0_105] : memref<64x32xf32, #tpu.memory_space<vmem>>, vector<1x32xf32>
    %425 = vector.shape_cast %424 : vector<1x32xf32> to vector<32xf32>
    %426 = arith.index_cast %422 : i32 to index
    %c0_106 = arith.constant 0 : index
    %427 = vector.load %arg4[%426, %c0_106] : memref<64x32xf32, #tpu.memory_space<vmem>>, vector<1x32xf32>
    %428 = vector.shape_cast %427 : vector<1x32xf32> to vector<32xf32>
    %429 = arith.mulf %425, %428 : vector<32xf32>
    %c26 = arith.constant 26 : index
    %c0_107 = arith.constant 0 : index
    %430 = vector.load %arg6[%c26, %c0_107] : memref<128x32xf32, #tpu.memory_space<vmem>>, vector<1x32xf32>
    %431 = vector.shape_cast %430 : vector<1x32xf32> to vector<32xf32>
    %432 = vector.shape_cast %429 : vector<32xf32> to vector<1x32xf32>
    tpu.vector_store %arg6[%c26, %c0_107], %432 {strides = array<i32>} : memref<128x32xf32, #tpu.memory_space<vmem>>, vector<1x32xf32>,
    %c27_i32 = arith.constant 27 : i32
    %433 = arith.addi %0, %c27_i32 : i32
    %434 = arith.index_cast %433 : i32 to index
    %435 = memref.load %arg1[%434] : memref<128xi32, #tpu.memory_space<smem>>
    %c27_i32_108 = arith.constant 27 : i32
    %436 = arith.addi %0, %c27_i32_108 : i32
    %437 = arith.index_cast %436 : i32 to index
    %438 = memref.load %arg2[%437] : memref<128xi32, #tpu.memory_space<smem>>
    %439 = arith.index_cast %435 : i32 to index
    %c0_109 = arith.constant 0 : index
    %440 = vector.load %arg3[%439, %c0_109] : memref<64x32xf32, #tpu.memory_space<vmem>>, vector<1x32xf32>
    %441 = vector.shape_cast %440 : vector<1x32xf32> to vector<32xf32>
    %442 = arith.index_cast %438 : i32 to index
    %c0_110 = arith.constant 0 : index
    %443 = vector.load %arg4[%442, %c0_110] : memref<64x32xf32, #tpu.memory_space<vmem>>, vector<1x32xf32>
    %444 = vector.shape_cast %443 : vector<1x32xf32> to vector<32xf32>
    %445 = arith.mulf %441, %444 : vector<32xf32>
    %c27 = arith.constant 27 : index
    %c0_111 = arith.constant 0 : index
    %446 = vector.load %arg6[%c27, %c0_111] : memref<128x32xf32, #tpu.memory_space<vmem>>, vector<1x32xf32>
    %447 = vector.shape_cast %446 : vector<1x32xf32> to vector<32xf32>
    %448 = vector.shape_cast %445 : vector<32xf32> to vector<1x32xf32>
    tpu.vector_store %arg6[%c27, %c0_111], %448 {strides = array<i32>} : memref<128x32xf32, #tpu.memory_space<vmem>>, vector<1x32xf32>,
    %c28_i32 = arith.constant 28 : i32
    %449 = arith.addi %0, %c28_i32 : i32
    %450 = arith.index_cast %449 : i32 to index
    %451 = memref.load %arg1[%450] : memref<128xi32, #tpu.memory_space<smem>>
    %c28_i32_112 = arith.constant 28 : i32
    %452 = arith.addi %0, %c28_i32_112 : i32
    %453 = arith.index_cast %452 : i32 to index
    %454 = memref.load %arg2[%453] : memref<128xi32, #tpu.memory_space<smem>>
    %455 = arith.index_cast %451 : i32 to index
    %c0_113 = arith.constant 0 : index
    %456 = vector.load %arg3[%455, %c0_113] : memref<64x32xf32, #tpu.memory_space<vmem>>, vector<1x32xf32>
    %457 = vector.shape_cast %456 : vector<1x32xf32> to vector<32xf32>
    %458 = arith.index_cast %454 : i32 to index
    %c0_114 = arith.constant 0 : index
    %459 = vector.load %arg4[%458, %c0_114] : memref<64x32xf32, #tpu.memory_space<vmem>>, vector<1x32xf32>
    %460 = vector.shape_cast %459 : vector<1x32xf32> to vector<32xf32>
    %461 = arith.mulf %457, %460 : vector<32xf32>
    %c28 = arith.constant 28 : index
    %c0_115 = arith.constant 0 : index
    %462 = vector.load %arg6[%c28, %c0_115] : memref<128x32xf32, #tpu.memory_space<vmem>>, vector<1x32xf32>
    %463 = vector.shape_cast %462 : vector<1x32xf32> to vector<32xf32>
    %464 = vector.shape_cast %461 : vector<32xf32> to vector<1x32xf32>
    tpu.vector_store %arg6[%c28, %c0_115], %464 {strides = array<i32>} : memref<128x32xf32, #tpu.memory_space<vmem>>, vector<1x32xf32>,
    %c29_i32 = arith.constant 29 : i32
    %465 = arith.addi %0, %c29_i32 : i32
    %466 = arith.index_cast %465 : i32 to index
    %467 = memref.load %arg1[%466] : memref<128xi32, #tpu.memory_space<smem>>
    %c29_i32_116 = arith.constant 29 : i32
    %468 = arith.addi %0, %c29_i32_116 : i32
    %469 = arith.index_cast %468 : i32 to index
    %470 = memref.load %arg2[%469] : memref<128xi32, #tpu.memory_space<smem>>
    %471 = arith.index_cast %467 : i32 to index
    %c0_117 = arith.constant 0 : index
    %472 = vector.load %arg3[%471, %c0_117] : memref<64x32xf32, #tpu.memory_space<vmem>>, vector<1x32xf32>
    %473 = vector.shape_cast %472 : vector<1x32xf32> to vector<32xf32>
    %474 = arith.index_cast %470 : i32 to index
    %c0_118 = arith.constant 0 : index
    %475 = vector.load %arg4[%474, %c0_118] : memref<64x32xf32, #tpu.memory_space<vmem>>, vector<1x32xf32>
    %476 = vector.shape_cast %475 : vector<1x32xf32> to vector<32xf32>
    %477 = arith.mulf %473, %476 : vector<32xf32>
    %c29 = arith.constant 29 : index
    %c0_119 = arith.constant 0 : index
    %478 = vector.load %arg6[%c29, %c0_119] : memref<128x32xf32, #tpu.memory_space<vmem>>, vector<1x32xf32>
    %479 = vector.shape_cast %478 : vector<1x32xf32> to vector<32xf32>
    %480 = vector.shape_cast %477 : vector<32xf32> to vector<1x32xf32>
    tpu.vector_store %arg6[%c29, %c0_119], %480 {strides = array<i32>} : memref<128x32xf32, #tpu.memory_space<vmem>>, vector<1x32xf32>,
    %c30_i32 = arith.constant 30 : i32
    %481 = arith.addi %0, %c30_i32 : i32
    %482 = arith.index_cast %481 : i32 to index
    %483 = memref.load %arg1[%482] : memref<128xi32, #tpu.memory_space<smem>>
    %c30_i32_120 = arith.constant 30 : i32
    %484 = arith.addi %0, %c30_i32_120 : i32
    %485 = arith.index_cast %484 : i32 to index
    %486 = memref.load %arg2[%485] : memref<128xi32, #tpu.memory_space<smem>>
    %487 = arith.index_cast %483 : i32 to index
    %c0_121 = arith.constant 0 : index
    %488 = vector.load %arg3[%487, %c0_121] : memref<64x32xf32, #tpu.memory_space<vmem>>, vector<1x32xf32>
    %489 = vector.shape_cast %488 : vector<1x32xf32> to vector<32xf32>
    %490 = arith.index_cast %486 : i32 to index
    %c0_122 = arith.constant 0 : index
    %491 = vector.load %arg4[%490, %c0_122] : memref<64x32xf32, #tpu.memory_space<vmem>>, vector<1x32xf32>
    %492 = vector.shape_cast %491 : vector<1x32xf32> to vector<32xf32>
    %493 = arith.mulf %489, %492 : vector<32xf32>
    %c30 = arith.constant 30 : index
    %c0_123 = arith.constant 0 : index
    %494 = vector.load %arg6[%c30, %c0_123] : memref<128x32xf32, #tpu.memory_space<vmem>>, vector<1x32xf32>
    %495 = vector.shape_cast %494 : vector<1x32xf32> to vector<32xf32>
    %496 = vector.shape_cast %493 : vector<32xf32> to vector<1x32xf32>
    tpu.vector_store %arg6[%c30, %c0_123], %496 {strides = array<i32>} : memref<128x32xf32, #tpu.memory_space<vmem>>, vector<1x32xf32>,
    %c31_i32 = arith.constant 31 : i32
    %497 = arith.addi %0, %c31_i32 : i32
    %498 = arith.index_cast %497 : i32 to index
    %499 = memref.load %arg1[%498] : memref<128xi32, #tpu.memory_space<smem>>
    %c31_i32_124 = arith.constant 31 : i32
    %500 = arith.addi %0, %c31_i32_124 : i32
    %501 = arith.index_cast %500 : i32 to index
    %502 = memref.load %arg2[%501] : memref<128xi32, #tpu.memory_space<smem>>
    %503 = arith.index_cast %499 : i32 to index
    %c0_125 = arith.constant 0 : index
    %504 = vector.load %arg3[%503, %c0_125] : memref<64x32xf32, #tpu.memory_space<vmem>>, vector<1x32xf32>
    %505 = vector.shape_cast %504 : vector<1x32xf32> to vector<32xf32>
    %506 = arith.index_cast %502 : i32 to index
    %c0_126 = arith.constant 0 : index
    %507 = vector.load %arg4[%506, %c0_126] : memref<64x32xf32, #tpu.memory_space<vmem>>, vector<1x32xf32>
    %508 = vector.shape_cast %507 : vector<1x32xf32> to vector<32xf32>
    %509 = arith.mulf %505, %508 : vector<32xf32>
    %c31 = arith.constant 31 : index
    %c0_127 = arith.constant 0 : index
    %510 = vector.load %arg6[%c31, %c0_127] : memref<128x32xf32, #tpu.memory_space<vmem>>, vector<1x32xf32>
    %511 = vector.shape_cast %510 : vector<1x32xf32> to vector<32xf32>
    %512 = vector.shape_cast %509 : vector<32xf32> to vector<1x32xf32>
    tpu.vector_store %arg6[%c31, %c0_127], %512 {strides = array<i32>} : memref<128x32xf32, #tpu.memory_space<vmem>>, vector<1x32xf32>,
    %c32_i32 = arith.constant 32 : i32
    %513 = arith.addi %0, %c32_i32 : i32
    %514 = arith.index_cast %513 : i32 to index
    %515 = memref.load %arg1[%514] : memref<128xi32, #tpu.memory_space<smem>>
    %c32_i32_128 = arith.constant 32 : i32
    %516 = arith.addi %0, %c32_i32_128 : i32
    %517 = arith.index_cast %516 : i32 to index
    %518 = memref.load %arg2[%517] : memref<128xi32, #tpu.memory_space<smem>>
    %519 = arith.index_cast %515 : i32 to index
    %c0_129 = arith.constant 0 : index
    %520 = vector.load %arg3[%519, %c0_129] : memref<64x32xf32, #tpu.memory_space<vmem>>, vector<1x32xf32>
    %521 = vector.shape_cast %520 : vector<1x32xf32> to vector<32xf32>
    %522 = arith.index_cast %518 : i32 to index
    %c0_130 = arith.constant 0 : index
    %523 = vector.load %arg4[%522, %c0_130] : memref<64x32xf32, #tpu.memory_space<vmem>>, vector<1x32xf32>
    %524 = vector.shape_cast %523 : vector<1x32xf32> to vector<32xf32>
    %525 = arith.mulf %521, %524 : vector<32xf32>
    %c32 = arith.constant 32 : index
    %c0_131 = arith.constant 0 : index
    %526 = vector.load %arg6[%c32, %c0_131] : memref<128x32xf32, #tpu.memory_space<vmem>>, vector<1x32xf32>
    %527 = vector.shape_cast %526 : vector<1x32xf32> to vector<32xf32>
    %528 = vector.shape_cast %525 : vector<32xf32> to vector<1x32xf32>
    tpu.vector_store %arg6[%c32, %c0_131], %528 {strides = array<i32>} : memref<128x32xf32, #tpu.memory_space<vmem>>, vector<1x32xf32>,
    %c33_i32 = arith.constant 33 : i32
    %529 = arith.addi %0, %c33_i32 : i32
    %530 = arith.index_cast %529 : i32 to index
    %531 = memref.load %arg1[%530] : memref<128xi32, #tpu.memory_space<smem>>
    %c33_i32_132 = arith.constant 33 : i32
    %532 = arith.addi %0, %c33_i32_132 : i32
    %533 = arith.index_cast %532 : i32 to index
    %534 = memref.load %arg2[%533] : memref<128xi32, #tpu.memory_space<smem>>
    %535 = arith.index_cast %531 : i32 to index
    %c0_133 = arith.constant 0 : index
    %536 = vector.load %arg3[%535, %c0_133] : memref<64x32xf32, #tpu.memory_space<vmem>>, vector<1x32xf32>
    %537 = vector.shape_cast %536 : vector<1x32xf32> to vector<32xf32>
    %538 = arith.index_cast %534 : i32 to index
    %c0_134 = arith.constant 0 : index
    %539 = vector.load %arg4[%538, %c0_134] : memref<64x32xf32, #tpu.memory_space<vmem>>, vector<1x32xf32>
    %540 = vector.shape_cast %539 : vector<1x32xf32> to vector<32xf32>
    %541 = arith.mulf %537, %540 : vector<32xf32>
    %c33 = arith.constant 33 : index
    %c0_135 = arith.constant 0 : index
    %542 = vector.load %arg6[%c33, %c0_135] : memref<128x32xf32, #tpu.memory_space<vmem>>, vector<1x32xf32>
    %543 = vector.shape_cast %542 : vector<1x32xf32> to vector<32xf32>
    %544 = vector.shape_cast %541 : vector<32xf32> to vector<1x32xf32>
    tpu.vector_store %arg6[%c33, %c0_135], %544 {strides = array<i32>} : memref<128x32xf32, #tpu.memory_space<vmem>>, vector<1x32xf32>,
    %c34_i32 = arith.constant 34 : i32
    %545 = arith.addi %0, %c34_i32 : i32
    %546 = arith.index_cast %545 : i32 to index
    %547 = memref.load %arg1[%546] : memref<128xi32, #tpu.memory_space<smem>>
    %c34_i32_136 = arith.constant 34 : i32
    %548 = arith.addi %0, %c34_i32_136 : i32
    %549 = arith.index_cast %548 : i32 to index
    %550 = memref.load %arg2[%549] : memref<128xi32, #tpu.memory_space<smem>>
    %551 = arith.index_cast %547 : i32 to index
    %c0_137 = arith.constant 0 : index
    %552 = vector.load %arg3[%551, %c0_137] : memref<64x32xf32, #tpu.memory_space<vmem>>, vector<1x32xf32>
    %553 = vector.shape_cast %552 : vector<1x32xf32> to vector<32xf32>
    %554 = arith.index_cast %550 : i32 to index
    %c0_138 = arith.constant 0 : index
    %555 = vector.load %arg4[%554, %c0_138] : memref<64x32xf32, #tpu.memory_space<vmem>>, vector<1x32xf32>
    %556 = vector.shape_cast %555 : vector<1x32xf32> to vector<32xf32>
    %557 = arith.mulf %553, %556 : vector<32xf32>
    %c34 = arith.constant 34 : index
    %c0_139 = arith.constant 0 : index
    %558 = vector.load %arg6[%c34, %c0_139] : memref<128x32xf32, #tpu.memory_space<vmem>>, vector<1x32xf32>
    %559 = vector.shape_cast %558 : vector<1x32xf32> to vector<32xf32>
    %560 = vector.shape_cast %557 : vector<32xf32> to vector<1x32xf32>
    tpu.vector_store %arg6[%c34, %c0_139], %560 {strides = array<i32>} : memref<128x32xf32, #tpu.memory_space<vmem>>, vector<1x32xf32>,
    %c35_i32 = arith.constant 35 : i32
    %561 = arith.addi %0, %c35_i32 : i32
    %562 = arith.index_cast %561 : i32 to index
    %563 = memref.load %arg1[%562] : memref<128xi32, #tpu.memory_space<smem>>
    %c35_i32_140 = arith.constant 35 : i32
    %564 = arith.addi %0, %c35_i32_140 : i32
    %565 = arith.index_cast %564 : i32 to index
    %566 = memref.load %arg2[%565] : memref<128xi32, #tpu.memory_space<smem>>
    %567 = arith.index_cast %563 : i32 to index
    %c0_141 = arith.constant 0 : index
    %568 = vector.load %arg3[%567, %c0_141] : memref<64x32xf32, #tpu.memory_space<vmem>>, vector<1x32xf32>
    %569 = vector.shape_cast %568 : vector<1x32xf32> to vector<32xf32>
    %570 = arith.index_cast %566 : i32 to index
    %c0_142 = arith.constant 0 : index
    %571 = vector.load %arg4[%570, %c0_142] : memref<64x32xf32, #tpu.memory_space<vmem>>, vector<1x32xf32>
    %572 = vector.shape_cast %571 : vector<1x32xf32> to vector<32xf32>
    %573 = arith.mulf %569, %572 : vector<32xf32>
    %c35 = arith.constant 35 : index
    %c0_143 = arith.constant 0 : index
    %574 = vector.load %arg6[%c35, %c0_143] : memref<128x32xf32, #tpu.memory_space<vmem>>, vector<1x32xf32>
    %575 = vector.shape_cast %574 : vector<1x32xf32> to vector<32xf32>
    %576 = vector.shape_cast %573 : vector<32xf32> to vector<1x32xf32>
    tpu.vector_store %arg6[%c35, %c0_143], %576 {strides = array<i32>} : memref<128x32xf32, #tpu.memory_space<vmem>>, vector<1x32xf32>,
    %c36_i32 = arith.constant 36 : i32
    %577 = arith.addi %0, %c36_i32 : i32
    %578 = arith.index_cast %577 : i32 to index
    %579 = memref.load %arg1[%578] : memref<128xi32, #tpu.memory_space<smem>>
    %c36_i32_144 = arith.constant 36 : i32
    %580 = arith.addi %0, %c36_i32_144 : i32
    %581 = arith.index_cast %580 : i32 to index
    %582 = memref.load %arg2[%581] : memref<128xi32, #tpu.memory_space<smem>>
    %583 = arith.index_cast %579 : i32 to index
    %c0_145 = arith.constant 0 : index
    %584 = vector.load %arg3[%583, %c0_145] : memref<64x32xf32, #tpu.memory_space<vmem>>, vector<1x32xf32>
    %585 = vector.shape_cast %584 : vector<1x32xf32> to vector<32xf32>
    %586 = arith.index_cast %582 : i32 to index
    %c0_146 = arith.constant 0 : index
    %587 = vector.load %arg4[%586, %c0_146] : memref<64x32xf32, #tpu.memory_space<vmem>>, vector<1x32xf32>
    %588 = vector.shape_cast %587 : vector<1x32xf32> to vector<32xf32>
    %589 = arith.mulf %585, %588 : vector<32xf32>
    %c36 = arith.constant 36 : index
    %c0_147 = arith.constant 0 : index
    %590 = vector.load %arg6[%c36, %c0_147] : memref<128x32xf32, #tpu.memory_space<vmem>>, vector<1x32xf32>
    %591 = vector.shape_cast %590 : vector<1x32xf32> to vector<32xf32>
    %592 = vector.shape_cast %589 : vector<32xf32> to vector<1x32xf32>
    tpu.vector_store %arg6[%c36, %c0_147], %592 {strides = array<i32>} : memref<128x32xf32, #tpu.memory_space<vmem>>, vector<1x32xf32>,
    %c37_i32 = arith.constant 37 : i32
    %593 = arith.addi %0, %c37_i32 : i32
    %594 = arith.index_cast %593 : i32 to index
    %595 = memref.load %arg1[%594] : memref<128xi32, #tpu.memory_space<smem>>
    %c37_i32_148 = arith.constant 37 : i32
    %596 = arith.addi %0, %c37_i32_148 : i32
    %597 = arith.index_cast %596 : i32 to index
    %598 = memref.load %arg2[%597] : memref<128xi32, #tpu.memory_space<smem>>
    %599 = arith.index_cast %595 : i32 to index
    %c0_149 = arith.constant 0 : index
    %600 = vector.load %arg3[%599, %c0_149] : memref<64x32xf32, #tpu.memory_space<vmem>>, vector<1x32xf32>
    %601 = vector.shape_cast %600 : vector<1x32xf32> to vector<32xf32>
    %602 = arith.index_cast %598 : i32 to index
    %c0_150 = arith.constant 0 : index
    %603 = vector.load %arg4[%602, %c0_150] : memref<64x32xf32, #tpu.memory_space<vmem>>, vector<1x32xf32>
    %604 = vector.shape_cast %603 : vector<1x32xf32> to vector<32xf32>
    %605 = arith.mulf %601, %604 : vector<32xf32>
    %c37 = arith.constant 37 : index
    %c0_151 = arith.constant 0 : index
    %606 = vector.load %arg6[%c37, %c0_151] : memref<128x32xf32, #tpu.memory_space<vmem>>, vector<1x32xf32>
    %607 = vector.shape_cast %606 : vector<1x32xf32> to vector<32xf32>
    %608 = vector.shape_cast %605 : vector<32xf32> to vector<1x32xf32>
    tpu.vector_store %arg6[%c37, %c0_151], %608 {strides = array<i32>} : memref<128x32xf32, #tpu.memory_space<vmem>>, vector<1x32xf32>,
    %c38_i32 = arith.constant 38 : i32
    %609 = arith.addi %0, %c38_i32 : i32
    %610 = arith.index_cast %609 : i32 to index
    %611 = memref.load %arg1[%610] : memref<128xi32, #tpu.memory_space<smem>>
    %c38_i32_152 = arith.constant 38 : i32
    %612 = arith.addi %0, %c38_i32_152 : i32
    %613 = arith.index_cast %612 : i32 to index
    %614 = memref.load %arg2[%613] : memref<128xi32, #tpu.memory_space<smem>>
    %615 = arith.index_cast %611 : i32 to index
    %c0_153 = arith.constant 0 : index
    %616 = vector.load %arg3[%615, %c0_153] : memref<64x32xf32, #tpu.memory_space<vmem>>, vector<1x32xf32>
    %617 = vector.shape_cast %616 : vector<1x32xf32> to vector<32xf32>
    %618 = arith.index_cast %614 : i32 to index
    %c0_154 = arith.constant 0 : index
    %619 = vector.load %arg4[%618, %c0_154] : memref<64x32xf32, #tpu.memory_space<vmem>>, vector<1x32xf32>
    %620 = vector.shape_cast %619 : vector<1x32xf32> to vector<32xf32>
    %621 = arith.mulf %617, %620 : vector<32xf32>
    %c38 = arith.constant 38 : index
    %c0_155 = arith.constant 0 : index
    %622 = vector.load %arg6[%c38, %c0_155] : memref<128x32xf32, #tpu.memory_space<vmem>>, vector<1x32xf32>
    %623 = vector.shape_cast %622 : vector<1x32xf32> to vector<32xf32>
    %624 = vector.shape_cast %621 : vector<32xf32> to vector<1x32xf32>
    tpu.vector_store %arg6[%c38, %c0_155], %624 {strides = array<i32>} : memref<128x32xf32, #tpu.memory_space<vmem>>, vector<1x32xf32>,
    %c39_i32 = arith.constant 39 : i32
    %625 = arith.addi %0, %c39_i32 : i32
    %626 = arith.index_cast %625 : i32 to index
    %627 = memref.load %arg1[%626] : memref<128xi32, #tpu.memory_space<smem>>
    %c39_i32_156 = arith.constant 39 : i32
    %628 = arith.addi %0, %c39_i32_156 : i32
    %629 = arith.index_cast %628 : i32 to index
    %630 = memref.load %arg2[%629] : memref<128xi32, #tpu.memory_space<smem>>
    %631 = arith.index_cast %627 : i32 to index
    %c0_157 = arith.constant 0 : index
    %632 = vector.load %arg3[%631, %c0_157] : memref<64x32xf32, #tpu.memory_space<vmem>>, vector<1x32xf32>
    %633 = vector.shape_cast %632 : vector<1x32xf32> to vector<32xf32>
    %634 = arith.index_cast %630 : i32 to index
    %c0_158 = arith.constant 0 : index
    %635 = vector.load %arg4[%634, %c0_158] : memref<64x32xf32, #tpu.memory_space<vmem>>, vector<1x32xf32>
    %636 = vector.shape_cast %635 : vector<1x32xf32> to vector<32xf32>
    %637 = arith.mulf %633, %636 : vector<32xf32>
    %c39 = arith.constant 39 : index
    %c0_159 = arith.constant 0 : index
    %638 = vector.load %arg6[%c39, %c0_159] : memref<128x32xf32, #tpu.memory_space<vmem>>, vector<1x32xf32>
    %639 = vector.shape_cast %638 : vector<1x32xf32> to vector<32xf32>
    %640 = vector.shape_cast %637 : vector<32xf32> to vector<1x32xf32>
    tpu.vector_store %arg6[%c39, %c0_159], %640 {strides = array<i32>} : memref<128x32xf32, #tpu.memory_space<vmem>>, vector<1x32xf32>,
    %c40_i32 = arith.constant 40 : i32
    %641 = arith.addi %0, %c40_i32 : i32
    %642 = arith.index_cast %641 : i32 to index
    %643 = memref.load %arg1[%642] : memref<128xi32, #tpu.memory_space<smem>>
    %c40_i32_160 = arith.constant 40 : i32
    %644 = arith.addi %0, %c40_i32_160 : i32
    %645 = arith.index_cast %644 : i32 to index
    %646 = memref.load %arg2[%645] : memref<128xi32, #tpu.memory_space<smem>>
    %647 = arith.index_cast %643 : i32 to index
    %c0_161 = arith.constant 0 : index
    %648 = vector.load %arg3[%647, %c0_161] : memref<64x32xf32, #tpu.memory_space<vmem>>, vector<1x32xf32>
    %649 = vector.shape_cast %648 : vector<1x32xf32> to vector<32xf32>
    %650 = arith.index_cast %646 : i32 to index
    %c0_162 = arith.constant 0 : index
    %651 = vector.load %arg4[%650, %c0_162] : memref<64x32xf32, #tpu.memory_space<vmem>>, vector<1x32xf32>
    %652 = vector.shape_cast %651 : vector<1x32xf32> to vector<32xf32>
    %653 = arith.mulf %649, %652 : vector<32xf32>
    %c40 = arith.constant 40 : index
    %c0_163 = arith.constant 0 : index
    %654 = vector.load %arg6[%c40, %c0_163] : memref<128x32xf32, #tpu.memory_space<vmem>>, vector<1x32xf32>
    %655 = vector.shape_cast %654 : vector<1x32xf32> to vector<32xf32>
    %656 = vector.shape_cast %653 : vector<32xf32> to vector<1x32xf32>
    tpu.vector_store %arg6[%c40, %c0_163], %656 {strides = array<i32>} : memref<128x32xf32, #tpu.memory_space<vmem>>, vector<1x32xf32>,
    %c41_i32 = arith.constant 41 : i32
    %657 = arith.addi %0, %c41_i32 : i32
    %658 = arith.index_cast %657 : i32 to index
    %659 = memref.load %arg1[%658] : memref<128xi32, #tpu.memory_space<smem>>
    %c41_i32_164 = arith.constant 41 : i32
    %660 = arith.addi %0, %c41_i32_164 : i32
    %661 = arith.index_cast %660 : i32 to index
    %662 = memref.load %arg2[%661] : memref<128xi32, #tpu.memory_space<smem>>
    %663 = arith.index_cast %659 : i32 to index
    %c0_165 = arith.constant 0 : index
    %664 = vector.load %arg3[%663, %c0_165] : memref<64x32xf32, #tpu.memory_space<vmem>>, vector<1x32xf32>
    %665 = vector.shape_cast %664 : vector<1x32xf32> to vector<32xf32>
    %666 = arith.index_cast %662 : i32 to index
    %c0_166 = arith.constant 0 : index
    %667 = vector.load %arg4[%666, %c0_166] : memref<64x32xf32, #tpu.memory_space<vmem>>, vector<1x32xf32>
    %668 = vector.shape_cast %667 : vector<1x32xf32> to vector<32xf32>
    %669 = arith.mulf %665, %668 : vector<32xf32>
    %c41 = arith.constant 41 : index
    %c0_167 = arith.constant 0 : index
    %670 = vector.load %arg6[%c41, %c0_167] : memref<128x32xf32, #tpu.memory_space<vmem>>, vector<1x32xf32>
    %671 = vector.shape_cast %670 : vector<1x32xf32> to vector<32xf32>
    %672 = vector.shape_cast %669 : vector<32xf32> to vector<1x32xf32>
    tpu.vector_store %arg6[%c41, %c0_167], %672 {strides = array<i32>} : memref<128x32xf32, #tpu.memory_space<vmem>>, vector<1x32xf32>,
    %c42_i32 = arith.constant 42 : i32
    %673 = arith.addi %0, %c42_i32 : i32
    %674 = arith.index_cast %673 : i32 to index
    %675 = memref.load %arg1[%674] : memref<128xi32, #tpu.memory_space<smem>>
    %c42_i32_168 = arith.constant 42 : i32
    %676 = arith.addi %0, %c42_i32_168 : i32
    %677 = arith.index_cast %676 : i32 to index
    %678 = memref.load %arg2[%677] : memref<128xi32, #tpu.memory_space<smem>>
    %679 = arith.index_cast %675 : i32 to index
    %c0_169 = arith.constant 0 : index
    %680 = vector.load %arg3[%679, %c0_169] : memref<64x32xf32, #tpu.memory_space<vmem>>, vector<1x32xf32>
    %681 = vector.shape_cast %680 : vector<1x32xf32> to vector<32xf32>
    %682 = arith.index_cast %678 : i32 to index
    %c0_170 = arith.constant 0 : index
    %683 = vector.load %arg4[%682, %c0_170] : memref<64x32xf32, #tpu.memory_space<vmem>>, vector<1x32xf32>
    %684 = vector.shape_cast %683 : vector<1x32xf32> to vector<32xf32>
    %685 = arith.mulf %681, %684 : vector<32xf32>
    %c42 = arith.constant 42 : index
    %c0_171 = arith.constant 0 : index
    %686 = vector.load %arg6[%c42, %c0_171] : memref<128x32xf32, #tpu.memory_space<vmem>>, vector<1x32xf32>
    %687 = vector.shape_cast %686 : vector<1x32xf32> to vector<32xf32>
    %688 = vector.shape_cast %685 : vector<32xf32> to vector<1x32xf32>
    tpu.vector_store %arg6[%c42, %c0_171], %688 {strides = array<i32>} : memref<128x32xf32, #tpu.memory_space<vmem>>, vector<1x32xf32>,
    %c43_i32 = arith.constant 43 : i32
    %689 = arith.addi %0, %c43_i32 : i32
    %690 = arith.index_cast %689 : i32 to index
    %691 = memref.load %arg1[%690] : memref<128xi32, #tpu.memory_space<smem>>
    %c43_i32_172 = arith.constant 43 : i32
    %692 = arith.addi %0, %c43_i32_172 : i32
    %693 = arith.index_cast %692 : i32 to index
    %694 = memref.load %arg2[%693] : memref<128xi32, #tpu.memory_space<smem>>
    %695 = arith.index_cast %691 : i32 to index
    %c0_173 = arith.constant 0 : index
    %696 = vector.load %arg3[%695, %c0_173] : memref<64x32xf32, #tpu.memory_space<vmem>>, vector<1x32xf32>
    %697 = vector.shape_cast %696 : vector<1x32xf32> to vector<32xf32>
    %698 = arith.index_cast %694 : i32 to index
    %c0_174 = arith.constant 0 : index
    %699 = vector.load %arg4[%698, %c0_174] : memref<64x32xf32, #tpu.memory_space<vmem>>, vector<1x32xf32>
    %700 = vector.shape_cast %699 : vector<1x32xf32> to vector<32xf32>
    %701 = arith.mulf %697, %700 : vector<32xf32>
    %c43 = arith.constant 43 : index
    %c0_175 = arith.constant 0 : index
    %702 = vector.load %arg6[%c43, %c0_175] : memref<128x32xf32, #tpu.memory_space<vmem>>, vector<1x32xf32>
    %703 = vector.shape_cast %702 : vector<1x32xf32> to vector<32xf32>
    %704 = vector.shape_cast %701 : vector<32xf32> to vector<1x32xf32>
    tpu.vector_store %arg6[%c43, %c0_175], %704 {strides = array<i32>} : memref<128x32xf32, #tpu.memory_space<vmem>>, vector<1x32xf32>,
    %c44_i32 = arith.constant 44 : i32
    %705 = arith.addi %0, %c44_i32 : i32
    %706 = arith.index_cast %705 : i32 to index
    %707 = memref.load %arg1[%706] : memref<128xi32, #tpu.memory_space<smem>>
    %c44_i32_176 = arith.constant 44 : i32
    %708 = arith.addi %0, %c44_i32_176 : i32
    %709 = arith.index_cast %708 : i32 to index
    %710 = memref.load %arg2[%709] : memref<128xi32, #tpu.memory_space<smem>>
    %711 = arith.index_cast %707 : i32 to index
    %c0_177 = arith.constant 0 : index
    %712 = vector.load %arg3[%711, %c0_177] : memref<64x32xf32, #tpu.memory_space<vmem>>, vector<1x32xf32>
    %713 = vector.shape_cast %712 : vector<1x32xf32> to vector<32xf32>
    %714 = arith.index_cast %710 : i32 to index
    %c0_178 = arith.constant 0 : index
    %715 = vector.load %arg4[%714, %c0_178] : memref<64x32xf32, #tpu.memory_space<vmem>>, vector<1x32xf32>
    %716 = vector.shape_cast %715 : vector<1x32xf32> to vector<32xf32>
    %717 = arith.mulf %713, %716 : vector<32xf32>
    %c44 = arith.constant 44 : index
    %c0_179 = arith.constant 0 : index
    %718 = vector.load %arg6[%c44, %c0_179] : memref<128x32xf32, #tpu.memory_space<vmem>>, vector<1x32xf32>
    %719 = vector.shape_cast %718 : vector<1x32xf32> to vector<32xf32>
    %720 = vector.shape_cast %717 : vector<32xf32> to vector<1x32xf32>
    tpu.vector_store %arg6[%c44, %c0_179], %720 {strides = array<i32>} : memref<128x32xf32, #tpu.memory_space<vmem>>, vector<1x32xf32>,
    %c45_i32 = arith.constant 45 : i32
    %721 = arith.addi %0, %c45_i32 : i32
    %722 = arith.index_cast %721 : i32 to index
    %723 = memref.load %arg1[%722] : memref<128xi32, #tpu.memory_space<smem>>
    %c45_i32_180 = arith.constant 45 : i32
    %724 = arith.addi %0, %c45_i32_180 : i32
    %725 = arith.index_cast %724 : i32 to index
    %726 = memref.load %arg2[%725] : memref<128xi32, #tpu.memory_space<smem>>
    %727 = arith.index_cast %723 : i32 to index
    %c0_181 = arith.constant 0 : index
    %728 = vector.load %arg3[%727, %c0_181] : memref<64x32xf32, #tpu.memory_space<vmem>>, vector<1x32xf32>
    %729 = vector.shape_cast %728 : vector<1x32xf32> to vector<32xf32>
    %730 = arith.index_cast %726 : i32 to index
    %c0_182 = arith.constant 0 : index
    %731 = vector.load %arg4[%730, %c0_182] : memref<64x32xf32, #tpu.memory_space<vmem>>, vector<1x32xf32>
    %732 = vector.shape_cast %731 : vector<1x32xf32> to vector<32xf32>
    %733 = arith.mulf %729, %732 : vector<32xf32>
    %c45 = arith.constant 45 : index
    %c0_183 = arith.constant 0 : index
    %734 = vector.load %arg6[%c45, %c0_183] : memref<128x32xf32, #tpu.memory_space<vmem>>, vector<1x32xf32>
    %735 = vector.shape_cast %734 : vector<1x32xf32> to vector<32xf32>
    %736 = vector.shape_cast %733 : vector<32xf32> to vector<1x32xf32>
    tpu.vector_store %arg6[%c45, %c0_183], %736 {strides = array<i32>} : memref<128x32xf32, #tpu.memory_space<vmem>>, vector<1x32xf32>,
    %c46_i32 = arith.constant 46 : i32
    %737 = arith.addi %0, %c46_i32 : i32
    %738 = arith.index_cast %737 : i32 to index
    %739 = memref.load %arg1[%738] : memref<128xi32, #tpu.memory_space<smem>>
    %c46_i32_184 = arith.constant 46 : i32
    %740 = arith.addi %0, %c46_i32_184 : i32
    %741 = arith.index_cast %740 : i32 to index
    %742 = memref.load %arg2[%741] : memref<128xi32, #tpu.memory_space<smem>>
    %743 = arith.index_cast %739 : i32 to index
    %c0_185 = arith.constant 0 : index
    %744 = vector.load %arg3[%743, %c0_185] : memref<64x32xf32, #tpu.memory_space<vmem>>, vector<1x32xf32>
    %745 = vector.shape_cast %744 : vector<1x32xf32> to vector<32xf32>
    %746 = arith.index_cast %742 : i32 to index
    %c0_186 = arith.constant 0 : index
    %747 = vector.load %arg4[%746, %c0_186] : memref<64x32xf32, #tpu.memory_space<vmem>>, vector<1x32xf32>
    %748 = vector.shape_cast %747 : vector<1x32xf32> to vector<32xf32>
    %749 = arith.mulf %745, %748 : vector<32xf32>
    %c46 = arith.constant 46 : index
    %c0_187 = arith.constant 0 : index
    %750 = vector.load %arg6[%c46, %c0_187] : memref<128x32xf32, #tpu.memory_space<vmem>>, vector<1x32xf32>
    %751 = vector.shape_cast %750 : vector<1x32xf32> to vector<32xf32>
    %752 = vector.shape_cast %749 : vector<32xf32> to vector<1x32xf32>
    tpu.vector_store %arg6[%c46, %c0_187], %752 {strides = array<i32>} : memref<128x32xf32, #tpu.memory_space<vmem>>, vector<1x32xf32>,
    %c47_i32 = arith.constant 47 : i32
    %753 = arith.addi %0, %c47_i32 : i32
    %754 = arith.index_cast %753 : i32 to index
    %755 = memref.load %arg1[%754] : memref<128xi32, #tpu.memory_space<smem>>
    %c47_i32_188 = arith.constant 47 : i32
    %756 = arith.addi %0, %c47_i32_188 : i32
    %757 = arith.index_cast %756 : i32 to index
    %758 = memref.load %arg2[%757] : memref<128xi32, #tpu.memory_space<smem>>
    %759 = arith.index_cast %755 : i32 to index
    %c0_189 = arith.constant 0 : index
    %760 = vector.load %arg3[%759, %c0_189] : memref<64x32xf32, #tpu.memory_space<vmem>>, vector<1x32xf32>
    %761 = vector.shape_cast %760 : vector<1x32xf32> to vector<32xf32>
    %762 = arith.index_cast %758 : i32 to index
    %c0_190 = arith.constant 0 : index
    %763 = vector.load %arg4[%762, %c0_190] : memref<64x32xf32, #tpu.memory_space<vmem>>, vector<1x32xf32>
    %764 = vector.shape_cast %763 : vector<1x32xf32> to vector<32xf32>
    %765 = arith.mulf %761, %764 : vector<32xf32>
    %c47 = arith.constant 47 : index
    %c0_191 = arith.constant 0 : index
    %766 = vector.load %arg6[%c47, %c0_191] : memref<128x32xf32, #tpu.memory_space<vmem>>, vector<1x32xf32>
    %767 = vector.shape_cast %766 : vector<1x32xf32> to vector<32xf32>
    %768 = vector.shape_cast %765 : vector<32xf32> to vector<1x32xf32>
    tpu.vector_store %arg6[%c47, %c0_191], %768 {strides = array<i32>} : memref<128x32xf32, #tpu.memory_space<vmem>>, vector<1x32xf32>,
    %c48_i32 = arith.constant 48 : i32
    %769 = arith.addi %0, %c48_i32 : i32
    %770 = arith.index_cast %769 : i32 to index
    %771 = memref.load %arg1[%770] : memref<128xi32, #tpu.memory_space<smem>>
    %c48_i32_192 = arith.constant 48 : i32
    %772 = arith.addi %0, %c48_i32_192 : i32
    %773 = arith.index_cast %772 : i32 to index
    %774 = memref.load %arg2[%773] : memref<128xi32, #tpu.memory_space<smem>>
    %775 = arith.index_cast %771 : i32 to index
    %c0_193 = arith.constant 0 : index
    %776 = vector.load %arg3[%775, %c0_193] : memref<64x32xf32, #tpu.memory_space<vmem>>, vector<1x32xf32>
    %777 = vector.shape_cast %776 : vector<1x32xf32> to vector<32xf32>
    %778 = arith.index_cast %774 : i32 to index
    %c0_194 = arith.constant 0 : index
    %779 = vector.load %arg4[%778, %c0_194] : memref<64x32xf32, #tpu.memory_space<vmem>>, vector<1x32xf32>
    %780 = vector.shape_cast %779 : vector<1x32xf32> to vector<32xf32>
    %781 = arith.mulf %777, %780 : vector<32xf32>
    %c48 = arith.constant 48 : index
    %c0_195 = arith.constant 0 : index
    %782 = vector.load %arg6[%c48, %c0_195] : memref<128x32xf32, #tpu.memory_space<vmem>>, vector<1x32xf32>
    %783 = vector.shape_cast %782 : vector<1x32xf32> to vector<32xf32>
    %784 = vector.shape_cast %781 : vector<32xf32> to vector<1x32xf32>
    tpu.vector_store %arg6[%c48, %c0_195], %784 {strides = array<i32>} : memref<128x32xf32, #tpu.memory_space<vmem>>, vector<1x32xf32>,
    %c49_i32 = arith.constant 49 : i32
    %785 = arith.addi %0, %c49_i32 : i32
    %786 = arith.index_cast %785 : i32 to index
    %787 = memref.load %arg1[%786] : memref<128xi32, #tpu.memory_space<smem>>
    %c49_i32_196 = arith.constant 49 : i32
    %788 = arith.addi %0, %c49_i32_196 : i32
    %789 = arith.index_cast %788 : i32 to index
    %790 = memref.load %arg2[%789] : memref<128xi32, #tpu.memory_space<smem>>
    %791 = arith.index_cast %787 : i32 to index
    %c0_197 = arith.constant 0 : index
    %792 = vector.load %arg3[%791, %c0_197] : memref<64x32xf32, #tpu.memory_space<vmem>>, vector<1x32xf32>
    %793 = vector.shape_cast %792 : vector<1x32xf32> to vector<32xf32>
    %794 = arith.index_cast %790 : i32 to index
    %c0_198 = arith.constant 0 : index
    %795 = vector.load %arg4[%794, %c0_198] : memref<64x32xf32, #tpu.memory_space<vmem>>, vector<1x32xf32>
    %796 = vector.shape_cast %795 : vector<1x32xf32> to vector<32xf32>
    %797 = arith.mulf %793, %796 : vector<32xf32>
    %c49 = arith.constant 49 : index
    %c0_199 = arith.constant 0 : index
    %798 = vector.load %arg6[%c49, %c0_199] : memref<128x32xf32, #tpu.memory_space<vmem>>, vector<1x32xf32>
    %799 = vector.shape_cast %798 : vector<1x32xf32> to vector<32xf32>
    %800 = vector.shape_cast %797 : vector<32xf32> to vector<1x32xf32>
    tpu.vector_store %arg6[%c49, %c0_199], %800 {strides = array<i32>} : memref<128x32xf32, #tpu.memory_space<vmem>>, vector<1x32xf32>,
    %c50_i32 = arith.constant 50 : i32
    %801 = arith.addi %0, %c50_i32 : i32
    %802 = arith.index_cast %801 : i32 to index
    %803 = memref.load %arg1[%802] : memref<128xi32, #tpu.memory_space<smem>>
    %c50_i32_200 = arith.constant 50 : i32
    %804 = arith.addi %0, %c50_i32_200 : i32
    %805 = arith.index_cast %804 : i32 to index
    %806 = memref.load %arg2[%805] : memref<128xi32, #tpu.memory_space<smem>>
    %807 = arith.index_cast %803 : i32 to index
    %c0_201 = arith.constant 0 : index
    %808 = vector.load %arg3[%807, %c0_201] : memref<64x32xf32, #tpu.memory_space<vmem>>, vector<1x32xf32>
    %809 = vector.shape_cast %808 : vector<1x32xf32> to vector<32xf32>
    %810 = arith.index_cast %806 : i32 to index
    %c0_202 = arith.constant 0 : index
    %811 = vector.load %arg4[%810, %c0_202] : memref<64x32xf32, #tpu.memory_space<vmem>>, vector<1x32xf32>
    %812 = vector.shape_cast %811 : vector<1x32xf32> to vector<32xf32>
    %813 = arith.mulf %809, %812 : vector<32xf32>
    %c50 = arith.constant 50 : index
    %c0_203 = arith.constant 0 : index
    %814 = vector.load %arg6[%c50, %c0_203] : memref<128x32xf32, #tpu.memory_space<vmem>>, vector<1x32xf32>
    %815 = vector.shape_cast %814 : vector<1x32xf32> to vector<32xf32>
    %816 = vector.shape_cast %813 : vector<32xf32> to vector<1x32xf32>
    tpu.vector_store %arg6[%c50, %c0_203], %816 {strides = array<i32>} : memref<128x32xf32, #tpu.memory_space<vmem>>, vector<1x32xf32>,
    %c51_i32 = arith.constant 51 : i32
    %817 = arith.addi %0, %c51_i32 : i32
    %818 = arith.index_cast %817 : i32 to index
    %819 = memref.load %arg1[%818] : memref<128xi32, #tpu.memory_space<smem>>
    %c51_i32_204 = arith.constant 51 : i32
    %820 = arith.addi %0, %c51_i32_204 : i32
    %821 = arith.index_cast %820 : i32 to index
    %822 = memref.load %arg2[%821] : memref<128xi32, #tpu.memory_space<smem>>
    %823 = arith.index_cast %819 : i32 to index
    %c0_205 = arith.constant 0 : index
    %824 = vector.load %arg3[%823, %c0_205] : memref<64x32xf32, #tpu.memory_space<vmem>>, vector<1x32xf32>
    %825 = vector.shape_cast %824 : vector<1x32xf32> to vector<32xf32>
    %826 = arith.index_cast %822 : i32 to index
    %c0_206 = arith.constant 0 : index
    %827 = vector.load %arg4[%826, %c0_206] : memref<64x32xf32, #tpu.memory_space<vmem>>, vector<1x32xf32>
    %828 = vector.shape_cast %827 : vector<1x32xf32> to vector<32xf32>
    %829 = arith.mulf %825, %828 : vector<32xf32>
    %c51 = arith.constant 51 : index
    %c0_207 = arith.constant 0 : index
    %830 = vector.load %arg6[%c51, %c0_207] : memref<128x32xf32, #tpu.memory_space<vmem>>, vector<1x32xf32>
    %831 = vector.shape_cast %830 : vector<1x32xf32> to vector<32xf32>
    %832 = vector.shape_cast %829 : vector<32xf32> to vector<1x32xf32>
    tpu.vector_store %arg6[%c51, %c0_207], %832 {strides = array<i32>} : memref<128x32xf32, #tpu.memory_space<vmem>>, vector<1x32xf32>,
    %c52_i32 = arith.constant 52 : i32
    %833 = arith.addi %0, %c52_i32 : i32
    %834 = arith.index_cast %833 : i32 to index
    %835 = memref.load %arg1[%834] : memref<128xi32, #tpu.memory_space<smem>>
    %c52_i32_208 = arith.constant 52 : i32
    %836 = arith.addi %0, %c52_i32_208 : i32
    %837 = arith.index_cast %836 : i32 to index
    %838 = memref.load %arg2[%837] : memref<128xi32, #tpu.memory_space<smem>>
    %839 = arith.index_cast %835 : i32 to index
    %c0_209 = arith.constant 0 : index
    %840 = vector.load %arg3[%839, %c0_209] : memref<64x32xf32, #tpu.memory_space<vmem>>, vector<1x32xf32>
    %841 = vector.shape_cast %840 : vector<1x32xf32> to vector<32xf32>
    %842 = arith.index_cast %838 : i32 to index
    %c0_210 = arith.constant 0 : index
    %843 = vector.load %arg4[%842, %c0_210] : memref<64x32xf32, #tpu.memory_space<vmem>>, vector<1x32xf32>
    %844 = vector.shape_cast %843 : vector<1x32xf32> to vector<32xf32>
    %845 = arith.mulf %841, %844 : vector<32xf32>
    %c52 = arith.constant 52 : index
    %c0_211 = arith.constant 0 : index
    %846 = vector.load %arg6[%c52, %c0_211] : memref<128x32xf32, #tpu.memory_space<vmem>>, vector<1x32xf32>
    %847 = vector.shape_cast %846 : vector<1x32xf32> to vector<32xf32>
    %848 = vector.shape_cast %845 : vector<32xf32> to vector<1x32xf32>
    tpu.vector_store %arg6[%c52, %c0_211], %848 {strides = array<i32>} : memref<128x32xf32, #tpu.memory_space<vmem>>, vector<1x32xf32>,
    %c53_i32 = arith.constant 53 : i32
    %849 = arith.addi %0, %c53_i32 : i32
    %850 = arith.index_cast %849 : i32 to index
    %851 = memref.load %arg1[%850] : memref<128xi32, #tpu.memory_space<smem>>
    %c53_i32_212 = arith.constant 53 : i32
    %852 = arith.addi %0, %c53_i32_212 : i32
    %853 = arith.index_cast %852 : i32 to index
    %854 = memref.load %arg2[%853] : memref<128xi32, #tpu.memory_space<smem>>
    %855 = arith.index_cast %851 : i32 to index
    %c0_213 = arith.constant 0 : index
    %856 = vector.load %arg3[%855, %c0_213] : memref<64x32xf32, #tpu.memory_space<vmem>>, vector<1x32xf32>
    %857 = vector.shape_cast %856 : vector<1x32xf32> to vector<32xf32>
    %858 = arith.index_cast %854 : i32 to index
    %c0_214 = arith.constant 0 : index
    %859 = vector.load %arg4[%858, %c0_214] : memref<64x32xf32, #tpu.memory_space<vmem>>, vector<1x32xf32>
    %860 = vector.shape_cast %859 : vector<1x32xf32> to vector<32xf32>
    %861 = arith.mulf %857, %860 : vector<32xf32>
    %c53 = arith.constant 53 : index
    %c0_215 = arith.constant 0 : index
    %862 = vector.load %arg6[%c53, %c0_215] : memref<128x32xf32, #tpu.memory_space<vmem>>, vector<1x32xf32>
    %863 = vector.shape_cast %862 : vector<1x32xf32> to vector<32xf32>
    %864 = vector.shape_cast %861 : vector<32xf32> to vector<1x32xf32>
    tpu.vector_store %arg6[%c53, %c0_215], %864 {strides = array<i32>} : memref<128x32xf32, #tpu.memory_space<vmem>>, vector<1x32xf32>,
    %c54_i32 = arith.constant 54 : i32
    %865 = arith.addi %0, %c54_i32 : i32
    %866 = arith.index_cast %865 : i32 to index
    %867 = memref.load %arg1[%866] : memref<128xi32, #tpu.memory_space<smem>>
    %c54_i32_216 = arith.constant 54 : i32
    %868 = arith.addi %0, %c54_i32_216 : i32
    %869 = arith.index_cast %868 : i32 to index
    %870 = memref.load %arg2[%869] : memref<128xi32, #tpu.memory_space<smem>>
    %871 = arith.index_cast %867 : i32 to index
    %c0_217 = arith.constant 0 : index
    %872 = vector.load %arg3[%871, %c0_217] : memref<64x32xf32, #tpu.memory_space<vmem>>, vector<1x32xf32>
    %873 = vector.shape_cast %872 : vector<1x32xf32> to vector<32xf32>
    %874 = arith.index_cast %870 : i32 to index
    %c0_218 = arith.constant 0 : index
    %875 = vector.load %arg4[%874, %c0_218] : memref<64x32xf32, #tpu.memory_space<vmem>>, vector<1x32xf32>
    %876 = vector.shape_cast %875 : vector<1x32xf32> to vector<32xf32>
    %877 = arith.mulf %873, %876 : vector<32xf32>
    %c54 = arith.constant 54 : index
    %c0_219 = arith.constant 0 : index
    %878 = vector.load %arg6[%c54, %c0_219] : memref<128x32xf32, #tpu.memory_space<vmem>>, vector<1x32xf32>
    %879 = vector.shape_cast %878 : vector<1x32xf32> to vector<32xf32>
    %880 = vector.shape_cast %877 : vector<32xf32> to vector<1x32xf32>
    tpu.vector_store %arg6[%c54, %c0_219], %880 {strides = array<i32>} : memref<128x32xf32, #tpu.memory_space<vmem>>, vector<1x32xf32>,
    %c55_i32 = arith.constant 55 : i32
    %881 = arith.addi %0, %c55_i32 : i32
    %882 = arith.index_cast %881 : i32 to index
    %883 = memref.load %arg1[%882] : memref<128xi32, #tpu.memory_space<smem>>
    %c55_i32_220 = arith.constant 55 : i32
    %884 = arith.addi %0, %c55_i32_220 : i32
    %885 = arith.index_cast %884 : i32 to index
    %886 = memref.load %arg2[%885] : memref<128xi32, #tpu.memory_space<smem>>
    %887 = arith.index_cast %883 : i32 to index
    %c0_221 = arith.constant 0 : index
    %888 = vector.load %arg3[%887, %c0_221] : memref<64x32xf32, #tpu.memory_space<vmem>>, vector<1x32xf32>
    %889 = vector.shape_cast %888 : vector<1x32xf32> to vector<32xf32>
    %890 = arith.index_cast %886 : i32 to index
    %c0_222 = arith.constant 0 : index
    %891 = vector.load %arg4[%890, %c0_222] : memref<64x32xf32, #tpu.memory_space<vmem>>, vector<1x32xf32>
    %892 = vector.shape_cast %891 : vector<1x32xf32> to vector<32xf32>
    %893 = arith.mulf %889, %892 : vector<32xf32>
    %c55 = arith.constant 55 : index
    %c0_223 = arith.constant 0 : index
    %894 = vector.load %arg6[%c55, %c0_223] : memref<128x32xf32, #tpu.memory_space<vmem>>, vector<1x32xf32>
    %895 = vector.shape_cast %894 : vector<1x32xf32> to vector<32xf32>
    %896 = vector.shape_cast %893 : vector<32xf32> to vector<1x32xf32>
    tpu.vector_store %arg6[%c55, %c0_223], %896 {strides = array<i32>} : memref<128x32xf32, #tpu.memory_space<vmem>>, vector<1x32xf32>,
    %c56_i32 = arith.constant 56 : i32
    %897 = arith.addi %0, %c56_i32 : i32
    %898 = arith.index_cast %897 : i32 to index
    %899 = memref.load %arg1[%898] : memref<128xi32, #tpu.memory_space<smem>>
    %c56_i32_224 = arith.constant 56 : i32
    %900 = arith.addi %0, %c56_i32_224 : i32
    %901 = arith.index_cast %900 : i32 to index
    %902 = memref.load %arg2[%901] : memref<128xi32, #tpu.memory_space<smem>>
    %903 = arith.index_cast %899 : i32 to index
    %c0_225 = arith.constant 0 : index
    %904 = vector.load %arg3[%903, %c0_225] : memref<64x32xf32, #tpu.memory_space<vmem>>, vector<1x32xf32>
    %905 = vector.shape_cast %904 : vector<1x32xf32> to vector<32xf32>
    %906 = arith.index_cast %902 : i32 to index
    %c0_226 = arith.constant 0 : index
    %907 = vector.load %arg4[%906, %c0_226] : memref<64x32xf32, #tpu.memory_space<vmem>>, vector<1x32xf32>
    %908 = vector.shape_cast %907 : vector<1x32xf32> to vector<32xf32>
    %909 = arith.mulf %905, %908 : vector<32xf32>
    %c56 = arith.constant 56 : index
    %c0_227 = arith.constant 0 : index
    %910 = vector.load %arg6[%c56, %c0_227] : memref<128x32xf32, #tpu.memory_space<vmem>>, vector<1x32xf32>
    %911 = vector.shape_cast %910 : vector<1x32xf32> to vector<32xf32>
    %912 = vector.shape_cast %909 : vector<32xf32> to vector<1x32xf32>
    tpu.vector_store %arg6[%c56, %c0_227], %912 {strides = array<i32>} : memref<128x32xf32, #tpu.memory_space<vmem>>, vector<1x32xf32>,
    %c57_i32 = arith.constant 57 : i32
    %913 = arith.addi %0, %c57_i32 : i32
    %914 = arith.index_cast %913 : i32 to index
    %915 = memref.load %arg1[%914] : memref<128xi32, #tpu.memory_space<smem>>
    %c57_i32_228 = arith.constant 57 : i32
    %916 = arith.addi %0, %c57_i32_228 : i32
    %917 = arith.index_cast %916 : i32 to index
    %918 = memref.load %arg2[%917] : memref<128xi32, #tpu.memory_space<smem>>
    %919 = arith.index_cast %915 : i32 to index
    %c0_229 = arith.constant 0 : index
    %920 = vector.load %arg3[%919, %c0_229] : memref<64x32xf32, #tpu.memory_space<vmem>>, vector<1x32xf32>
    %921 = vector.shape_cast %920 : vector<1x32xf32> to vector<32xf32>
    %922 = arith.index_cast %918 : i32 to index
    %c0_230 = arith.constant 0 : index
    %923 = vector.load %arg4[%922, %c0_230] : memref<64x32xf32, #tpu.memory_space<vmem>>, vector<1x32xf32>
    %924 = vector.shape_cast %923 : vector<1x32xf32> to vector<32xf32>
    %925 = arith.mulf %921, %924 : vector<32xf32>
    %c57 = arith.constant 57 : index
    %c0_231 = arith.constant 0 : index
    %926 = vector.load %arg6[%c57, %c0_231] : memref<128x32xf32, #tpu.memory_space<vmem>>, vector<1x32xf32>
    %927 = vector.shape_cast %926 : vector<1x32xf32> to vector<32xf32>
    %928 = vector.shape_cast %925 : vector<32xf32> to vector<1x32xf32>
    tpu.vector_store %arg6[%c57, %c0_231], %928 {strides = array<i32>} : memref<128x32xf32, #tpu.memory_space<vmem>>, vector<1x32xf32>,
    %c58_i32 = arith.constant 58 : i32
    %929 = arith.addi %0, %c58_i32 : i32
    %930 = arith.index_cast %929 : i32 to index
    %931 = memref.load %arg1[%930] : memref<128xi32, #tpu.memory_space<smem>>
    %c58_i32_232 = arith.constant 58 : i32
    %932 = arith.addi %0, %c58_i32_232 : i32
    %933 = arith.index_cast %932 : i32 to index
    %934 = memref.load %arg2[%933] : memref<128xi32, #tpu.memory_space<smem>>
    %935 = arith.index_cast %931 : i32 to index
    %c0_233 = arith.constant 0 : index
    %936 = vector.load %arg3[%935, %c0_233] : memref<64x32xf32, #tpu.memory_space<vmem>>, vector<1x32xf32>
    %937 = vector.shape_cast %936 : vector<1x32xf32> to vector<32xf32>
    %938 = arith.index_cast %934 : i32 to index
    %c0_234 = arith.constant 0 : index
    %939 = vector.load %arg4[%938, %c0_234] : memref<64x32xf32, #tpu.memory_space<vmem>>, vector<1x32xf32>
    %940 = vector.shape_cast %939 : vector<1x32xf32> to vector<32xf32>
    %941 = arith.mulf %937, %940 : vector<32xf32>
    %c58 = arith.constant 58 : index
    %c0_235 = arith.constant 0 : index
    %942 = vector.load %arg6[%c58, %c0_235] : memref<128x32xf32, #tpu.memory_space<vmem>>, vector<1x32xf32>
    %943 = vector.shape_cast %942 : vector<1x32xf32> to vector<32xf32>
    %944 = vector.shape_cast %941 : vector<32xf32> to vector<1x32xf32>
    tpu.vector_store %arg6[%c58, %c0_235], %944 {strides = array<i32>} : memref<128x32xf32, #tpu.memory_space<vmem>>, vector<1x32xf32>,
    %c59_i32 = arith.constant 59 : i32
    %945 = arith.addi %0, %c59_i32 : i32
    %946 = arith.index_cast %945 : i32 to index
    %947 = memref.load %arg1[%946] : memref<128xi32, #tpu.memory_space<smem>>
    %c59_i32_236 = arith.constant 59 : i32
    %948 = arith.addi %0, %c59_i32_236 : i32
    %949 = arith.index_cast %948 : i32 to index
    %950 = memref.load %arg2[%949] : memref<128xi32, #tpu.memory_space<smem>>
    %951 = arith.index_cast %947 : i32 to index
    %c0_237 = arith.constant 0 : index
    %952 = vector.load %arg3[%951, %c0_237] : memref<64x32xf32, #tpu.memory_space<vmem>>, vector<1x32xf32>
    %953 = vector.shape_cast %952 : vector<1x32xf32> to vector<32xf32>
    %954 = arith.index_cast %950 : i32 to index
    %c0_238 = arith.constant 0 : index
    %955 = vector.load %arg4[%954, %c0_238] : memref<64x32xf32, #tpu.memory_space<vmem>>, vector<1x32xf32>
    %956 = vector.shape_cast %955 : vector<1x32xf32> to vector<32xf32>
    %957 = arith.mulf %953, %956 : vector<32xf32>
    %c59 = arith.constant 59 : index
    %c0_239 = arith.constant 0 : index
    %958 = vector.load %arg6[%c59, %c0_239] : memref<128x32xf32, #tpu.memory_space<vmem>>, vector<1x32xf32>
    %959 = vector.shape_cast %958 : vector<1x32xf32> to vector<32xf32>
    %960 = vector.shape_cast %957 : vector<32xf32> to vector<1x32xf32>
    tpu.vector_store %arg6[%c59, %c0_239], %960 {strides = array<i32>} : memref<128x32xf32, #tpu.memory_space<vmem>>, vector<1x32xf32>,
    %c60_i32 = arith.constant 60 : i32
    %961 = arith.addi %0, %c60_i32 : i32
    %962 = arith.index_cast %961 : i32 to index
    %963 = memref.load %arg1[%962] : memref<128xi32, #tpu.memory_space<smem>>
    %c60_i32_240 = arith.constant 60 : i32
    %964 = arith.addi %0, %c60_i32_240 : i32
    %965 = arith.index_cast %964 : i32 to index
    %966 = memref.load %arg2[%965] : memref<128xi32, #tpu.memory_space<smem>>
    %967 = arith.index_cast %963 : i32 to index
    %c0_241 = arith.constant 0 : index
    %968 = vector.load %arg3[%967, %c0_241] : memref<64x32xf32, #tpu.memory_space<vmem>>, vector<1x32xf32>
    %969 = vector.shape_cast %968 : vector<1x32xf32> to vector<32xf32>
    %970 = arith.index_cast %966 : i32 to index
    %c0_242 = arith.constant 0 : index
    %971 = vector.load %arg4[%970, %c0_242] : memref<64x32xf32, #tpu.memory_space<vmem>>, vector<1x32xf32>
    %972 = vector.shape_cast %971 : vector<1x32xf32> to vector<32xf32>
    %973 = arith.mulf %969, %972 : vector<32xf32>
    %c60 = arith.constant 60 : index
    %c0_243 = arith.constant 0 : index
    %974 = vector.load %arg6[%c60, %c0_243] : memref<128x32xf32, #tpu.memory_space<vmem>>, vector<1x32xf32>
    %975 = vector.shape_cast %974 : vector<1x32xf32> to vector<32xf32>
    %976 = vector.shape_cast %973 : vector<32xf32> to vector<1x32xf32>
    tpu.vector_store %arg6[%c60, %c0_243], %976 {strides = array<i32>} : memref<128x32xf32, #tpu.memory_space<vmem>>, vector<1x32xf32>,
    %c61_i32 = arith.constant 61 : i32
    %977 = arith.addi %0, %c61_i32 : i32
    %978 = arith.index_cast %977 : i32 to index
    %979 = memref.load %arg1[%978] : memref<128xi32, #tpu.memory_space<smem>>
    %c61_i32_244 = arith.constant 61 : i32
    %980 = arith.addi %0, %c61_i32_244 : i32
    %981 = arith.index_cast %980 : i32 to index
    %982 = memref.load %arg2[%981] : memref<128xi32, #tpu.memory_space<smem>>
    %983 = arith.index_cast %979 : i32 to index
    %c0_245 = arith.constant 0 : index
    %984 = vector.load %arg3[%983, %c0_245] : memref<64x32xf32, #tpu.memory_space<vmem>>, vector<1x32xf32>
    %985 = vector.shape_cast %984 : vector<1x32xf32> to vector<32xf32>
    %986 = arith.index_cast %982 : i32 to index
    %c0_246 = arith.constant 0 : index
    %987 = vector.load %arg4[%986, %c0_246] : memref<64x32xf32, #tpu.memory_space<vmem>>, vector<1x32xf32>
    %988 = vector.shape_cast %987 : vector<1x32xf32> to vector<32xf32>
    %989 = arith.mulf %985, %988 : vector<32xf32>
    %c61 = arith.constant 61 : index
    %c0_247 = arith.constant 0 : index
    %990 = vector.load %arg6[%c61, %c0_247] : memref<128x32xf32, #tpu.memory_space<vmem>>, vector<1x32xf32>
    %991 = vector.shape_cast %990 : vector<1x32xf32> to vector<32xf32>
    %992 = vector.shape_cast %989 : vector<32xf32> to vector<1x32xf32>
    tpu.vector_store %arg6[%c61, %c0_247], %992 {strides = array<i32>} : memref<128x32xf32, #tpu.memory_space<vmem>>, vector<1x32xf32>,
    %c62_i32 = arith.constant 62 : i32
    %993 = arith.addi %0, %c62_i32 : i32
    %994 = arith.index_cast %993 : i32 to index
    %995 = memref.load %arg1[%994] : memref<128xi32, #tpu.memory_space<smem>>
    %c62_i32_248 = arith.constant 62 : i32
    %996 = arith.addi %0, %c62_i32_248 : i32
    %997 = arith.index_cast %996 : i32 to index
    %998 = memref.load %arg2[%997] : memref<128xi32, #tpu.memory_space<smem>>
    %999 = arith.index_cast %995 : i32 to index
    %c0_249 = arith.constant 0 : index
    %1000 = vector.load %arg3[%999, %c0_249] : memref<64x32xf32, #tpu.memory_space<vmem>>, vector<1x32xf32>
    %1001 = vector.shape_cast %1000 : vector<1x32xf32> to vector<32xf32>
    %1002 = arith.index_cast %998 : i32 to index
    %c0_250 = arith.constant 0 : index
    %1003 = vector.load %arg4[%1002, %c0_250] : memref<64x32xf32, #tpu.memory_space<vmem>>, vector<1x32xf32>
    %1004 = vector.shape_cast %1003 : vector<1x32xf32> to vector<32xf32>
    %1005 = arith.mulf %1001, %1004 : vector<32xf32>
    %c62 = arith.constant 62 : index
    %c0_251 = arith.constant 0 : index
    %1006 = vector.load %arg6[%c62, %c0_251] : memref<128x32xf32, #tpu.memory_space<vmem>>, vector<1x32xf32>
    %1007 = vector.shape_cast %1006 : vector<1x32xf32> to vector<32xf32>
    %1008 = vector.shape_cast %1005 : vector<32xf32> to vector<1x32xf32>
    tpu.vector_store %arg6[%c62, %c0_251], %1008 {strides = array<i32>} : memref<128x32xf32, #tpu.memory_space<vmem>>, vector<1x32xf32>,
    %c63_i32 = arith.constant 63 : i32
    %1009 = arith.addi %0, %c63_i32 : i32
    %1010 = arith.index_cast %1009 : i32 to index
    %1011 = memref.load %arg1[%1010] : memref<128xi32, #tpu.memory_space<smem>>
    %c63_i32_252 = arith.constant 63 : i32
    %1012 = arith.addi %0, %c63_i32_252 : i32
    %1013 = arith.index_cast %1012 : i32 to index
    %1014 = memref.load %arg2[%1013] : memref<128xi32, #tpu.memory_space<smem>>
    %1015 = arith.index_cast %1011 : i32 to index
    %c0_253 = arith.constant 0 : index
    %1016 = vector.load %arg3[%1015, %c0_253] : memref<64x32xf32, #tpu.memory_space<vmem>>, vector<1x32xf32>
    %1017 = vector.shape_cast %1016 : vector<1x32xf32> to vector<32xf32>
    %1018 = arith.index_cast %1014 : i32 to index
    %c0_254 = arith.constant 0 : index
    %1019 = vector.load %arg4[%1018, %c0_254] : memref<64x32xf32, #tpu.memory_space<vmem>>, vector<1x32xf32>
    %1020 = vector.shape_cast %1019 : vector<1x32xf32> to vector<32xf32>
    %1021 = arith.mulf %1017, %1020 : vector<32xf32>
    %c63 = arith.constant 63 : index
    %c0_255 = arith.constant 0 : index
    %1022 = vector.load %arg6[%c63, %c0_255] : memref<128x32xf32, #tpu.memory_space<vmem>>, vector<1x32xf32>
    %1023 = vector.shape_cast %1022 : vector<1x32xf32> to vector<32xf32>
    %1024 = vector.shape_cast %1021 : vector<32xf32> to vector<1x32xf32>
    tpu.vector_store %arg6[%c63, %c0_255], %1024 {strides = array<i32>} : memref<128x32xf32, #tpu.memory_space<vmem>>, vector<1x32xf32>,
    %c64_i32 = arith.constant 64 : i32
    %1025 = arith.addi %0, %c64_i32 : i32
    %1026 = arith.index_cast %1025 : i32 to index
    %1027 = memref.load %arg1[%1026] : memref<128xi32, #tpu.memory_space<smem>>
    %c64_i32_256 = arith.constant 64 : i32
    %1028 = arith.addi %0, %c64_i32_256 : i32
    %1029 = arith.index_cast %1028 : i32 to index
    %1030 = memref.load %arg2[%1029] : memref<128xi32, #tpu.memory_space<smem>>
    %1031 = arith.index_cast %1027 : i32 to index
    %c0_257 = arith.constant 0 : index
    %1032 = vector.load %arg3[%1031, %c0_257] : memref<64x32xf32, #tpu.memory_space<vmem>>, vector<1x32xf32>
    %1033 = vector.shape_cast %1032 : vector<1x32xf32> to vector<32xf32>
    %1034 = arith.index_cast %1030 : i32 to index
    %c0_258 = arith.constant 0 : index
    %1035 = vector.load %arg4[%1034, %c0_258] : memref<64x32xf32, #tpu.memory_space<vmem>>, vector<1x32xf32>
    %1036 = vector.shape_cast %1035 : vector<1x32xf32> to vector<32xf32>
    %1037 = arith.mulf %1033, %1036 : vector<32xf32>
    %c64 = arith.constant 64 : index
    %c0_259 = arith.constant 0 : index
    %1038 = vector.load %arg6[%c64, %c0_259] : memref<128x32xf32, #tpu.memory_space<vmem>>, vector<1x32xf32>
    %1039 = vector.shape_cast %1038 : vector<1x32xf32> to vector<32xf32>
    %1040 = vector.shape_cast %1037 : vector<32xf32> to vector<1x32xf32>
    tpu.vector_store %arg6[%c64, %c0_259], %1040 {strides = array<i32>} : memref<128x32xf32, #tpu.memory_space<vmem>>, vector<1x32xf32>,
    %c65_i32 = arith.constant 65 : i32
    %1041 = arith.addi %0, %c65_i32 : i32
    %1042 = arith.index_cast %1041 : i32 to index
    %1043 = memref.load %arg1[%1042] : memref<128xi32, #tpu.memory_space<smem>>
    %c65_i32_260 = arith.constant 65 : i32
    %1044 = arith.addi %0, %c65_i32_260 : i32
    %1045 = arith.index_cast %1044 : i32 to index
    %1046 = memref.load %arg2[%1045] : memref<128xi32, #tpu.memory_space<smem>>
    %1047 = arith.index_cast %1043 : i32 to index
    %c0_261 = arith.constant 0 : index
    %1048 = vector.load %arg3[%1047, %c0_261] : memref<64x32xf32, #tpu.memory_space<vmem>>, vector<1x32xf32>
    %1049 = vector.shape_cast %1048 : vector<1x32xf32> to vector<32xf32>
    %1050 = arith.index_cast %1046 : i32 to index
    %c0_262 = arith.constant 0 : index
    %1051 = vector.load %arg4[%1050, %c0_262] : memref<64x32xf32, #tpu.memory_space<vmem>>, vector<1x32xf32>
    %1052 = vector.shape_cast %1051 : vector<1x32xf32> to vector<32xf32>
    %1053 = arith.mulf %1049, %1052 : vector<32xf32>
    %c65 = arith.constant 65 : index
    %c0_263 = arith.constant 0 : index
    %1054 = vector.load %arg6[%c65, %c0_263] : memref<128x32xf32, #tpu.memory_space<vmem>>, vector<1x32xf32>
    %1055 = vector.shape_cast %1054 : vector<1x32xf32> to vector<32xf32>
    %1056 = vector.shape_cast %1053 : vector<32xf32> to vector<1x32xf32>
    tpu.vector_store %arg6[%c65, %c0_263], %1056 {strides = array<i32>} : memref<128x32xf32, #tpu.memory_space<vmem>>, vector<1x32xf32>,
    %c66_i32 = arith.constant 66 : i32
    %1057 = arith.addi %0, %c66_i32 : i32
    %1058 = arith.index_cast %1057 : i32 to index
    %1059 = memref.load %arg1[%1058] : memref<128xi32, #tpu.memory_space<smem>>
    %c66_i32_264 = arith.constant 66 : i32
    %1060 = arith.addi %0, %c66_i32_264 : i32
    %1061 = arith.index_cast %1060 : i32 to index
    %1062 = memref.load %arg2[%1061] : memref<128xi32, #tpu.memory_space<smem>>
    %1063 = arith.index_cast %1059 : i32 to index
    %c0_265 = arith.constant 0 : index
    %1064 = vector.load %arg3[%1063, %c0_265] : memref<64x32xf32, #tpu.memory_space<vmem>>, vector<1x32xf32>
    %1065 = vector.shape_cast %1064 : vector<1x32xf32> to vector<32xf32>
    %1066 = arith.index_cast %1062 : i32 to index
    %c0_266 = arith.constant 0 : index
    %1067 = vector.load %arg4[%1066, %c0_266] : memref<64x32xf32, #tpu.memory_space<vmem>>, vector<1x32xf32>
    %1068 = vector.shape_cast %1067 : vector<1x32xf32> to vector<32xf32>
    %1069 = arith.mulf %1065, %1068 : vector<32xf32>
    %c66 = arith.constant 66 : index
    %c0_267 = arith.constant 0 : index
    %1070 = vector.load %arg6[%c66, %c0_267] : memref<128x32xf32, #tpu.memory_space<vmem>>, vector<1x32xf32>
    %1071 = vector.shape_cast %1070 : vector<1x32xf32> to vector<32xf32>
    %1072 = vector.shape_cast %1069 : vector<32xf32> to vector<1x32xf32>
    tpu.vector_store %arg6[%c66, %c0_267], %1072 {strides = array<i32>} : memref<128x32xf32, #tpu.memory_space<vmem>>, vector<1x32xf32>,
    %c67_i32 = arith.constant 67 : i32
    %1073 = arith.addi %0, %c67_i32 : i32
    %1074 = arith.index_cast %1073 : i32 to index
    %1075 = memref.load %arg1[%1074] : memref<128xi32, #tpu.memory_space<smem>>
    %c67_i32_268 = arith.constant 67 : i32
    %1076 = arith.addi %0, %c67_i32_268 : i32
    %1077 = arith.index_cast %1076 : i32 to index
    %1078 = memref.load %arg2[%1077] : memref<128xi32, #tpu.memory_space<smem>>
    %1079 = arith.index_cast %1075 : i32 to index
    %c0_269 = arith.constant 0 : index
    %1080 = vector.load %arg3[%1079, %c0_269] : memref<64x32xf32, #tpu.memory_space<vmem>>, vector<1x32xf32>
    %1081 = vector.shape_cast %1080 : vector<1x32xf32> to vector<32xf32>
    %1082 = arith.index_cast %1078 : i32 to index
    %c0_270 = arith.constant 0 : index
    %1083 = vector.load %arg4[%1082, %c0_270] : memref<64x32xf32, #tpu.memory_space<vmem>>, vector<1x32xf32>
    %1084 = vector.shape_cast %1083 : vector<1x32xf32> to vector<32xf32>
    %1085 = arith.mulf %1081, %1084 : vector<32xf32>
    %c67 = arith.constant 67 : index
    %c0_271 = arith.constant 0 : index
    %1086 = vector.load %arg6[%c67, %c0_271] : memref<128x32xf32, #tpu.memory_space<vmem>>, vector<1x32xf32>
    %1087 = vector.shape_cast %1086 : vector<1x32xf32> to vector<32xf32>
    %1088 = vector.shape_cast %1085 : vector<32xf32> to vector<1x32xf32>
    tpu.vector_store %arg6[%c67, %c0_271], %1088 {strides = array<i32>} : memref<128x32xf32, #tpu.memory_space<vmem>>, vector<1x32xf32>,
    %c68_i32 = arith.constant 68 : i32
    %1089 = arith.addi %0, %c68_i32 : i32
    %1090 = arith.index_cast %1089 : i32 to index
    %1091 = memref.load %arg1[%1090] : memref<128xi32, #tpu.memory_space<smem>>
    %c68_i32_272 = arith.constant 68 : i32
    %1092 = arith.addi %0, %c68_i32_272 : i32
    %1093 = arith.index_cast %1092 : i32 to index
    %1094 = memref.load %arg2[%1093] : memref<128xi32, #tpu.memory_space<smem>>
    %1095 = arith.index_cast %1091 : i32 to index
    %c0_273 = arith.constant 0 : index
    %1096 = vector.load %arg3[%1095, %c0_273] : memref<64x32xf32, #tpu.memory_space<vmem>>, vector<1x32xf32>
    %1097 = vector.shape_cast %1096 : vector<1x32xf32> to vector<32xf32>
    %1098 = arith.index_cast %1094 : i32 to index
    %c0_274 = arith.constant 0 : index
    %1099 = vector.load %arg4[%1098, %c0_274] : memref<64x32xf32, #tpu.memory_space<vmem>>, vector<1x32xf32>
    %1100 = vector.shape_cast %1099 : vector<1x32xf32> to vector<32xf32>
    %1101 = arith.mulf %1097, %1100 : vector<32xf32>
    %c68 = arith.constant 68 : index
    %c0_275 = arith.constant 0 : index
    %1102 = vector.load %arg6[%c68, %c0_275] : memref<128x32xf32, #tpu.memory_space<vmem>>, vector<1x32xf32>
    %1103 = vector.shape_cast %1102 : vector<1x32xf32> to vector<32xf32>
    %1104 = vector.shape_cast %1101 : vector<32xf32> to vector<1x32xf32>
    tpu.vector_store %arg6[%c68, %c0_275], %1104 {strides = array<i32>} : memref<128x32xf32, #tpu.memory_space<vmem>>, vector<1x32xf32>,
    %c69_i32 = arith.constant 69 : i32
    %1105 = arith.addi %0, %c69_i32 : i32
    %1106 = arith.index_cast %1105 : i32 to index
    %1107 = memref.load %arg1[%1106] : memref<128xi32, #tpu.memory_space<smem>>
    %c69_i32_276 = arith.constant 69 : i32
    %1108 = arith.addi %0, %c69_i32_276 : i32
    %1109 = arith.index_cast %1108 : i32 to index
    %1110 = memref.load %arg2[%1109] : memref<128xi32, #tpu.memory_space<smem>>
    %1111 = arith.index_cast %1107 : i32 to index
    %c0_277 = arith.constant 0 : index
    %1112 = vector.load %arg3[%1111, %c0_277] : memref<64x32xf32, #tpu.memory_space<vmem>>, vector<1x32xf32>
    %1113 = vector.shape_cast %1112 : vector<1x32xf32> to vector<32xf32>
    %1114 = arith.index_cast %1110 : i32 to index
    %c0_278 = arith.constant 0 : index
    %1115 = vector.load %arg4[%1114, %c0_278] : memref<64x32xf32, #tpu.memory_space<vmem>>, vector<1x32xf32>
    %1116 = vector.shape_cast %1115 : vector<1x32xf32> to vector<32xf32>
    %1117 = arith.mulf %1113, %1116 : vector<32xf32>
    %c69 = arith.constant 69 : index
    %c0_279 = arith.constant 0 : index
    %1118 = vector.load %arg6[%c69, %c0_279] : memref<128x32xf32, #tpu.memory_space<vmem>>, vector<1x32xf32>
    %1119 = vector.shape_cast %1118 : vector<1x32xf32> to vector<32xf32>
    %1120 = vector.shape_cast %1117 : vector<32xf32> to vector<1x32xf32>
    tpu.vector_store %arg6[%c69, %c0_279], %1120 {strides = array<i32>} : memref<128x32xf32, #tpu.memory_space<vmem>>, vector<1x32xf32>,
    %c70_i32 = arith.constant 70 : i32
    %1121 = arith.addi %0, %c70_i32 : i32
    %1122 = arith.index_cast %1121 : i32 to index
    %1123 = memref.load %arg1[%1122] : memref<128xi32, #tpu.memory_space<smem>>
    %c70_i32_280 = arith.constant 70 : i32
    %1124 = arith.addi %0, %c70_i32_280 : i32
    %1125 = arith.index_cast %1124 : i32 to index
    %1126 = memref.load %arg2[%1125] : memref<128xi32, #tpu.memory_space<smem>>
    %1127 = arith.index_cast %1123 : i32 to index
    %c0_281 = arith.constant 0 : index
    %1128 = vector.load %arg3[%1127, %c0_281] : memref<64x32xf32, #tpu.memory_space<vmem>>, vector<1x32xf32>
    %1129 = vector.shape_cast %1128 : vector<1x32xf32> to vector<32xf32>
    %1130 = arith.index_cast %1126 : i32 to index
    %c0_282 = arith.constant 0 : index
    %1131 = vector.load %arg4[%1130, %c0_282] : memref<64x32xf32, #tpu.memory_space<vmem>>, vector<1x32xf32>
    %1132 = vector.shape_cast %1131 : vector<1x32xf32> to vector<32xf32>
    %1133 = arith.mulf %1129, %1132 : vector<32xf32>
    %c70 = arith.constant 70 : index
    %c0_283 = arith.constant 0 : index
    %1134 = vector.load %arg6[%c70, %c0_283] : memref<128x32xf32, #tpu.memory_space<vmem>>, vector<1x32xf32>
    %1135 = vector.shape_cast %1134 : vector<1x32xf32> to vector<32xf32>
    %1136 = vector.shape_cast %1133 : vector<32xf32> to vector<1x32xf32>
    tpu.vector_store %arg6[%c70, %c0_283], %1136 {strides = array<i32>} : memref<128x32xf32, #tpu.memory_space<vmem>>, vector<1x32xf32>,
    %c71_i32 = arith.constant 71 : i32
    %1137 = arith.addi %0, %c71_i32 : i32
    %1138 = arith.index_cast %1137 : i32 to index
    %1139 = memref.load %arg1[%1138] : memref<128xi32, #tpu.memory_space<smem>>
    %c71_i32_284 = arith.constant 71 : i32
    %1140 = arith.addi %0, %c71_i32_284 : i32
    %1141 = arith.index_cast %1140 : i32 to index
    %1142 = memref.load %arg2[%1141] : memref<128xi32, #tpu.memory_space<smem>>
    %1143 = arith.index_cast %1139 : i32 to index
    %c0_285 = arith.constant 0 : index
    %1144 = vector.load %arg3[%1143, %c0_285] : memref<64x32xf32, #tpu.memory_space<vmem>>, vector<1x32xf32>
    %1145 = vector.shape_cast %1144 : vector<1x32xf32> to vector<32xf32>
    %1146 = arith.index_cast %1142 : i32 to index
    %c0_286 = arith.constant 0 : index
    %1147 = vector.load %arg4[%1146, %c0_286] : memref<64x32xf32, #tpu.memory_space<vmem>>, vector<1x32xf32>
    %1148 = vector.shape_cast %1147 : vector<1x32xf32> to vector<32xf32>
    %1149 = arith.mulf %1145, %1148 : vector<32xf32>
    %c71 = arith.constant 71 : index
    %c0_287 = arith.constant 0 : index
    %1150 = vector.load %arg6[%c71, %c0_287] : memref<128x32xf32, #tpu.memory_space<vmem>>, vector<1x32xf32>
    %1151 = vector.shape_cast %1150 : vector<1x32xf32> to vector<32xf32>
    %1152 = vector.shape_cast %1149 : vector<32xf32> to vector<1x32xf32>
    tpu.vector_store %arg6[%c71, %c0_287], %1152 {strides = array<i32>} : memref<128x32xf32, #tpu.memory_space<vmem>>, vector<1x32xf32>,
    %c72_i32 = arith.constant 72 : i32
    %1153 = arith.addi %0, %c72_i32 : i32
    %1154 = arith.index_cast %1153 : i32 to index
    %1155 = memref.load %arg1[%1154] : memref<128xi32, #tpu.memory_space<smem>>
    %c72_i32_288 = arith.constant 72 : i32
    %1156 = arith.addi %0, %c72_i32_288 : i32
    %1157 = arith.index_cast %1156 : i32 to index
    %1158 = memref.load %arg2[%1157] : memref<128xi32, #tpu.memory_space<smem>>
    %1159 = arith.index_cast %1155 : i32 to index
    %c0_289 = arith.constant 0 : index
    %1160 = vector.load %arg3[%1159, %c0_289] : memref<64x32xf32, #tpu.memory_space<vmem>>, vector<1x32xf32>
    %1161 = vector.shape_cast %1160 : vector<1x32xf32> to vector<32xf32>
    %1162 = arith.index_cast %1158 : i32 to index
    %c0_290 = arith.constant 0 : index
    %1163 = vector.load %arg4[%1162, %c0_290] : memref<64x32xf32, #tpu.memory_space<vmem>>, vector<1x32xf32>
    %1164 = vector.shape_cast %1163 : vector<1x32xf32> to vector<32xf32>
    %1165 = arith.mulf %1161, %1164 : vector<32xf32>
    %c72 = arith.constant 72 : index
    %c0_291 = arith.constant 0 : index
    %1166 = vector.load %arg6[%c72, %c0_291] : memref<128x32xf32, #tpu.memory_space<vmem>>, vector<1x32xf32>
    %1167 = vector.shape_cast %1166 : vector<1x32xf32> to vector<32xf32>
    %1168 = vector.shape_cast %1165 : vector<32xf32> to vector<1x32xf32>
    tpu.vector_store %arg6[%c72, %c0_291], %1168 {strides = array<i32>} : memref<128x32xf32, #tpu.memory_space<vmem>>, vector<1x32xf32>,
    %c73_i32 = arith.constant 73 : i32
    %1169 = arith.addi %0, %c73_i32 : i32
    %1170 = arith.index_cast %1169 : i32 to index
    %1171 = memref.load %arg1[%1170] : memref<128xi32, #tpu.memory_space<smem>>
    %c73_i32_292 = arith.constant 73 : i32
    %1172 = arith.addi %0, %c73_i32_292 : i32
    %1173 = arith.index_cast %1172 : i32 to index
    %1174 = memref.load %arg2[%1173] : memref<128xi32, #tpu.memory_space<smem>>
    %1175 = arith.index_cast %1171 : i32 to index
    %c0_293 = arith.constant 0 : index
    %1176 = vector.load %arg3[%1175, %c0_293] : memref<64x32xf32, #tpu.memory_space<vmem>>, vector<1x32xf32>
    %1177 = vector.shape_cast %1176 : vector<1x32xf32> to vector<32xf32>
    %1178 = arith.index_cast %1174 : i32 to index
    %c0_294 = arith.constant 0 : index
    %1179 = vector.load %arg4[%1178, %c0_294] : memref<64x32xf32, #tpu.memory_space<vmem>>, vector<1x32xf32>
    %1180 = vector.shape_cast %1179 : vector<1x32xf32> to vector<32xf32>
    %1181 = arith.mulf %1177, %1180 : vector<32xf32>
    %c73 = arith.constant 73 : index
    %c0_295 = arith.constant 0 : index
    %1182 = vector.load %arg6[%c73, %c0_295] : memref<128x32xf32, #tpu.memory_space<vmem>>, vector<1x32xf32>
    %1183 = vector.shape_cast %1182 : vector<1x32xf32> to vector<32xf32>
    %1184 = vector.shape_cast %1181 : vector<32xf32> to vector<1x32xf32>
    tpu.vector_store %arg6[%c73, %c0_295], %1184 {strides = array<i32>} : memref<128x32xf32, #tpu.memory_space<vmem>>, vector<1x32xf32>,
    %c74_i32 = arith.constant 74 : i32
    %1185 = arith.addi %0, %c74_i32 : i32
    %1186 = arith.index_cast %1185 : i32 to index
    %1187 = memref.load %arg1[%1186] : memref<128xi32, #tpu.memory_space<smem>>
    %c74_i32_296 = arith.constant 74 : i32
    %1188 = arith.addi %0, %c74_i32_296 : i32
    %1189 = arith.index_cast %1188 : i32 to index
    %1190 = memref.load %arg2[%1189] : memref<128xi32, #tpu.memory_space<smem>>
    %1191 = arith.index_cast %1187 : i32 to index
    %c0_297 = arith.constant 0 : index
    %1192 = vector.load %arg3[%1191, %c0_297] : memref<64x32xf32, #tpu.memory_space<vmem>>, vector<1x32xf32>
    %1193 = vector.shape_cast %1192 : vector<1x32xf32> to vector<32xf32>
    %1194 = arith.index_cast %1190 : i32 to index
    %c0_298 = arith.constant 0 : index
    %1195 = vector.load %arg4[%1194, %c0_298] : memref<64x32xf32, #tpu.memory_space<vmem>>, vector<1x32xf32>
    %1196 = vector.shape_cast %1195 : vector<1x32xf32> to vector<32xf32>
    %1197 = arith.mulf %1193, %1196 : vector<32xf32>
    %c74 = arith.constant 74 : index
    %c0_299 = arith.constant 0 : index
    %1198 = vector.load %arg6[%c74, %c0_299] : memref<128x32xf32, #tpu.memory_space<vmem>>, vector<1x32xf32>
    %1199 = vector.shape_cast %1198 : vector<1x32xf32> to vector<32xf32>
    %1200 = vector.shape_cast %1197 : vector<32xf32> to vector<1x32xf32>
    tpu.vector_store %arg6[%c74, %c0_299], %1200 {strides = array<i32>} : memref<128x32xf32, #tpu.memory_space<vmem>>, vector<1x32xf32>,
    %c75_i32 = arith.constant 75 : i32
    %1201 = arith.addi %0, %c75_i32 : i32
    %1202 = arith.index_cast %1201 : i32 to index
    %1203 = memref.load %arg1[%1202] : memref<128xi32, #tpu.memory_space<smem>>
    %c75_i32_300 = arith.constant 75 : i32
    %1204 = arith.addi %0, %c75_i32_300 : i32
    %1205 = arith.index_cast %1204 : i32 to index
    %1206 = memref.load %arg2[%1205] : memref<128xi32, #tpu.memory_space<smem>>
    %1207 = arith.index_cast %1203 : i32 to index
    %c0_301 = arith.constant 0 : index
    %1208 = vector.load %arg3[%1207, %c0_301] : memref<64x32xf32, #tpu.memory_space<vmem>>, vector<1x32xf32>
    %1209 = vector.shape_cast %1208 : vector<1x32xf32> to vector<32xf32>
    %1210 = arith.index_cast %1206 : i32 to index
    %c0_302 = arith.constant 0 : index
    %1211 = vector.load %arg4[%1210, %c0_302] : memref<64x32xf32, #tpu.memory_space<vmem>>, vector<1x32xf32>
    %1212 = vector.shape_cast %1211 : vector<1x32xf32> to vector<32xf32>
    %1213 = arith.mulf %1209, %1212 : vector<32xf32>
    %c75 = arith.constant 75 : index
    %c0_303 = arith.constant 0 : index
    %1214 = vector.load %arg6[%c75, %c0_303] : memref<128x32xf32, #tpu.memory_space<vmem>>, vector<1x32xf32>
    %1215 = vector.shape_cast %1214 : vector<1x32xf32> to vector<32xf32>
    %1216 = vector.shape_cast %1213 : vector<32xf32> to vector<1x32xf32>
    tpu.vector_store %arg6[%c75, %c0_303], %1216 {strides = array<i32>} : memref<128x32xf32, #tpu.memory_space<vmem>>, vector<1x32xf32>,
    %c76_i32 = arith.constant 76 : i32
    %1217 = arith.addi %0, %c76_i32 : i32
    %1218 = arith.index_cast %1217 : i32 to index
    %1219 = memref.load %arg1[%1218] : memref<128xi32, #tpu.memory_space<smem>>
    %c76_i32_304 = arith.constant 76 : i32
    %1220 = arith.addi %0, %c76_i32_304 : i32
    %1221 = arith.index_cast %1220 : i32 to index
    %1222 = memref.load %arg2[%1221] : memref<128xi32, #tpu.memory_space<smem>>
    %1223 = arith.index_cast %1219 : i32 to index
    %c0_305 = arith.constant 0 : index
    %1224 = vector.load %arg3[%1223, %c0_305] : memref<64x32xf32, #tpu.memory_space<vmem>>, vector<1x32xf32>
    %1225 = vector.shape_cast %1224 : vector<1x32xf32> to vector<32xf32>
    %1226 = arith.index_cast %1222 : i32 to index
    %c0_306 = arith.constant 0 : index
    %1227 = vector.load %arg4[%1226, %c0_306] : memref<64x32xf32, #tpu.memory_space<vmem>>, vector<1x32xf32>
    %1228 = vector.shape_cast %1227 : vector<1x32xf32> to vector<32xf32>
    %1229 = arith.mulf %1225, %1228 : vector<32xf32>
    %c76 = arith.constant 76 : index
    %c0_307 = arith.constant 0 : index
    %1230 = vector.load %arg6[%c76, %c0_307] : memref<128x32xf32, #tpu.memory_space<vmem>>, vector<1x32xf32>
    %1231 = vector.shape_cast %1230 : vector<1x32xf32> to vector<32xf32>
    %1232 = vector.shape_cast %1229 : vector<32xf32> to vector<1x32xf32>
    tpu.vector_store %arg6[%c76, %c0_307], %1232 {strides = array<i32>} : memref<128x32xf32, #tpu.memory_space<vmem>>, vector<1x32xf32>,
    %c77_i32 = arith.constant 77 : i32
    %1233 = arith.addi %0, %c77_i32 : i32
    %1234 = arith.index_cast %1233 : i32 to index
    %1235 = memref.load %arg1[%1234] : memref<128xi32, #tpu.memory_space<smem>>
    %c77_i32_308 = arith.constant 77 : i32
    %1236 = arith.addi %0, %c77_i32_308 : i32
    %1237 = arith.index_cast %1236 : i32 to index
    %1238 = memref.load %arg2[%1237] : memref<128xi32, #tpu.memory_space<smem>>
    %1239 = arith.index_cast %1235 : i32 to index
    %c0_309 = arith.constant 0 : index
    %1240 = vector.load %arg3[%1239, %c0_309] : memref<64x32xf32, #tpu.memory_space<vmem>>, vector<1x32xf32>
    %1241 = vector.shape_cast %1240 : vector<1x32xf32> to vector<32xf32>
    %1242 = arith.index_cast %1238 : i32 to index
    %c0_310 = arith.constant 0 : index
    %1243 = vector.load %arg4[%1242, %c0_310] : memref<64x32xf32, #tpu.memory_space<vmem>>, vector<1x32xf32>
    %1244 = vector.shape_cast %1243 : vector<1x32xf32> to vector<32xf32>
    %1245 = arith.mulf %1241, %1244 : vector<32xf32>
    %c77 = arith.constant 77 : index
    %c0_311 = arith.constant 0 : index
    %1246 = vector.load %arg6[%c77, %c0_311] : memref<128x32xf32, #tpu.memory_space<vmem>>, vector<1x32xf32>
    %1247 = vector.shape_cast %1246 : vector<1x32xf32> to vector<32xf32>
    %1248 = vector.shape_cast %1245 : vector<32xf32> to vector<1x32xf32>
    tpu.vector_store %arg6[%c77, %c0_311], %1248 {strides = array<i32>} : memref<128x32xf32, #tpu.memory_space<vmem>>, vector<1x32xf32>,
    %c78_i32 = arith.constant 78 : i32
    %1249 = arith.addi %0, %c78_i32 : i32
    %1250 = arith.index_cast %1249 : i32 to index
    %1251 = memref.load %arg1[%1250] : memref<128xi32, #tpu.memory_space<smem>>
    %c78_i32_312 = arith.constant 78 : i32
    %1252 = arith.addi %0, %c78_i32_312 : i32
    %1253 = arith.index_cast %1252 : i32 to index
    %1254 = memref.load %arg2[%1253] : memref<128xi32, #tpu.memory_space<smem>>
    %1255 = arith.index_cast %1251 : i32 to index
    %c0_313 = arith.constant 0 : index
    %1256 = vector.load %arg3[%1255, %c0_313] : memref<64x32xf32, #tpu.memory_space<vmem>>, vector<1x32xf32>
    %1257 = vector.shape_cast %1256 : vector<1x32xf32> to vector<32xf32>
    %1258 = arith.index_cast %1254 : i32 to index
    %c0_314 = arith.constant 0 : index
    %1259 = vector.load %arg4[%1258, %c0_314] : memref<64x32xf32, #tpu.memory_space<vmem>>, vector<1x32xf32>
    %1260 = vector.shape_cast %1259 : vector<1x32xf32> to vector<32xf32>
    %1261 = arith.mulf %1257, %1260 : vector<32xf32>
    %c78 = arith.constant 78 : index
    %c0_315 = arith.constant 0 : index
    %1262 = vector.load %arg6[%c78, %c0_315] : memref<128x32xf32, #tpu.memory_space<vmem>>, vector<1x32xf32>
    %1263 = vector.shape_cast %1262 : vector<1x32xf32> to vector<32xf32>
    %1264 = vector.shape_cast %1261 : vector<32xf32> to vector<1x32xf32>
    tpu.vector_store %arg6[%c78, %c0_315], %1264 {strides = array<i32>} : memref<128x32xf32, #tpu.memory_space<vmem>>, vector<1x32xf32>,
    %c79_i32 = arith.constant 79 : i32
    %1265 = arith.addi %0, %c79_i32 : i32
    %1266 = arith.index_cast %1265 : i32 to index
    %1267 = memref.load %arg1[%1266] : memref<128xi32, #tpu.memory_space<smem>>
    %c79_i32_316 = arith.constant 79 : i32
    %1268 = arith.addi %0, %c79_i32_316 : i32
    %1269 = arith.index_cast %1268 : i32 to index
    %1270 = memref.load %arg2[%1269] : memref<128xi32, #tpu.memory_space<smem>>
    %1271 = arith.index_cast %1267 : i32 to index
    %c0_317 = arith.constant 0 : index
    %1272 = vector.load %arg3[%1271, %c0_317] : memref<64x32xf32, #tpu.memory_space<vmem>>, vector<1x32xf32>
    %1273 = vector.shape_cast %1272 : vector<1x32xf32> to vector<32xf32>
    %1274 = arith.index_cast %1270 : i32 to index
    %c0_318 = arith.constant 0 : index
    %1275 = vector.load %arg4[%1274, %c0_318] : memref<64x32xf32, #tpu.memory_space<vmem>>, vector<1x32xf32>
    %1276 = vector.shape_cast %1275 : vector<1x32xf32> to vector<32xf32>
    %1277 = arith.mulf %1273, %1276 : vector<32xf32>
    %c79 = arith.constant 79 : index
    %c0_319 = arith.constant 0 : index
    %1278 = vector.load %arg6[%c79, %c0_319] : memref<128x32xf32, #tpu.memory_space<vmem>>, vector<1x32xf32>
    %1279 = vector.shape_cast %1278 : vector<1x32xf32> to vector<32xf32>
    %1280 = vector.shape_cast %1277 : vector<32xf32> to vector<1x32xf32>
    tpu.vector_store %arg6[%c79, %c0_319], %1280 {strides = array<i32>} : memref<128x32xf32, #tpu.memory_space<vmem>>, vector<1x32xf32>,
    %c80_i32 = arith.constant 80 : i32
    %1281 = arith.addi %0, %c80_i32 : i32
    %1282 = arith.index_cast %1281 : i32 to index
    %1283 = memref.load %arg1[%1282] : memref<128xi32, #tpu.memory_space<smem>>
    %c80_i32_320 = arith.constant 80 : i32
    %1284 = arith.addi %0, %c80_i32_320 : i32
    %1285 = arith.index_cast %1284 : i32 to index
    %1286 = memref.load %arg2[%1285] : memref<128xi32, #tpu.memory_space<smem>>
    %1287 = arith.index_cast %1283 : i32 to index
    %c0_321 = arith.constant 0 : index
    %1288 = vector.load %arg3[%1287, %c0_321] : memref<64x32xf32, #tpu.memory_space<vmem>>, vector<1x32xf32>
    %1289 = vector.shape_cast %1288 : vector<1x32xf32> to vector<32xf32>
    %1290 = arith.index_cast %1286 : i32 to index
    %c0_322 = arith.constant 0 : index
    %1291 = vector.load %arg4[%1290, %c0_322] : memref<64x32xf32, #tpu.memory_space<vmem>>, vector<1x32xf32>
    %1292 = vector.shape_cast %1291 : vector<1x32xf32> to vector<32xf32>
    %1293 = arith.mulf %1289, %1292 : vector<32xf32>
    %c80 = arith.constant 80 : index
    %c0_323 = arith.constant 0 : index
    %1294 = vector.load %arg6[%c80, %c0_323] : memref<128x32xf32, #tpu.memory_space<vmem>>, vector<1x32xf32>
    %1295 = vector.shape_cast %1294 : vector<1x32xf32> to vector<32xf32>
    %1296 = vector.shape_cast %1293 : vector<32xf32> to vector<1x32xf32>
    tpu.vector_store %arg6[%c80, %c0_323], %1296 {strides = array<i32>} : memref<128x32xf32, #tpu.memory_space<vmem>>, vector<1x32xf32>,
    %c81_i32 = arith.constant 81 : i32
    %1297 = arith.addi %0, %c81_i32 : i32
    %1298 = arith.index_cast %1297 : i32 to index
    %1299 = memref.load %arg1[%1298] : memref<128xi32, #tpu.memory_space<smem>>
    %c81_i32_324 = arith.constant 81 : i32
    %1300 = arith.addi %0, %c81_i32_324 : i32
    %1301 = arith.index_cast %1300 : i32 to index
    %1302 = memref.load %arg2[%1301] : memref<128xi32, #tpu.memory_space<smem>>
    %1303 = arith.index_cast %1299 : i32 to index
    %c0_325 = arith.constant 0 : index
    %1304 = vector.load %arg3[%1303, %c0_325] : memref<64x32xf32, #tpu.memory_space<vmem>>, vector<1x32xf32>
    %1305 = vector.shape_cast %1304 : vector<1x32xf32> to vector<32xf32>
    %1306 = arith.index_cast %1302 : i32 to index
    %c0_326 = arith.constant 0 : index
    %1307 = vector.load %arg4[%1306, %c0_326] : memref<64x32xf32, #tpu.memory_space<vmem>>, vector<1x32xf32>
    %1308 = vector.shape_cast %1307 : vector<1x32xf32> to vector<32xf32>
    %1309 = arith.mulf %1305, %1308 : vector<32xf32>
    %c81 = arith.constant 81 : index
    %c0_327 = arith.constant 0 : index
    %1310 = vector.load %arg6[%c81, %c0_327] : memref<128x32xf32, #tpu.memory_space<vmem>>, vector<1x32xf32>
    %1311 = vector.shape_cast %1310 : vector<1x32xf32> to vector<32xf32>
    %1312 = vector.shape_cast %1309 : vector<32xf32> to vector<1x32xf32>
    tpu.vector_store %arg6[%c81, %c0_327], %1312 {strides = array<i32>} : memref<128x32xf32, #tpu.memory_space<vmem>>, vector<1x32xf32>,
    %c82_i32 = arith.constant 82 : i32
    %1313 = arith.addi %0, %c82_i32 : i32
    %1314 = arith.index_cast %1313 : i32 to index
    %1315 = memref.load %arg1[%1314] : memref<128xi32, #tpu.memory_space<smem>>
    %c82_i32_328 = arith.constant 82 : i32
    %1316 = arith.addi %0, %c82_i32_328 : i32
    %1317 = arith.index_cast %1316 : i32 to index
    %1318 = memref.load %arg2[%1317] : memref<128xi32, #tpu.memory_space<smem>>
    %1319 = arith.index_cast %1315 : i32 to index
    %c0_329 = arith.constant 0 : index
    %1320 = vector.load %arg3[%1319, %c0_329] : memref<64x32xf32, #tpu.memory_space<vmem>>, vector<1x32xf32>
    %1321 = vector.shape_cast %1320 : vector<1x32xf32> to vector<32xf32>
    %1322 = arith.index_cast %1318 : i32 to index
    %c0_330 = arith.constant 0 : index
    %1323 = vector.load %arg4[%1322, %c0_330] : memref<64x32xf32, #tpu.memory_space<vmem>>, vector<1x32xf32>
    %1324 = vector.shape_cast %1323 : vector<1x32xf32> to vector<32xf32>
    %1325 = arith.mulf %1321, %1324 : vector<32xf32>
    %c82 = arith.constant 82 : index
    %c0_331 = arith.constant 0 : index
    %1326 = vector.load %arg6[%c82, %c0_331] : memref<128x32xf32, #tpu.memory_space<vmem>>, vector<1x32xf32>
    %1327 = vector.shape_cast %1326 : vector<1x32xf32> to vector<32xf32>
    %1328 = vector.shape_cast %1325 : vector<32xf32> to vector<1x32xf32>
    tpu.vector_store %arg6[%c82, %c0_331], %1328 {strides = array<i32>} : memref<128x32xf32, #tpu.memory_space<vmem>>, vector<1x32xf32>,
    %c83_i32 = arith.constant 83 : i32
    %1329 = arith.addi %0, %c83_i32 : i32
    %1330 = arith.index_cast %1329 : i32 to index
    %1331 = memref.load %arg1[%1330] : memref<128xi32, #tpu.memory_space<smem>>
    %c83_i32_332 = arith.constant 83 : i32
    %1332 = arith.addi %0, %c83_i32_332 : i32
    %1333 = arith.index_cast %1332 : i32 to index
    %1334 = memref.load %arg2[%1333] : memref<128xi32, #tpu.memory_space<smem>>
    %1335 = arith.index_cast %1331 : i32 to index
    %c0_333 = arith.constant 0 : index
    %1336 = vector.load %arg3[%1335, %c0_333] : memref<64x32xf32, #tpu.memory_space<vmem>>, vector<1x32xf32>
    %1337 = vector.shape_cast %1336 : vector<1x32xf32> to vector<32xf32>
    %1338 = arith.index_cast %1334 : i32 to index
    %c0_334 = arith.constant 0 : index
    %1339 = vector.load %arg4[%1338, %c0_334] : memref<64x32xf32, #tpu.memory_space<vmem>>, vector<1x32xf32>
    %1340 = vector.shape_cast %1339 : vector<1x32xf32> to vector<32xf32>
    %1341 = arith.mulf %1337, %1340 : vector<32xf32>
    %c83 = arith.constant 83 : index
    %c0_335 = arith.constant 0 : index
    %1342 = vector.load %arg6[%c83, %c0_335] : memref<128x32xf32, #tpu.memory_space<vmem>>, vector<1x32xf32>
    %1343 = vector.shape_cast %1342 : vector<1x32xf32> to vector<32xf32>
    %1344 = vector.shape_cast %1341 : vector<32xf32> to vector<1x32xf32>
    tpu.vector_store %arg6[%c83, %c0_335], %1344 {strides = array<i32>} : memref<128x32xf32, #tpu.memory_space<vmem>>, vector<1x32xf32>,
    %c84_i32 = arith.constant 84 : i32
    %1345 = arith.addi %0, %c84_i32 : i32
    %1346 = arith.index_cast %1345 : i32 to index
    %1347 = memref.load %arg1[%1346] : memref<128xi32, #tpu.memory_space<smem>>
    %c84_i32_336 = arith.constant 84 : i32
    %1348 = arith.addi %0, %c84_i32_336 : i32
    %1349 = arith.index_cast %1348 : i32 to index
    %1350 = memref.load %arg2[%1349] : memref<128xi32, #tpu.memory_space<smem>>
    %1351 = arith.index_cast %1347 : i32 to index
    %c0_337 = arith.constant 0 : index
    %1352 = vector.load %arg3[%1351, %c0_337] : memref<64x32xf32, #tpu.memory_space<vmem>>, vector<1x32xf32>
    %1353 = vector.shape_cast %1352 : vector<1x32xf32> to vector<32xf32>
    %1354 = arith.index_cast %1350 : i32 to index
    %c0_338 = arith.constant 0 : index
    %1355 = vector.load %arg4[%1354, %c0_338] : memref<64x32xf32, #tpu.memory_space<vmem>>, vector<1x32xf32>
    %1356 = vector.shape_cast %1355 : vector<1x32xf32> to vector<32xf32>
    %1357 = arith.mulf %1353, %1356 : vector<32xf32>
    %c84 = arith.constant 84 : index
    %c0_339 = arith.constant 0 : index
    %1358 = vector.load %arg6[%c84, %c0_339] : memref<128x32xf32, #tpu.memory_space<vmem>>, vector<1x32xf32>
    %1359 = vector.shape_cast %1358 : vector<1x32xf32> to vector<32xf32>
    %1360 = vector.shape_cast %1357 : vector<32xf32> to vector<1x32xf32>
    tpu.vector_store %arg6[%c84, %c0_339], %1360 {strides = array<i32>} : memref<128x32xf32, #tpu.memory_space<vmem>>, vector<1x32xf32>,
    %c85_i32 = arith.constant 85 : i32
    %1361 = arith.addi %0, %c85_i32 : i32
    %1362 = arith.index_cast %1361 : i32 to index
    %1363 = memref.load %arg1[%1362] : memref<128xi32, #tpu.memory_space<smem>>
    %c85_i32_340 = arith.constant 85 : i32
    %1364 = arith.addi %0, %c85_i32_340 : i32
    %1365 = arith.index_cast %1364 : i32 to index
    %1366 = memref.load %arg2[%1365] : memref<128xi32, #tpu.memory_space<smem>>
    %1367 = arith.index_cast %1363 : i32 to index
    %c0_341 = arith.constant 0 : index
    %1368 = vector.load %arg3[%1367, %c0_341] : memref<64x32xf32, #tpu.memory_space<vmem>>, vector<1x32xf32>
    %1369 = vector.shape_cast %1368 : vector<1x32xf32> to vector<32xf32>
    %1370 = arith.index_cast %1366 : i32 to index
    %c0_342 = arith.constant 0 : index
    %1371 = vector.load %arg4[%1370, %c0_342] : memref<64x32xf32, #tpu.memory_space<vmem>>, vector<1x32xf32>
    %1372 = vector.shape_cast %1371 : vector<1x32xf32> to vector<32xf32>
    %1373 = arith.mulf %1369, %1372 : vector<32xf32>
    %c85 = arith.constant 85 : index
    %c0_343 = arith.constant 0 : index
    %1374 = vector.load %arg6[%c85, %c0_343] : memref<128x32xf32, #tpu.memory_space<vmem>>, vector<1x32xf32>
    %1375 = vector.shape_cast %1374 : vector<1x32xf32> to vector<32xf32>
    %1376 = vector.shape_cast %1373 : vector<32xf32> to vector<1x32xf32>
    tpu.vector_store %arg6[%c85, %c0_343], %1376 {strides = array<i32>} : memref<128x32xf32, #tpu.memory_space<vmem>>, vector<1x32xf32>,
    %c86_i32 = arith.constant 86 : i32
    %1377 = arith.addi %0, %c86_i32 : i32
    %1378 = arith.index_cast %1377 : i32 to index
    %1379 = memref.load %arg1[%1378] : memref<128xi32, #tpu.memory_space<smem>>
    %c86_i32_344 = arith.constant 86 : i32
    %1380 = arith.addi %0, %c86_i32_344 : i32
    %1381 = arith.index_cast %1380 : i32 to index
    %1382 = memref.load %arg2[%1381] : memref<128xi32, #tpu.memory_space<smem>>
    %1383 = arith.index_cast %1379 : i32 to index
    %c0_345 = arith.constant 0 : index
    %1384 = vector.load %arg3[%1383, %c0_345] : memref<64x32xf32, #tpu.memory_space<vmem>>, vector<1x32xf32>
    %1385 = vector.shape_cast %1384 : vector<1x32xf32> to vector<32xf32>
    %1386 = arith.index_cast %1382 : i32 to index
    %c0_346 = arith.constant 0 : index
    %1387 = vector.load %arg4[%1386, %c0_346] : memref<64x32xf32, #tpu.memory_space<vmem>>, vector<1x32xf32>
    %1388 = vector.shape_cast %1387 : vector<1x32xf32> to vector<32xf32>
    %1389 = arith.mulf %1385, %1388 : vector<32xf32>
    %c86 = arith.constant 86 : index
    %c0_347 = arith.constant 0 : index
    %1390 = vector.load %arg6[%c86, %c0_347] : memref<128x32xf32, #tpu.memory_space<vmem>>, vector<1x32xf32>
    %1391 = vector.shape_cast %1390 : vector<1x32xf32> to vector<32xf32>
    %1392 = vector.shape_cast %1389 : vector<32xf32> to vector<1x32xf32>
    tpu.vector_store %arg6[%c86, %c0_347], %1392 {strides = array<i32>} : memref<128x32xf32, #tpu.memory_space<vmem>>, vector<1x32xf32>,
    %c87_i32 = arith.constant 87 : i32
    %1393 = arith.addi %0, %c87_i32 : i32
    %1394 = arith.index_cast %1393 : i32 to index
    %1395 = memref.load %arg1[%1394] : memref<128xi32, #tpu.memory_space<smem>>
    %c87_i32_348 = arith.constant 87 : i32
    %1396 = arith.addi %0, %c87_i32_348 : i32
    %1397 = arith.index_cast %1396 : i32 to index
    %1398 = memref.load %arg2[%1397] : memref<128xi32, #tpu.memory_space<smem>>
    %1399 = arith.index_cast %1395 : i32 to index
    %c0_349 = arith.constant 0 : index
    %1400 = vector.load %arg3[%1399, %c0_349] : memref<64x32xf32, #tpu.memory_space<vmem>>, vector<1x32xf32>
    %1401 = vector.shape_cast %1400 : vector<1x32xf32> to vector<32xf32>
    %1402 = arith.index_cast %1398 : i32 to index
    %c0_350 = arith.constant 0 : index
    %1403 = vector.load %arg4[%1402, %c0_350] : memref<64x32xf32, #tpu.memory_space<vmem>>, vector<1x32xf32>
    %1404 = vector.shape_cast %1403 : vector<1x32xf32> to vector<32xf32>
    %1405 = arith.mulf %1401, %1404 : vector<32xf32>
    %c87 = arith.constant 87 : index
    %c0_351 = arith.constant 0 : index
    %1406 = vector.load %arg6[%c87, %c0_351] : memref<128x32xf32, #tpu.memory_space<vmem>>, vector<1x32xf32>
    %1407 = vector.shape_cast %1406 : vector<1x32xf32> to vector<32xf32>
    %1408 = vector.shape_cast %1405 : vector<32xf32> to vector<1x32xf32>
    tpu.vector_store %arg6[%c87, %c0_351], %1408 {strides = array<i32>} : memref<128x32xf32, #tpu.memory_space<vmem>>, vector<1x32xf32>,
    %c88_i32 = arith.constant 88 : i32
    %1409 = arith.addi %0, %c88_i32 : i32
    %1410 = arith.index_cast %1409 : i32 to index
    %1411 = memref.load %arg1[%1410] : memref<128xi32, #tpu.memory_space<smem>>
    %c88_i32_352 = arith.constant 88 : i32
    %1412 = arith.addi %0, %c88_i32_352 : i32
    %1413 = arith.index_cast %1412 : i32 to index
    %1414 = memref.load %arg2[%1413] : memref<128xi32, #tpu.memory_space<smem>>
    %1415 = arith.index_cast %1411 : i32 to index
    %c0_353 = arith.constant 0 : index
    %1416 = vector.load %arg3[%1415, %c0_353] : memref<64x32xf32, #tpu.memory_space<vmem>>, vector<1x32xf32>
    %1417 = vector.shape_cast %1416 : vector<1x32xf32> to vector<32xf32>
    %1418 = arith.index_cast %1414 : i32 to index
    %c0_354 = arith.constant 0 : index
    %1419 = vector.load %arg4[%1418, %c0_354] : memref<64x32xf32, #tpu.memory_space<vmem>>, vector<1x32xf32>
    %1420 = vector.shape_cast %1419 : vector<1x32xf32> to vector<32xf32>
    %1421 = arith.mulf %1417, %1420 : vector<32xf32>
    %c88 = arith.constant 88 : index
    %c0_355 = arith.constant 0 : index
    %1422 = vector.load %arg6[%c88, %c0_355] : memref<128x32xf32, #tpu.memory_space<vmem>>, vector<1x32xf32>
    %1423 = vector.shape_cast %1422 : vector<1x32xf32> to vector<32xf32>
    %1424 = vector.shape_cast %1421 : vector<32xf32> to vector<1x32xf32>
    tpu.vector_store %arg6[%c88, %c0_355], %1424 {strides = array<i32>} : memref<128x32xf32, #tpu.memory_space<vmem>>, vector<1x32xf32>,
    %c89_i32 = arith.constant 89 : i32
    %1425 = arith.addi %0, %c89_i32 : i32
    %1426 = arith.index_cast %1425 : i32 to index
    %1427 = memref.load %arg1[%1426] : memref<128xi32, #tpu.memory_space<smem>>
    %c89_i32_356 = arith.constant 89 : i32
    %1428 = arith.addi %0, %c89_i32_356 : i32
    %1429 = arith.index_cast %1428 : i32 to index
    %1430 = memref.load %arg2[%1429] : memref<128xi32, #tpu.memory_space<smem>>
    %1431 = arith.index_cast %1427 : i32 to index
    %c0_357 = arith.constant 0 : index
    %1432 = vector.load %arg3[%1431, %c0_357] : memref<64x32xf32, #tpu.memory_space<vmem>>, vector<1x32xf32>
    %1433 = vector.shape_cast %1432 : vector<1x32xf32> to vector<32xf32>
    %1434 = arith.index_cast %1430 : i32 to index
    %c0_358 = arith.constant 0 : index
    %1435 = vector.load %arg4[%1434, %c0_358] : memref<64x32xf32, #tpu.memory_space<vmem>>, vector<1x32xf32>
    %1436 = vector.shape_cast %1435 : vector<1x32xf32> to vector<32xf32>
    %1437 = arith.mulf %1433, %1436 : vector<32xf32>
    %c89 = arith.constant 89 : index
    %c0_359 = arith.constant 0 : index
    %1438 = vector.load %arg6[%c89, %c0_359] : memref<128x32xf32, #tpu.memory_space<vmem>>, vector<1x32xf32>
    %1439 = vector.shape_cast %1438 : vector<1x32xf32> to vector<32xf32>
    %1440 = vector.shape_cast %1437 : vector<32xf32> to vector<1x32xf32>
    tpu.vector_store %arg6[%c89, %c0_359], %1440 {strides = array<i32>} : memref<128x32xf32, #tpu.memory_space<vmem>>, vector<1x32xf32>,
    %c90_i32 = arith.constant 90 : i32
    %1441 = arith.addi %0, %c90_i32 : i32
    %1442 = arith.index_cast %1441 : i32 to index
    %1443 = memref.load %arg1[%1442] : memref<128xi32, #tpu.memory_space<smem>>
    %c90_i32_360 = arith.constant 90 : i32
    %1444 = arith.addi %0, %c90_i32_360 : i32
    %1445 = arith.index_cast %1444 : i32 to index
    %1446 = memref.load %arg2[%1445] : memref<128xi32, #tpu.memory_space<smem>>
    %1447 = arith.index_cast %1443 : i32 to index
    %c0_361 = arith.constant 0 : index
    %1448 = vector.load %arg3[%1447, %c0_361] : memref<64x32xf32, #tpu.memory_space<vmem>>, vector<1x32xf32>
    %1449 = vector.shape_cast %1448 : vector<1x32xf32> to vector<32xf32>
    %1450 = arith.index_cast %1446 : i32 to index
    %c0_362 = arith.constant 0 : index
    %1451 = vector.load %arg4[%1450, %c0_362] : memref<64x32xf32, #tpu.memory_space<vmem>>, vector<1x32xf32>
    %1452 = vector.shape_cast %1451 : vector<1x32xf32> to vector<32xf32>
    %1453 = arith.mulf %1449, %1452 : vector<32xf32>
    %c90 = arith.constant 90 : index
    %c0_363 = arith.constant 0 : index
    %1454 = vector.load %arg6[%c90, %c0_363] : memref<128x32xf32, #tpu.memory_space<vmem>>, vector<1x32xf32>
    %1455 = vector.shape_cast %1454 : vector<1x32xf32> to vector<32xf32>
    %1456 = vector.shape_cast %1453 : vector<32xf32> to vector<1x32xf32>
    tpu.vector_store %arg6[%c90, %c0_363], %1456 {strides = array<i32>} : memref<128x32xf32, #tpu.memory_space<vmem>>, vector<1x32xf32>,
    %c91_i32 = arith.constant 91 : i32
    %1457 = arith.addi %0, %c91_i32 : i32
    %1458 = arith.index_cast %1457 : i32 to index
    %1459 = memref.load %arg1[%1458] : memref<128xi32, #tpu.memory_space<smem>>
    %c91_i32_364 = arith.constant 91 : i32
    %1460 = arith.addi %0, %c91_i32_364 : i32
    %1461 = arith.index_cast %1460 : i32 to index
    %1462 = memref.load %arg2[%1461] : memref<128xi32, #tpu.memory_space<smem>>
    %1463 = arith.index_cast %1459 : i32 to index
    %c0_365 = arith.constant 0 : index
    %1464 = vector.load %arg3[%1463, %c0_365] : memref<64x32xf32, #tpu.memory_space<vmem>>, vector<1x32xf32>
    %1465 = vector.shape_cast %1464 : vector<1x32xf32> to vector<32xf32>
    %1466 = arith.index_cast %1462 : i32 to index
    %c0_366 = arith.constant 0 : index
    %1467 = vector.load %arg4[%1466, %c0_366] : memref<64x32xf32, #tpu.memory_space<vmem>>, vector<1x32xf32>
    %1468 = vector.shape_cast %1467 : vector<1x32xf32> to vector<32xf32>
    %1469 = arith.mulf %1465, %1468 : vector<32xf32>
    %c91 = arith.constant 91 : index
    %c0_367 = arith.constant 0 : index
    %1470 = vector.load %arg6[%c91, %c0_367] : memref<128x32xf32, #tpu.memory_space<vmem>>, vector<1x32xf32>
    %1471 = vector.shape_cast %1470 : vector<1x32xf32> to vector<32xf32>
    %1472 = vector.shape_cast %1469 : vector<32xf32> to vector<1x32xf32>
    tpu.vector_store %arg6[%c91, %c0_367], %1472 {strides = array<i32>} : memref<128x32xf32, #tpu.memory_space<vmem>>, vector<1x32xf32>,
    %c92_i32 = arith.constant 92 : i32
    %1473 = arith.addi %0, %c92_i32 : i32
    %1474 = arith.index_cast %1473 : i32 to index
    %1475 = memref.load %arg1[%1474] : memref<128xi32, #tpu.memory_space<smem>>
    %c92_i32_368 = arith.constant 92 : i32
    %1476 = arith.addi %0, %c92_i32_368 : i32
    %1477 = arith.index_cast %1476 : i32 to index
    %1478 = memref.load %arg2[%1477] : memref<128xi32, #tpu.memory_space<smem>>
    %1479 = arith.index_cast %1475 : i32 to index
    %c0_369 = arith.constant 0 : index
    %1480 = vector.load %arg3[%1479, %c0_369] : memref<64x32xf32, #tpu.memory_space<vmem>>, vector<1x32xf32>
    %1481 = vector.shape_cast %1480 : vector<1x32xf32> to vector<32xf32>
    %1482 = arith.index_cast %1478 : i32 to index
    %c0_370 = arith.constant 0 : index
    %1483 = vector.load %arg4[%1482, %c0_370] : memref<64x32xf32, #tpu.memory_space<vmem>>, vector<1x32xf32>
    %1484 = vector.shape_cast %1483 : vector<1x32xf32> to vector<32xf32>
    %1485 = arith.mulf %1481, %1484 : vector<32xf32>
    %c92 = arith.constant 92 : index
    %c0_371 = arith.constant 0 : index
    %1486 = vector.load %arg6[%c92, %c0_371] : memref<128x32xf32, #tpu.memory_space<vmem>>, vector<1x32xf32>
    %1487 = vector.shape_cast %1486 : vector<1x32xf32> to vector<32xf32>
    %1488 = vector.shape_cast %1485 : vector<32xf32> to vector<1x32xf32>
    tpu.vector_store %arg6[%c92, %c0_371], %1488 {strides = array<i32>} : memref<128x32xf32, #tpu.memory_space<vmem>>, vector<1x32xf32>,
    %c93_i32 = arith.constant 93 : i32
    %1489 = arith.addi %0, %c93_i32 : i32
    %1490 = arith.index_cast %1489 : i32 to index
    %1491 = memref.load %arg1[%1490] : memref<128xi32, #tpu.memory_space<smem>>
    %c93_i32_372 = arith.constant 93 : i32
    %1492 = arith.addi %0, %c93_i32_372 : i32
    %1493 = arith.index_cast %1492 : i32 to index
    %1494 = memref.load %arg2[%1493] : memref<128xi32, #tpu.memory_space<smem>>
    %1495 = arith.index_cast %1491 : i32 to index
    %c0_373 = arith.constant 0 : index
    %1496 = vector.load %arg3[%1495, %c0_373] : memref<64x32xf32, #tpu.memory_space<vmem>>, vector<1x32xf32>
    %1497 = vector.shape_cast %1496 : vector<1x32xf32> to vector<32xf32>
    %1498 = arith.index_cast %1494 : i32 to index
    %c0_374 = arith.constant 0 : index
    %1499 = vector.load %arg4[%1498, %c0_374] : memref<64x32xf32, #tpu.memory_space<vmem>>, vector<1x32xf32>
    %1500 = vector.shape_cast %1499 : vector<1x32xf32> to vector<32xf32>
    %1501 = arith.mulf %1497, %1500 : vector<32xf32>
    %c93 = arith.constant 93 : index
    %c0_375 = arith.constant 0 : index
    %1502 = vector.load %arg6[%c93, %c0_375] : memref<128x32xf32, #tpu.memory_space<vmem>>, vector<1x32xf32>
    %1503 = vector.shape_cast %1502 : vector<1x32xf32> to vector<32xf32>
    %1504 = vector.shape_cast %1501 : vector<32xf32> to vector<1x32xf32>
    tpu.vector_store %arg6[%c93, %c0_375], %1504 {strides = array<i32>} : memref<128x32xf32, #tpu.memory_space<vmem>>, vector<1x32xf32>,
    %c94_i32 = arith.constant 94 : i32
    %1505 = arith.addi %0, %c94_i32 : i32
    %1506 = arith.index_cast %1505 : i32 to index
    %1507 = memref.load %arg1[%1506] : memref<128xi32, #tpu.memory_space<smem>>
    %c94_i32_376 = arith.constant 94 : i32
    %1508 = arith.addi %0, %c94_i32_376 : i32
    %1509 = arith.index_cast %1508 : i32 to index
    %1510 = memref.load %arg2[%1509] : memref<128xi32, #tpu.memory_space<smem>>
    %1511 = arith.index_cast %1507 : i32 to index
    %c0_377 = arith.constant 0 : index
    %1512 = vector.load %arg3[%1511, %c0_377] : memref<64x32xf32, #tpu.memory_space<vmem>>, vector<1x32xf32>
    %1513 = vector.shape_cast %1512 : vector<1x32xf32> to vector<32xf32>
    %1514 = arith.index_cast %1510 : i32 to index
    %c0_378 = arith.constant 0 : index
    %1515 = vector.load %arg4[%1514, %c0_378] : memref<64x32xf32, #tpu.memory_space<vmem>>, vector<1x32xf32>
    %1516 = vector.shape_cast %1515 : vector<1x32xf32> to vector<32xf32>
    %1517 = arith.mulf %1513, %1516 : vector<32xf32>
    %c94 = arith.constant 94 : index
    %c0_379 = arith.constant 0 : index
    %1518 = vector.load %arg6[%c94, %c0_379] : memref<128x32xf32, #tpu.memory_space<vmem>>, vector<1x32xf32>
    %1519 = vector.shape_cast %1518 : vector<1x32xf32> to vector<32xf32>
    %1520 = vector.shape_cast %1517 : vector<32xf32> to vector<1x32xf32>
    tpu.vector_store %arg6[%c94, %c0_379], %1520 {strides = array<i32>} : memref<128x32xf32, #tpu.memory_space<vmem>>, vector<1x32xf32>,
    %c95_i32 = arith.constant 95 : i32
    %1521 = arith.addi %0, %c95_i32 : i32
    %1522 = arith.index_cast %1521 : i32 to index
    %1523 = memref.load %arg1[%1522] : memref<128xi32, #tpu.memory_space<smem>>
    %c95_i32_380 = arith.constant 95 : i32
    %1524 = arith.addi %0, %c95_i32_380 : i32
    %1525 = arith.index_cast %1524 : i32 to index
    %1526 = memref.load %arg2[%1525] : memref<128xi32, #tpu.memory_space<smem>>
    %1527 = arith.index_cast %1523 : i32 to index
    %c0_381 = arith.constant 0 : index
    %1528 = vector.load %arg3[%1527, %c0_381] : memref<64x32xf32, #tpu.memory_space<vmem>>, vector<1x32xf32>
    %1529 = vector.shape_cast %1528 : vector<1x32xf32> to vector<32xf32>
    %1530 = arith.index_cast %1526 : i32 to index
    %c0_382 = arith.constant 0 : index
    %1531 = vector.load %arg4[%1530, %c0_382] : memref<64x32xf32, #tpu.memory_space<vmem>>, vector<1x32xf32>
    %1532 = vector.shape_cast %1531 : vector<1x32xf32> to vector<32xf32>
    %1533 = arith.mulf %1529, %1532 : vector<32xf32>
    %c95 = arith.constant 95 : index
    %c0_383 = arith.constant 0 : index
    %1534 = vector.load %arg6[%c95, %c0_383] : memref<128x32xf32, #tpu.memory_space<vmem>>, vector<1x32xf32>
    %1535 = vector.shape_cast %1534 : vector<1x32xf32> to vector<32xf32>
    %1536 = vector.shape_cast %1533 : vector<32xf32> to vector<1x32xf32>
    tpu.vector_store %arg6[%c95, %c0_383], %1536 {strides = array<i32>} : memref<128x32xf32, #tpu.memory_space<vmem>>, vector<1x32xf32>,
    %c96_i32 = arith.constant 96 : i32
    %1537 = arith.addi %0, %c96_i32 : i32
    %1538 = arith.index_cast %1537 : i32 to index
    %1539 = memref.load %arg1[%1538] : memref<128xi32, #tpu.memory_space<smem>>
    %c96_i32_384 = arith.constant 96 : i32
    %1540 = arith.addi %0, %c96_i32_384 : i32
    %1541 = arith.index_cast %1540 : i32 to index
    %1542 = memref.load %arg2[%1541] : memref<128xi32, #tpu.memory_space<smem>>
    %1543 = arith.index_cast %1539 : i32 to index
    %c0_385 = arith.constant 0 : index
    %1544 = vector.load %arg3[%1543, %c0_385] : memref<64x32xf32, #tpu.memory_space<vmem>>, vector<1x32xf32>
    %1545 = vector.shape_cast %1544 : vector<1x32xf32> to vector<32xf32>
    %1546 = arith.index_cast %1542 : i32 to index
    %c0_386 = arith.constant 0 : index
    %1547 = vector.load %arg4[%1546, %c0_386] : memref<64x32xf32, #tpu.memory_space<vmem>>, vector<1x32xf32>
    %1548 = vector.shape_cast %1547 : vector<1x32xf32> to vector<32xf32>
    %1549 = arith.mulf %1545, %1548 : vector<32xf32>
    %c96 = arith.constant 96 : index
    %c0_387 = arith.constant 0 : index
    %1550 = vector.load %arg6[%c96, %c0_387] : memref<128x32xf32, #tpu.memory_space<vmem>>, vector<1x32xf32>
    %1551 = vector.shape_cast %1550 : vector<1x32xf32> to vector<32xf32>
    %1552 = vector.shape_cast %1549 : vector<32xf32> to vector<1x32xf32>
    tpu.vector_store %arg6[%c96, %c0_387], %1552 {strides = array<i32>} : memref<128x32xf32, #tpu.memory_space<vmem>>, vector<1x32xf32>,
    %c97_i32 = arith.constant 97 : i32
    %1553 = arith.addi %0, %c97_i32 : i32
    %1554 = arith.index_cast %1553 : i32 to index
    %1555 = memref.load %arg1[%1554] : memref<128xi32, #tpu.memory_space<smem>>
    %c97_i32_388 = arith.constant 97 : i32
    %1556 = arith.addi %0, %c97_i32_388 : i32
    %1557 = arith.index_cast %1556 : i32 to index
    %1558 = memref.load %arg2[%1557] : memref<128xi32, #tpu.memory_space<smem>>
    %1559 = arith.index_cast %1555 : i32 to index
    %c0_389 = arith.constant 0 : index
    %1560 = vector.load %arg3[%1559, %c0_389] : memref<64x32xf32, #tpu.memory_space<vmem>>, vector<1x32xf32>
    %1561 = vector.shape_cast %1560 : vector<1x32xf32> to vector<32xf32>
    %1562 = arith.index_cast %1558 : i32 to index
    %c0_390 = arith.constant 0 : index
    %1563 = vector.load %arg4[%1562, %c0_390] : memref<64x32xf32, #tpu.memory_space<vmem>>, vector<1x32xf32>
    %1564 = vector.shape_cast %1563 : vector<1x32xf32> to vector<32xf32>
    %1565 = arith.mulf %1561, %1564 : vector<32xf32>
    %c97 = arith.constant 97 : index
    %c0_391 = arith.constant 0 : index
    %1566 = vector.load %arg6[%c97, %c0_391] : memref<128x32xf32, #tpu.memory_space<vmem>>, vector<1x32xf32>
    %1567 = vector.shape_cast %1566 : vector<1x32xf32> to vector<32xf32>
    %1568 = vector.shape_cast %1565 : vector<32xf32> to vector<1x32xf32>
    tpu.vector_store %arg6[%c97, %c0_391], %1568 {strides = array<i32>} : memref<128x32xf32, #tpu.memory_space<vmem>>, vector<1x32xf32>,
    %c98_i32 = arith.constant 98 : i32
    %1569 = arith.addi %0, %c98_i32 : i32
    %1570 = arith.index_cast %1569 : i32 to index
    %1571 = memref.load %arg1[%1570] : memref<128xi32, #tpu.memory_space<smem>>
    %c98_i32_392 = arith.constant 98 : i32
    %1572 = arith.addi %0, %c98_i32_392 : i32
    %1573 = arith.index_cast %1572 : i32 to index
    %1574 = memref.load %arg2[%1573] : memref<128xi32, #tpu.memory_space<smem>>
    %1575 = arith.index_cast %1571 : i32 to index
    %c0_393 = arith.constant 0 : index
    %1576 = vector.load %arg3[%1575, %c0_393] : memref<64x32xf32, #tpu.memory_space<vmem>>, vector<1x32xf32>
    %1577 = vector.shape_cast %1576 : vector<1x32xf32> to vector<32xf32>
    %1578 = arith.index_cast %1574 : i32 to index
    %c0_394 = arith.constant 0 : index
    %1579 = vector.load %arg4[%1578, %c0_394] : memref<64x32xf32, #tpu.memory_space<vmem>>, vector<1x32xf32>
    %1580 = vector.shape_cast %1579 : vector<1x32xf32> to vector<32xf32>
    %1581 = arith.mulf %1577, %1580 : vector<32xf32>
    %c98 = arith.constant 98 : index
    %c0_395 = arith.constant 0 : index
    %1582 = vector.load %arg6[%c98, %c0_395] : memref<128x32xf32, #tpu.memory_space<vmem>>, vector<1x32xf32>
    %1583 = vector.shape_cast %1582 : vector<1x32xf32> to vector<32xf32>
    %1584 = vector.shape_cast %1581 : vector<32xf32> to vector<1x32xf32>
    tpu.vector_store %arg6[%c98, %c0_395], %1584 {strides = array<i32>} : memref<128x32xf32, #tpu.memory_space<vmem>>, vector<1x32xf32>,
    %c99_i32 = arith.constant 99 : i32
    %1585 = arith.addi %0, %c99_i32 : i32
    %1586 = arith.index_cast %1585 : i32 to index
    %1587 = memref.load %arg1[%1586] : memref<128xi32, #tpu.memory_space<smem>>
    %c99_i32_396 = arith.constant 99 : i32
    %1588 = arith.addi %0, %c99_i32_396 : i32
    %1589 = arith.index_cast %1588 : i32 to index
    %1590 = memref.load %arg2[%1589] : memref<128xi32, #tpu.memory_space<smem>>
    %1591 = arith.index_cast %1587 : i32 to index
    %c0_397 = arith.constant 0 : index
    %1592 = vector.load %arg3[%1591, %c0_397] : memref<64x32xf32, #tpu.memory_space<vmem>>, vector<1x32xf32>
    %1593 = vector.shape_cast %1592 : vector<1x32xf32> to vector<32xf32>
    %1594 = arith.index_cast %1590 : i32 to index
    %c0_398 = arith.constant 0 : index
    %1595 = vector.load %arg4[%1594, %c0_398] : memref<64x32xf32, #tpu.memory_space<vmem>>, vector<1x32xf32>
    %1596 = vector.shape_cast %1595 : vector<1x32xf32> to vector<32xf32>
    %1597 = arith.mulf %1593, %1596 : vector<32xf32>
    %c99 = arith.constant 99 : index
    %c0_399 = arith.constant 0 : index
    %1598 = vector.load %arg6[%c99, %c0_399] : memref<128x32xf32, #tpu.memory_space<vmem>>, vector<1x32xf32>
    %1599 = vector.shape_cast %1598 : vector<1x32xf32> to vector<32xf32>
    %1600 = vector.shape_cast %1597 : vector<32xf32> to vector<1x32xf32>
    tpu.vector_store %arg6[%c99, %c0_399], %1600 {strides = array<i32>} : memref<128x32xf32, #tpu.memory_space<vmem>>, vector<1x32xf32>,
    %c100_i32 = arith.constant 100 : i32
    %1601 = arith.addi %0, %c100_i32 : i32
    %1602 = arith.index_cast %1601 : i32 to index
    %1603 = memref.load %arg1[%1602] : memref<128xi32, #tpu.memory_space<smem>>
    %c100_i32_400 = arith.constant 100 : i32
    %1604 = arith.addi %0, %c100_i32_400 : i32
    %1605 = arith.index_cast %1604 : i32 to index
    %1606 = memref.load %arg2[%1605] : memref<128xi32, #tpu.memory_space<smem>>
    %1607 = arith.index_cast %1603 : i32 to index
    %c0_401 = arith.constant 0 : index
    %1608 = vector.load %arg3[%1607, %c0_401] : memref<64x32xf32, #tpu.memory_space<vmem>>, vector<1x32xf32>
    %1609 = vector.shape_cast %1608 : vector<1x32xf32> to vector<32xf32>
    %1610 = arith.index_cast %1606 : i32 to index
    %c0_402 = arith.constant 0 : index
    %1611 = vector.load %arg4[%1610, %c0_402] : memref<64x32xf32, #tpu.memory_space<vmem>>, vector<1x32xf32>
    %1612 = vector.shape_cast %1611 : vector<1x32xf32> to vector<32xf32>
    %1613 = arith.mulf %1609, %1612 : vector<32xf32>
    %c100 = arith.constant 100 : index
    %c0_403 = arith.constant 0 : index
    %1614 = vector.load %arg6[%c100, %c0_403] : memref<128x32xf32, #tpu.memory_space<vmem>>, vector<1x32xf32>
    %1615 = vector.shape_cast %1614 : vector<1x32xf32> to vector<32xf32>
    %1616 = vector.shape_cast %1613 : vector<32xf32> to vector<1x32xf32>
    tpu.vector_store %arg6[%c100, %c0_403], %1616 {strides = array<i32>} : memref<128x32xf32, #tpu.memory_space<vmem>>, vector<1x32xf32>,
    %c101_i32 = arith.constant 101 : i32
    %1617 = arith.addi %0, %c101_i32 : i32
    %1618 = arith.index_cast %1617 : i32 to index
    %1619 = memref.load %arg1[%1618] : memref<128xi32, #tpu.memory_space<smem>>
    %c101_i32_404 = arith.constant 101 : i32
    %1620 = arith.addi %0, %c101_i32_404 : i32
    %1621 = arith.index_cast %1620 : i32 to index
    %1622 = memref.load %arg2[%1621] : memref<128xi32, #tpu.memory_space<smem>>
    %1623 = arith.index_cast %1619 : i32 to index
    %c0_405 = arith.constant 0 : index
    %1624 = vector.load %arg3[%1623, %c0_405] : memref<64x32xf32, #tpu.memory_space<vmem>>, vector<1x32xf32>
    %1625 = vector.shape_cast %1624 : vector<1x32xf32> to vector<32xf32>
    %1626 = arith.index_cast %1622 : i32 to index
    %c0_406 = arith.constant 0 : index
    %1627 = vector.load %arg4[%1626, %c0_406] : memref<64x32xf32, #tpu.memory_space<vmem>>, vector<1x32xf32>
    %1628 = vector.shape_cast %1627 : vector<1x32xf32> to vector<32xf32>
    %1629 = arith.mulf %1625, %1628 : vector<32xf32>
    %c101 = arith.constant 101 : index
    %c0_407 = arith.constant 0 : index
    %1630 = vector.load %arg6[%c101, %c0_407] : memref<128x32xf32, #tpu.memory_space<vmem>>, vector<1x32xf32>
    %1631 = vector.shape_cast %1630 : vector<1x32xf32> to vector<32xf32>
    %1632 = vector.shape_cast %1629 : vector<32xf32> to vector<1x32xf32>
    tpu.vector_store %arg6[%c101, %c0_407], %1632 {strides = array<i32>} : memref<128x32xf32, #tpu.memory_space<vmem>>, vector<1x32xf32>,
    %c102_i32 = arith.constant 102 : i32
    %1633 = arith.addi %0, %c102_i32 : i32
    %1634 = arith.index_cast %1633 : i32 to index
    %1635 = memref.load %arg1[%1634] : memref<128xi32, #tpu.memory_space<smem>>
    %c102_i32_408 = arith.constant 102 : i32
    %1636 = arith.addi %0, %c102_i32_408 : i32
    %1637 = arith.index_cast %1636 : i32 to index
    %1638 = memref.load %arg2[%1637] : memref<128xi32, #tpu.memory_space<smem>>
    %1639 = arith.index_cast %1635 : i32 to index
    %c0_409 = arith.constant 0 : index
    %1640 = vector.load %arg3[%1639, %c0_409] : memref<64x32xf32, #tpu.memory_space<vmem>>, vector<1x32xf32>
    %1641 = vector.shape_cast %1640 : vector<1x32xf32> to vector<32xf32>
    %1642 = arith.index_cast %1638 : i32 to index
    %c0_410 = arith.constant 0 : index
    %1643 = vector.load %arg4[%1642, %c0_410] : memref<64x32xf32, #tpu.memory_space<vmem>>, vector<1x32xf32>
    %1644 = vector.shape_cast %1643 : vector<1x32xf32> to vector<32xf32>
    %1645 = arith.mulf %1641, %1644 : vector<32xf32>
    %c102 = arith.constant 102 : index
    %c0_411 = arith.constant 0 : index
    %1646 = vector.load %arg6[%c102, %c0_411] : memref<128x32xf32, #tpu.memory_space<vmem>>, vector<1x32xf32>
    %1647 = vector.shape_cast %1646 : vector<1x32xf32> to vector<32xf32>
    %1648 = vector.shape_cast %1645 : vector<32xf32> to vector<1x32xf32>
    tpu.vector_store %arg6[%c102, %c0_411], %1648 {strides = array<i32>} : memref<128x32xf32, #tpu.memory_space<vmem>>, vector<1x32xf32>,
    %c103_i32 = arith.constant 103 : i32
    %1649 = arith.addi %0, %c103_i32 : i32
    %1650 = arith.index_cast %1649 : i32 to index
    %1651 = memref.load %arg1[%1650] : memref<128xi32, #tpu.memory_space<smem>>
    %c103_i32_412 = arith.constant 103 : i32
    %1652 = arith.addi %0, %c103_i32_412 : i32
    %1653 = arith.index_cast %1652 : i32 to index
    %1654 = memref.load %arg2[%1653] : memref<128xi32, #tpu.memory_space<smem>>
    %1655 = arith.index_cast %1651 : i32 to index
    %c0_413 = arith.constant 0 : index
    %1656 = vector.load %arg3[%1655, %c0_413] : memref<64x32xf32, #tpu.memory_space<vmem>>, vector<1x32xf32>
    %1657 = vector.shape_cast %1656 : vector<1x32xf32> to vector<32xf32>
    %1658 = arith.index_cast %1654 : i32 to index
    %c0_414 = arith.constant 0 : index
    %1659 = vector.load %arg4[%1658, %c0_414] : memref<64x32xf32, #tpu.memory_space<vmem>>, vector<1x32xf32>
    %1660 = vector.shape_cast %1659 : vector<1x32xf32> to vector<32xf32>
    %1661 = arith.mulf %1657, %1660 : vector<32xf32>
    %c103 = arith.constant 103 : index
    %c0_415 = arith.constant 0 : index
    %1662 = vector.load %arg6[%c103, %c0_415] : memref<128x32xf32, #tpu.memory_space<vmem>>, vector<1x32xf32>
    %1663 = vector.shape_cast %1662 : vector<1x32xf32> to vector<32xf32>
    %1664 = vector.shape_cast %1661 : vector<32xf32> to vector<1x32xf32>
    tpu.vector_store %arg6[%c103, %c0_415], %1664 {strides = array<i32>} : memref<128x32xf32, #tpu.memory_space<vmem>>, vector<1x32xf32>,
    %c104_i32 = arith.constant 104 : i32
    %1665 = arith.addi %0, %c104_i32 : i32
    %1666 = arith.index_cast %1665 : i32 to index
    %1667 = memref.load %arg1[%1666] : memref<128xi32, #tpu.memory_space<smem>>
    %c104_i32_416 = arith.constant 104 : i32
    %1668 = arith.addi %0, %c104_i32_416 : i32
    %1669 = arith.index_cast %1668 : i32 to index
    %1670 = memref.load %arg2[%1669] : memref<128xi32, #tpu.memory_space<smem>>
    %1671 = arith.index_cast %1667 : i32 to index
    %c0_417 = arith.constant 0 : index
    %1672 = vector.load %arg3[%1671, %c0_417] : memref<64x32xf32, #tpu.memory_space<vmem>>, vector<1x32xf32>
    %1673 = vector.shape_cast %1672 : vector<1x32xf32> to vector<32xf32>
    %1674 = arith.index_cast %1670 : i32 to index
    %c0_418 = arith.constant 0 : index
    %1675 = vector.load %arg4[%1674, %c0_418] : memref<64x32xf32, #tpu.memory_space<vmem>>, vector<1x32xf32>
    %1676 = vector.shape_cast %1675 : vector<1x32xf32> to vector<32xf32>
    %1677 = arith.mulf %1673, %1676 : vector<32xf32>
    %c104 = arith.constant 104 : index
    %c0_419 = arith.constant 0 : index
    %1678 = vector.load %arg6[%c104, %c0_419] : memref<128x32xf32, #tpu.memory_space<vmem>>, vector<1x32xf32>
    %1679 = vector.shape_cast %1678 : vector<1x32xf32> to vector<32xf32>
    %1680 = vector.shape_cast %1677 : vector<32xf32> to vector<1x32xf32>
    tpu.vector_store %arg6[%c104, %c0_419], %1680 {strides = array<i32>} : memref<128x32xf32, #tpu.memory_space<vmem>>, vector<1x32xf32>,
    %c105_i32 = arith.constant 105 : i32
    %1681 = arith.addi %0, %c105_i32 : i32
    %1682 = arith.index_cast %1681 : i32 to index
    %1683 = memref.load %arg1[%1682] : memref<128xi32, #tpu.memory_space<smem>>
    %c105_i32_420 = arith.constant 105 : i32
    %1684 = arith.addi %0, %c105_i32_420 : i32
    %1685 = arith.index_cast %1684 : i32 to index
    %1686 = memref.load %arg2[%1685] : memref<128xi32, #tpu.memory_space<smem>>
    %1687 = arith.index_cast %1683 : i32 to index
    %c0_421 = arith.constant 0 : index
    %1688 = vector.load %arg3[%1687, %c0_421] : memref<64x32xf32, #tpu.memory_space<vmem>>, vector<1x32xf32>
    %1689 = vector.shape_cast %1688 : vector<1x32xf32> to vector<32xf32>
    %1690 = arith.index_cast %1686 : i32 to index
    %c0_422 = arith.constant 0 : index
    %1691 = vector.load %arg4[%1690, %c0_422] : memref<64x32xf32, #tpu.memory_space<vmem>>, vector<1x32xf32>
    %1692 = vector.shape_cast %1691 : vector<1x32xf32> to vector<32xf32>
    %1693 = arith.mulf %1689, %1692 : vector<32xf32>
    %c105 = arith.constant 105 : index
    %c0_423 = arith.constant 0 : index
    %1694 = vector.load %arg6[%c105, %c0_423] : memref<128x32xf32, #tpu.memory_space<vmem>>, vector<1x32xf32>
    %1695 = vector.shape_cast %1694 : vector<1x32xf32> to vector<32xf32>
    %1696 = vector.shape_cast %1693 : vector<32xf32> to vector<1x32xf32>
    tpu.vector_store %arg6[%c105, %c0_423], %1696 {strides = array<i32>} : memref<128x32xf32, #tpu.memory_space<vmem>>, vector<1x32xf32>,
    %c106_i32 = arith.constant 106 : i32
    %1697 = arith.addi %0, %c106_i32 : i32
    %1698 = arith.index_cast %1697 : i32 to index
    %1699 = memref.load %arg1[%1698] : memref<128xi32, #tpu.memory_space<smem>>
    %c106_i32_424 = arith.constant 106 : i32
    %1700 = arith.addi %0, %c106_i32_424 : i32
    %1701 = arith.index_cast %1700 : i32 to index
    %1702 = memref.load %arg2[%1701] : memref<128xi32, #tpu.memory_space<smem>>
    %1703 = arith.index_cast %1699 : i32 to index
    %c0_425 = arith.constant 0 : index
    %1704 = vector.load %arg3[%1703, %c0_425] : memref<64x32xf32, #tpu.memory_space<vmem>>, vector<1x32xf32>
    %1705 = vector.shape_cast %1704 : vector<1x32xf32> to vector<32xf32>
    %1706 = arith.index_cast %1702 : i32 to index
    %c0_426 = arith.constant 0 : index
    %1707 = vector.load %arg4[%1706, %c0_426] : memref<64x32xf32, #tpu.memory_space<vmem>>, vector<1x32xf32>
    %1708 = vector.shape_cast %1707 : vector<1x32xf32> to vector<32xf32>
    %1709 = arith.mulf %1705, %1708 : vector<32xf32>
    %c106 = arith.constant 106 : index
    %c0_427 = arith.constant 0 : index
    %1710 = vector.load %arg6[%c106, %c0_427] : memref<128x32xf32, #tpu.memory_space<vmem>>, vector<1x32xf32>
    %1711 = vector.shape_cast %1710 : vector<1x32xf32> to vector<32xf32>
    %1712 = vector.shape_cast %1709 : vector<32xf32> to vector<1x32xf32>
    tpu.vector_store %arg6[%c106, %c0_427], %1712 {strides = array<i32>} : memref<128x32xf32, #tpu.memory_space<vmem>>, vector<1x32xf32>,
    %c107_i32 = arith.constant 107 : i32
    %1713 = arith.addi %0, %c107_i32 : i32
    %1714 = arith.index_cast %1713 : i32 to index
    %1715 = memref.load %arg1[%1714] : memref<128xi32, #tpu.memory_space<smem>>
    %c107_i32_428 = arith.constant 107 : i32
    %1716 = arith.addi %0, %c107_i32_428 : i32
    %1717 = arith.index_cast %1716 : i32 to index
    %1718 = memref.load %arg2[%1717] : memref<128xi32, #tpu.memory_space<smem>>
    %1719 = arith.index_cast %1715 : i32 to index
    %c0_429 = arith.constant 0 : index
    %1720 = vector.load %arg3[%1719, %c0_429] : memref<64x32xf32, #tpu.memory_space<vmem>>, vector<1x32xf32>
    %1721 = vector.shape_cast %1720 : vector<1x32xf32> to vector<32xf32>
    %1722 = arith.index_cast %1718 : i32 to index
    %c0_430 = arith.constant 0 : index
    %1723 = vector.load %arg4[%1722, %c0_430] : memref<64x32xf32, #tpu.memory_space<vmem>>, vector<1x32xf32>
    %1724 = vector.shape_cast %1723 : vector<1x32xf32> to vector<32xf32>
    %1725 = arith.mulf %1721, %1724 : vector<32xf32>
    %c107 = arith.constant 107 : index
    %c0_431 = arith.constant 0 : index
    %1726 = vector.load %arg6[%c107, %c0_431] : memref<128x32xf32, #tpu.memory_space<vmem>>, vector<1x32xf32>
    %1727 = vector.shape_cast %1726 : vector<1x32xf32> to vector<32xf32>
    %1728 = vector.shape_cast %1725 : vector<32xf32> to vector<1x32xf32>
    tpu.vector_store %arg6[%c107, %c0_431], %1728 {strides = array<i32>} : memref<128x32xf32, #tpu.memory_space<vmem>>, vector<1x32xf32>,
    %c108_i32 = arith.constant 108 : i32
    %1729 = arith.addi %0, %c108_i32 : i32
    %1730 = arith.index_cast %1729 : i32 to index
    %1731 = memref.load %arg1[%1730] : memref<128xi32, #tpu.memory_space<smem>>
    %c108_i32_432 = arith.constant 108 : i32
    %1732 = arith.addi %0, %c108_i32_432 : i32
    %1733 = arith.index_cast %1732 : i32 to index
    %1734 = memref.load %arg2[%1733] : memref<128xi32, #tpu.memory_space<smem>>
    %1735 = arith.index_cast %1731 : i32 to index
    %c0_433 = arith.constant 0 : index
    %1736 = vector.load %arg3[%1735, %c0_433] : memref<64x32xf32, #tpu.memory_space<vmem>>, vector<1x32xf32>
    %1737 = vector.shape_cast %1736 : vector<1x32xf32> to vector<32xf32>
    %1738 = arith.index_cast %1734 : i32 to index
    %c0_434 = arith.constant 0 : index
    %1739 = vector.load %arg4[%1738, %c0_434] : memref<64x32xf32, #tpu.memory_space<vmem>>, vector<1x32xf32>
    %1740 = vector.shape_cast %1739 : vector<1x32xf32> to vector<32xf32>
    %1741 = arith.mulf %1737, %1740 : vector<32xf32>
    %c108 = arith.constant 108 : index
    %c0_435 = arith.constant 0 : index
    %1742 = vector.load %arg6[%c108, %c0_435] : memref<128x32xf32, #tpu.memory_space<vmem>>, vector<1x32xf32>
    %1743 = vector.shape_cast %1742 : vector<1x32xf32> to vector<32xf32>
    %1744 = vector.shape_cast %1741 : vector<32xf32> to vector<1x32xf32>
    tpu.vector_store %arg6[%c108, %c0_435], %1744 {strides = array<i32>} : memref<128x32xf32, #tpu.memory_space<vmem>>, vector<1x32xf32>,
    %c109_i32 = arith.constant 109 : i32
    %1745 = arith.addi %0, %c109_i32 : i32
    %1746 = arith.index_cast %1745 : i32 to index
    %1747 = memref.load %arg1[%1746] : memref<128xi32, #tpu.memory_space<smem>>
    %c109_i32_436 = arith.constant 109 : i32
    %1748 = arith.addi %0, %c109_i32_436 : i32
    %1749 = arith.index_cast %1748 : i32 to index
    %1750 = memref.load %arg2[%1749] : memref<128xi32, #tpu.memory_space<smem>>
    %1751 = arith.index_cast %1747 : i32 to index
    %c0_437 = arith.constant 0 : index
    %1752 = vector.load %arg3[%1751, %c0_437] : memref<64x32xf32, #tpu.memory_space<vmem>>, vector<1x32xf32>
    %1753 = vector.shape_cast %1752 : vector<1x32xf32> to vector<32xf32>
    %1754 = arith.index_cast %1750 : i32 to index
    %c0_438 = arith.constant 0 : index
    %1755 = vector.load %arg4[%1754, %c0_438] : memref<64x32xf32, #tpu.memory_space<vmem>>, vector<1x32xf32>
    %1756 = vector.shape_cast %1755 : vector<1x32xf32> to vector<32xf32>
    %1757 = arith.mulf %1753, %1756 : vector<32xf32>
    %c109 = arith.constant 109 : index
    %c0_439 = arith.constant 0 : index
    %1758 = vector.load %arg6[%c109, %c0_439] : memref<128x32xf32, #tpu.memory_space<vmem>>, vector<1x32xf32>
    %1759 = vector.shape_cast %1758 : vector<1x32xf32> to vector<32xf32>
    %1760 = vector.shape_cast %1757 : vector<32xf32> to vector<1x32xf32>
    tpu.vector_store %arg6[%c109, %c0_439], %1760 {strides = array<i32>} : memref<128x32xf32, #tpu.memory_space<vmem>>, vector<1x32xf32>,
    %c110_i32 = arith.constant 110 : i32
    %1761 = arith.addi %0, %c110_i32 : i32
    %1762 = arith.index_cast %1761 : i32 to index
    %1763 = memref.load %arg1[%1762] : memref<128xi32, #tpu.memory_space<smem>>
    %c110_i32_440 = arith.constant 110 : i32
    %1764 = arith.addi %0, %c110_i32_440 : i32
    %1765 = arith.index_cast %1764 : i32 to index
    %1766 = memref.load %arg2[%1765] : memref<128xi32, #tpu.memory_space<smem>>
    %1767 = arith.index_cast %1763 : i32 to index
    %c0_441 = arith.constant 0 : index
    %1768 = vector.load %arg3[%1767, %c0_441] : memref<64x32xf32, #tpu.memory_space<vmem>>, vector<1x32xf32>
    %1769 = vector.shape_cast %1768 : vector<1x32xf32> to vector<32xf32>
    %1770 = arith.index_cast %1766 : i32 to index
    %c0_442 = arith.constant 0 : index
    %1771 = vector.load %arg4[%1770, %c0_442] : memref<64x32xf32, #tpu.memory_space<vmem>>, vector<1x32xf32>
    %1772 = vector.shape_cast %1771 : vector<1x32xf32> to vector<32xf32>
    %1773 = arith.mulf %1769, %1772 : vector<32xf32>
    %c110 = arith.constant 110 : index
    %c0_443 = arith.constant 0 : index
    %1774 = vector.load %arg6[%c110, %c0_443] : memref<128x32xf32, #tpu.memory_space<vmem>>, vector<1x32xf32>
    %1775 = vector.shape_cast %1774 : vector<1x32xf32> to vector<32xf32>
    %1776 = vector.shape_cast %1773 : vector<32xf32> to vector<1x32xf32>
    tpu.vector_store %arg6[%c110, %c0_443], %1776 {strides = array<i32>} : memref<128x32xf32, #tpu.memory_space<vmem>>, vector<1x32xf32>,
    %c111_i32 = arith.constant 111 : i32
    %1777 = arith.addi %0, %c111_i32 : i32
    %1778 = arith.index_cast %1777 : i32 to index
    %1779 = memref.load %arg1[%1778] : memref<128xi32, #tpu.memory_space<smem>>
    %c111_i32_444 = arith.constant 111 : i32
    %1780 = arith.addi %0, %c111_i32_444 : i32
    %1781 = arith.index_cast %1780 : i32 to index
    %1782 = memref.load %arg2[%1781] : memref<128xi32, #tpu.memory_space<smem>>
    %1783 = arith.index_cast %1779 : i32 to index
    %c0_445 = arith.constant 0 : index
    %1784 = vector.load %arg3[%1783, %c0_445] : memref<64x32xf32, #tpu.memory_space<vmem>>, vector<1x32xf32>
    %1785 = vector.shape_cast %1784 : vector<1x32xf32> to vector<32xf32>
    %1786 = arith.index_cast %1782 : i32 to index
    %c0_446 = arith.constant 0 : index
    %1787 = vector.load %arg4[%1786, %c0_446] : memref<64x32xf32, #tpu.memory_space<vmem>>, vector<1x32xf32>
    %1788 = vector.shape_cast %1787 : vector<1x32xf32> to vector<32xf32>
    %1789 = arith.mulf %1785, %1788 : vector<32xf32>
    %c111 = arith.constant 111 : index
    %c0_447 = arith.constant 0 : index
    %1790 = vector.load %arg6[%c111, %c0_447] : memref<128x32xf32, #tpu.memory_space<vmem>>, vector<1x32xf32>
    %1791 = vector.shape_cast %1790 : vector<1x32xf32> to vector<32xf32>
    %1792 = vector.shape_cast %1789 : vector<32xf32> to vector<1x32xf32>
    tpu.vector_store %arg6[%c111, %c0_447], %1792 {strides = array<i32>} : memref<128x32xf32, #tpu.memory_space<vmem>>, vector<1x32xf32>,
    %c112_i32 = arith.constant 112 : i32
    %1793 = arith.addi %0, %c112_i32 : i32
    %1794 = arith.index_cast %1793 : i32 to index
    %1795 = memref.load %arg1[%1794] : memref<128xi32, #tpu.memory_space<smem>>
    %c112_i32_448 = arith.constant 112 : i32
    %1796 = arith.addi %0, %c112_i32_448 : i32
    %1797 = arith.index_cast %1796 : i32 to index
    %1798 = memref.load %arg2[%1797] : memref<128xi32, #tpu.memory_space<smem>>
    %1799 = arith.index_cast %1795 : i32 to index
    %c0_449 = arith.constant 0 : index
    %1800 = vector.load %arg3[%1799, %c0_449] : memref<64x32xf32, #tpu.memory_space<vmem>>, vector<1x32xf32>
    %1801 = vector.shape_cast %1800 : vector<1x32xf32> to vector<32xf32>
    %1802 = arith.index_cast %1798 : i32 to index
    %c0_450 = arith.constant 0 : index
    %1803 = vector.load %arg4[%1802, %c0_450] : memref<64x32xf32, #tpu.memory_space<vmem>>, vector<1x32xf32>
    %1804 = vector.shape_cast %1803 : vector<1x32xf32> to vector<32xf32>
    %1805 = arith.mulf %1801, %1804 : vector<32xf32>
    %c112 = arith.constant 112 : index
    %c0_451 = arith.constant 0 : index
    %1806 = vector.load %arg6[%c112, %c0_451] : memref<128x32xf32, #tpu.memory_space<vmem>>, vector<1x32xf32>
    %1807 = vector.shape_cast %1806 : vector<1x32xf32> to vector<32xf32>
    %1808 = vector.shape_cast %1805 : vector<32xf32> to vector<1x32xf32>
    tpu.vector_store %arg6[%c112, %c0_451], %1808 {strides = array<i32>} : memref<128x32xf32, #tpu.memory_space<vmem>>, vector<1x32xf32>,
    %c113_i32 = arith.constant 113 : i32
    %1809 = arith.addi %0, %c113_i32 : i32
    %1810 = arith.index_cast %1809 : i32 to index
    %1811 = memref.load %arg1[%1810] : memref<128xi32, #tpu.memory_space<smem>>
    %c113_i32_452 = arith.constant 113 : i32
    %1812 = arith.addi %0, %c113_i32_452 : i32
    %1813 = arith.index_cast %1812 : i32 to index
    %1814 = memref.load %arg2[%1813] : memref<128xi32, #tpu.memory_space<smem>>
    %1815 = arith.index_cast %1811 : i32 to index
    %c0_453 = arith.constant 0 : index
    %1816 = vector.load %arg3[%1815, %c0_453] : memref<64x32xf32, #tpu.memory_space<vmem>>, vector<1x32xf32>
    %1817 = vector.shape_cast %1816 : vector<1x32xf32> to vector<32xf32>
    %1818 = arith.index_cast %1814 : i32 to index
    %c0_454 = arith.constant 0 : index
    %1819 = vector.load %arg4[%1818, %c0_454] : memref<64x32xf32, #tpu.memory_space<vmem>>, vector<1x32xf32>
    %1820 = vector.shape_cast %1819 : vector<1x32xf32> to vector<32xf32>
    %1821 = arith.mulf %1817, %1820 : vector<32xf32>
    %c113 = arith.constant 113 : index
    %c0_455 = arith.constant 0 : index
    %1822 = vector.load %arg6[%c113, %c0_455] : memref<128x32xf32, #tpu.memory_space<vmem>>, vector<1x32xf32>
    %1823 = vector.shape_cast %1822 : vector<1x32xf32> to vector<32xf32>
    %1824 = vector.shape_cast %1821 : vector<32xf32> to vector<1x32xf32>
    tpu.vector_store %arg6[%c113, %c0_455], %1824 {strides = array<i32>} : memref<128x32xf32, #tpu.memory_space<vmem>>, vector<1x32xf32>,
    %c114_i32 = arith.constant 114 : i32
    %1825 = arith.addi %0, %c114_i32 : i32
    %1826 = arith.index_cast %1825 : i32 to index
    %1827 = memref.load %arg1[%1826] : memref<128xi32, #tpu.memory_space<smem>>
    %c114_i32_456 = arith.constant 114 : i32
    %1828 = arith.addi %0, %c114_i32_456 : i32
    %1829 = arith.index_cast %1828 : i32 to index
    %1830 = memref.load %arg2[%1829] : memref<128xi32, #tpu.memory_space<smem>>
    %1831 = arith.index_cast %1827 : i32 to index
    %c0_457 = arith.constant 0 : index
    %1832 = vector.load %arg3[%1831, %c0_457] : memref<64x32xf32, #tpu.memory_space<vmem>>, vector<1x32xf32>
    %1833 = vector.shape_cast %1832 : vector<1x32xf32> to vector<32xf32>
    %1834 = arith.index_cast %1830 : i32 to index
    %c0_458 = arith.constant 0 : index
    %1835 = vector.load %arg4[%1834, %c0_458] : memref<64x32xf32, #tpu.memory_space<vmem>>, vector<1x32xf32>
    %1836 = vector.shape_cast %1835 : vector<1x32xf32> to vector<32xf32>
    %1837 = arith.mulf %1833, %1836 : vector<32xf32>
    %c114 = arith.constant 114 : index
    %c0_459 = arith.constant 0 : index
    %1838 = vector.load %arg6[%c114, %c0_459] : memref<128x32xf32, #tpu.memory_space<vmem>>, vector<1x32xf32>
    %1839 = vector.shape_cast %1838 : vector<1x32xf32> to vector<32xf32>
    %1840 = vector.shape_cast %1837 : vector<32xf32> to vector<1x32xf32>
    tpu.vector_store %arg6[%c114, %c0_459], %1840 {strides = array<i32>} : memref<128x32xf32, #tpu.memory_space<vmem>>, vector<1x32xf32>,
    %c115_i32 = arith.constant 115 : i32
    %1841 = arith.addi %0, %c115_i32 : i32
    %1842 = arith.index_cast %1841 : i32 to index
    %1843 = memref.load %arg1[%1842] : memref<128xi32, #tpu.memory_space<smem>>
    %c115_i32_460 = arith.constant 115 : i32
    %1844 = arith.addi %0, %c115_i32_460 : i32
    %1845 = arith.index_cast %1844 : i32 to index
    %1846 = memref.load %arg2[%1845] : memref<128xi32, #tpu.memory_space<smem>>
    %1847 = arith.index_cast %1843 : i32 to index
    %c0_461 = arith.constant 0 : index
    %1848 = vector.load %arg3[%1847, %c0_461] : memref<64x32xf32, #tpu.memory_space<vmem>>, vector<1x32xf32>
    %1849 = vector.shape_cast %1848 : vector<1x32xf32> to vector<32xf32>
    %1850 = arith.index_cast %1846 : i32 to index
    %c0_462 = arith.constant 0 : index
    %1851 = vector.load %arg4[%1850, %c0_462] : memref<64x32xf32, #tpu.memory_space<vmem>>, vector<1x32xf32>
    %1852 = vector.shape_cast %1851 : vector<1x32xf32> to vector<32xf32>
    %1853 = arith.mulf %1849, %1852 : vector<32xf32>
    %c115 = arith.constant 115 : index
    %c0_463 = arith.constant 0 : index
    %1854 = vector.load %arg6[%c115, %c0_463] : memref<128x32xf32, #tpu.memory_space<vmem>>, vector<1x32xf32>
    %1855 = vector.shape_cast %1854 : vector<1x32xf32> to vector<32xf32>
    %1856 = vector.shape_cast %1853 : vector<32xf32> to vector<1x32xf32>
    tpu.vector_store %arg6[%c115, %c0_463], %1856 {strides = array<i32>} : memref<128x32xf32, #tpu.memory_space<vmem>>, vector<1x32xf32>,
    %c116_i32 = arith.constant 116 : i32
    %1857 = arith.addi %0, %c116_i32 : i32
    %1858 = arith.index_cast %1857 : i32 to index
    %1859 = memref.load %arg1[%1858] : memref<128xi32, #tpu.memory_space<smem>>
    %c116_i32_464 = arith.constant 116 : i32
    %1860 = arith.addi %0, %c116_i32_464 : i32
    %1861 = arith.index_cast %1860 : i32 to index
    %1862 = memref.load %arg2[%1861] : memref<128xi32, #tpu.memory_space<smem>>
    %1863 = arith.index_cast %1859 : i32 to index
    %c0_465 = arith.constant 0 : index
    %1864 = vector.load %arg3[%1863, %c0_465] : memref<64x32xf32, #tpu.memory_space<vmem>>, vector<1x32xf32>
    %1865 = vector.shape_cast %1864 : vector<1x32xf32> to vector<32xf32>
    %1866 = arith.index_cast %1862 : i32 to index
    %c0_466 = arith.constant 0 : index
    %1867 = vector.load %arg4[%1866, %c0_466] : memref<64x32xf32, #tpu.memory_space<vmem>>, vector<1x32xf32>
    %1868 = vector.shape_cast %1867 : vector<1x32xf32> to vector<32xf32>
    %1869 = arith.mulf %1865, %1868 : vector<32xf32>
    %c116 = arith.constant 116 : index
    %c0_467 = arith.constant 0 : index
    %1870 = vector.load %arg6[%c116, %c0_467] : memref<128x32xf32, #tpu.memory_space<vmem>>, vector<1x32xf32>
    %1871 = vector.shape_cast %1870 : vector<1x32xf32> to vector<32xf32>
    %1872 = vector.shape_cast %1869 : vector<32xf32> to vector<1x32xf32>
    tpu.vector_store %arg6[%c116, %c0_467], %1872 {strides = array<i32>} : memref<128x32xf32, #tpu.memory_space<vmem>>, vector<1x32xf32>,
    %c117_i32 = arith.constant 117 : i32
    %1873 = arith.addi %0, %c117_i32 : i32
    %1874 = arith.index_cast %1873 : i32 to index
    %1875 = memref.load %arg1[%1874] : memref<128xi32, #tpu.memory_space<smem>>
    %c117_i32_468 = arith.constant 117 : i32
    %1876 = arith.addi %0, %c117_i32_468 : i32
    %1877 = arith.index_cast %1876 : i32 to index
    %1878 = memref.load %arg2[%1877] : memref<128xi32, #tpu.memory_space<smem>>
    %1879 = arith.index_cast %1875 : i32 to index
    %c0_469 = arith.constant 0 : index
    %1880 = vector.load %arg3[%1879, %c0_469] : memref<64x32xf32, #tpu.memory_space<vmem>>, vector<1x32xf32>
    %1881 = vector.shape_cast %1880 : vector<1x32xf32> to vector<32xf32>
    %1882 = arith.index_cast %1878 : i32 to index
    %c0_470 = arith.constant 0 : index
    %1883 = vector.load %arg4[%1882, %c0_470] : memref<64x32xf32, #tpu.memory_space<vmem>>, vector<1x32xf32>
    %1884 = vector.shape_cast %1883 : vector<1x32xf32> to vector<32xf32>
    %1885 = arith.mulf %1881, %1884 : vector<32xf32>
    %c117 = arith.constant 117 : index
    %c0_471 = arith.constant 0 : index
    %1886 = vector.load %arg6[%c117, %c0_471] : memref<128x32xf32, #tpu.memory_space<vmem>>, vector<1x32xf32>
    %1887 = vector.shape_cast %1886 : vector<1x32xf32> to vector<32xf32>
    %1888 = vector.shape_cast %1885 : vector<32xf32> to vector<1x32xf32>
    tpu.vector_store %arg6[%c117, %c0_471], %1888 {strides = array<i32>} : memref<128x32xf32, #tpu.memory_space<vmem>>, vector<1x32xf32>,
    %c118_i32 = arith.constant 118 : i32
    %1889 = arith.addi %0, %c118_i32 : i32
    %1890 = arith.index_cast %1889 : i32 to index
    %1891 = memref.load %arg1[%1890] : memref<128xi32, #tpu.memory_space<smem>>
    %c118_i32_472 = arith.constant 118 : i32
    %1892 = arith.addi %0, %c118_i32_472 : i32
    %1893 = arith.index_cast %1892 : i32 to index
    %1894 = memref.load %arg2[%1893] : memref<128xi32, #tpu.memory_space<smem>>
    %1895 = arith.index_cast %1891 : i32 to index
    %c0_473 = arith.constant 0 : index
    %1896 = vector.load %arg3[%1895, %c0_473] : memref<64x32xf32, #tpu.memory_space<vmem>>, vector<1x32xf32>
    %1897 = vector.shape_cast %1896 : vector<1x32xf32> to vector<32xf32>
    %1898 = arith.index_cast %1894 : i32 to index
    %c0_474 = arith.constant 0 : index
    %1899 = vector.load %arg4[%1898, %c0_474] : memref<64x32xf32, #tpu.memory_space<vmem>>, vector<1x32xf32>
    %1900 = vector.shape_cast %1899 : vector<1x32xf32> to vector<32xf32>
    %1901 = arith.mulf %1897, %1900 : vector<32xf32>
    %c118 = arith.constant 118 : index
    %c0_475 = arith.constant 0 : index
    %1902 = vector.load %arg6[%c118, %c0_475] : memref<128x32xf32, #tpu.memory_space<vmem>>, vector<1x32xf32>
    %1903 = vector.shape_cast %1902 : vector<1x32xf32> to vector<32xf32>
    %1904 = vector.shape_cast %1901 : vector<32xf32> to vector<1x32xf32>
    tpu.vector_store %arg6[%c118, %c0_475], %1904 {strides = array<i32>} : memref<128x32xf32, #tpu.memory_space<vmem>>, vector<1x32xf32>,
    %c119_i32 = arith.constant 119 : i32
    %1905 = arith.addi %0, %c119_i32 : i32
    %1906 = arith.index_cast %1905 : i32 to index
    %1907 = memref.load %arg1[%1906] : memref<128xi32, #tpu.memory_space<smem>>
    %c119_i32_476 = arith.constant 119 : i32
    %1908 = arith.addi %0, %c119_i32_476 : i32
    %1909 = arith.index_cast %1908 : i32 to index
    %1910 = memref.load %arg2[%1909] : memref<128xi32, #tpu.memory_space<smem>>
    %1911 = arith.index_cast %1907 : i32 to index
    %c0_477 = arith.constant 0 : index
    %1912 = vector.load %arg3[%1911, %c0_477] : memref<64x32xf32, #tpu.memory_space<vmem>>, vector<1x32xf32>
    %1913 = vector.shape_cast %1912 : vector<1x32xf32> to vector<32xf32>
    %1914 = arith.index_cast %1910 : i32 to index
    %c0_478 = arith.constant 0 : index
    %1915 = vector.load %arg4[%1914, %c0_478] : memref<64x32xf32, #tpu.memory_space<vmem>>, vector<1x32xf32>
    %1916 = vector.shape_cast %1915 : vector<1x32xf32> to vector<32xf32>
    %1917 = arith.mulf %1913, %1916 : vector<32xf32>
    %c119 = arith.constant 119 : index
    %c0_479 = arith.constant 0 : index
    %1918 = vector.load %arg6[%c119, %c0_479] : memref<128x32xf32, #tpu.memory_space<vmem>>, vector<1x32xf32>
    %1919 = vector.shape_cast %1918 : vector<1x32xf32> to vector<32xf32>
    %1920 = vector.shape_cast %1917 : vector<32xf32> to vector<1x32xf32>
    tpu.vector_store %arg6[%c119, %c0_479], %1920 {strides = array<i32>} : memref<128x32xf32, #tpu.memory_space<vmem>>, vector<1x32xf32>,
    %c120_i32 = arith.constant 120 : i32
    %1921 = arith.addi %0, %c120_i32 : i32
    %1922 = arith.index_cast %1921 : i32 to index
    %1923 = memref.load %arg1[%1922] : memref<128xi32, #tpu.memory_space<smem>>
    %c120_i32_480 = arith.constant 120 : i32
    %1924 = arith.addi %0, %c120_i32_480 : i32
    %1925 = arith.index_cast %1924 : i32 to index
    %1926 = memref.load %arg2[%1925] : memref<128xi32, #tpu.memory_space<smem>>
    %1927 = arith.index_cast %1923 : i32 to index
    %c0_481 = arith.constant 0 : index
    %1928 = vector.load %arg3[%1927, %c0_481] : memref<64x32xf32, #tpu.memory_space<vmem>>, vector<1x32xf32>
    %1929 = vector.shape_cast %1928 : vector<1x32xf32> to vector<32xf32>
    %1930 = arith.index_cast %1926 : i32 to index
    %c0_482 = arith.constant 0 : index
    %1931 = vector.load %arg4[%1930, %c0_482] : memref<64x32xf32, #tpu.memory_space<vmem>>, vector<1x32xf32>
    %1932 = vector.shape_cast %1931 : vector<1x32xf32> to vector<32xf32>
    %1933 = arith.mulf %1929, %1932 : vector<32xf32>
    %c120 = arith.constant 120 : index
    %c0_483 = arith.constant 0 : index
    %1934 = vector.load %arg6[%c120, %c0_483] : memref<128x32xf32, #tpu.memory_space<vmem>>, vector<1x32xf32>
    %1935 = vector.shape_cast %1934 : vector<1x32xf32> to vector<32xf32>
    %1936 = vector.shape_cast %1933 : vector<32xf32> to vector<1x32xf32>
    tpu.vector_store %arg6[%c120, %c0_483], %1936 {strides = array<i32>} : memref<128x32xf32, #tpu.memory_space<vmem>>, vector<1x32xf32>,
    %c121_i32 = arith.constant 121 : i32
    %1937 = arith.addi %0, %c121_i32 : i32
    %1938 = arith.index_cast %1937 : i32 to index
    %1939 = memref.load %arg1[%1938] : memref<128xi32, #tpu.memory_space<smem>>
    %c121_i32_484 = arith.constant 121 : i32
    %1940 = arith.addi %0, %c121_i32_484 : i32
    %1941 = arith.index_cast %1940 : i32 to index
    %1942 = memref.load %arg2[%1941] : memref<128xi32, #tpu.memory_space<smem>>
    %1943 = arith.index_cast %1939 : i32 to index
    %c0_485 = arith.constant 0 : index
    %1944 = vector.load %arg3[%1943, %c0_485] : memref<64x32xf32, #tpu.memory_space<vmem>>, vector<1x32xf32>
    %1945 = vector.shape_cast %1944 : vector<1x32xf32> to vector<32xf32>
    %1946 = arith.index_cast %1942 : i32 to index
    %c0_486 = arith.constant 0 : index
    %1947 = vector.load %arg4[%1946, %c0_486] : memref<64x32xf32, #tpu.memory_space<vmem>>, vector<1x32xf32>
    %1948 = vector.shape_cast %1947 : vector<1x32xf32> to vector<32xf32>
    %1949 = arith.mulf %1945, %1948 : vector<32xf32>
    %c121 = arith.constant 121 : index
    %c0_487 = arith.constant 0 : index
    %1950 = vector.load %arg6[%c121, %c0_487] : memref<128x32xf32, #tpu.memory_space<vmem>>, vector<1x32xf32>
    %1951 = vector.shape_cast %1950 : vector<1x32xf32> to vector<32xf32>
    %1952 = vector.shape_cast %1949 : vector<32xf32> to vector<1x32xf32>
    tpu.vector_store %arg6[%c121, %c0_487], %1952 {strides = array<i32>} : memref<128x32xf32, #tpu.memory_space<vmem>>, vector<1x32xf32>,
    %c122_i32 = arith.constant 122 : i32
    %1953 = arith.addi %0, %c122_i32 : i32
    %1954 = arith.index_cast %1953 : i32 to index
    %1955 = memref.load %arg1[%1954] : memref<128xi32, #tpu.memory_space<smem>>
    %c122_i32_488 = arith.constant 122 : i32
    %1956 = arith.addi %0, %c122_i32_488 : i32
    %1957 = arith.index_cast %1956 : i32 to index
    %1958 = memref.load %arg2[%1957] : memref<128xi32, #tpu.memory_space<smem>>
    %1959 = arith.index_cast %1955 : i32 to index
    %c0_489 = arith.constant 0 : index
    %1960 = vector.load %arg3[%1959, %c0_489] : memref<64x32xf32, #tpu.memory_space<vmem>>, vector<1x32xf32>
    %1961 = vector.shape_cast %1960 : vector<1x32xf32> to vector<32xf32>
    %1962 = arith.index_cast %1958 : i32 to index
    %c0_490 = arith.constant 0 : index
    %1963 = vector.load %arg4[%1962, %c0_490] : memref<64x32xf32, #tpu.memory_space<vmem>>, vector<1x32xf32>
    %1964 = vector.shape_cast %1963 : vector<1x32xf32> to vector<32xf32>
    %1965 = arith.mulf %1961, %1964 : vector<32xf32>
    %c122 = arith.constant 122 : index
    %c0_491 = arith.constant 0 : index
    %1966 = vector.load %arg6[%c122, %c0_491] : memref<128x32xf32, #tpu.memory_space<vmem>>, vector<1x32xf32>
    %1967 = vector.shape_cast %1966 : vector<1x32xf32> to vector<32xf32>
    %1968 = vector.shape_cast %1965 : vector<32xf32> to vector<1x32xf32>
    tpu.vector_store %arg6[%c122, %c0_491], %1968 {strides = array<i32>} : memref<128x32xf32, #tpu.memory_space<vmem>>, vector<1x32xf32>,
    %c123_i32 = arith.constant 123 : i32
    %1969 = arith.addi %0, %c123_i32 : i32
    %1970 = arith.index_cast %1969 : i32 to index
    %1971 = memref.load %arg1[%1970] : memref<128xi32, #tpu.memory_space<smem>>
    %c123_i32_492 = arith.constant 123 : i32
    %1972 = arith.addi %0, %c123_i32_492 : i32
    %1973 = arith.index_cast %1972 : i32 to index
    %1974 = memref.load %arg2[%1973] : memref<128xi32, #tpu.memory_space<smem>>
    %1975 = arith.index_cast %1971 : i32 to index
    %c0_493 = arith.constant 0 : index
    %1976 = vector.load %arg3[%1975, %c0_493] : memref<64x32xf32, #tpu.memory_space<vmem>>, vector<1x32xf32>
    %1977 = vector.shape_cast %1976 : vector<1x32xf32> to vector<32xf32>
    %1978 = arith.index_cast %1974 : i32 to index
    %c0_494 = arith.constant 0 : index
    %1979 = vector.load %arg4[%1978, %c0_494] : memref<64x32xf32, #tpu.memory_space<vmem>>, vector<1x32xf32>
    %1980 = vector.shape_cast %1979 : vector<1x32xf32> to vector<32xf32>
    %1981 = arith.mulf %1977, %1980 : vector<32xf32>
    %c123 = arith.constant 123 : index
    %c0_495 = arith.constant 0 : index
    %1982 = vector.load %arg6[%c123, %c0_495] : memref<128x32xf32, #tpu.memory_space<vmem>>, vector<1x32xf32>
    %1983 = vector.shape_cast %1982 : vector<1x32xf32> to vector<32xf32>
    %1984 = vector.shape_cast %1981 : vector<32xf32> to vector<1x32xf32>
    tpu.vector_store %arg6[%c123, %c0_495], %1984 {strides = array<i32>} : memref<128x32xf32, #tpu.memory_space<vmem>>, vector<1x32xf32>,
    %c124_i32 = arith.constant 124 : i32
    %1985 = arith.addi %0, %c124_i32 : i32
    %1986 = arith.index_cast %1985 : i32 to index
    %1987 = memref.load %arg1[%1986] : memref<128xi32, #tpu.memory_space<smem>>
    %c124_i32_496 = arith.constant 124 : i32
    %1988 = arith.addi %0, %c124_i32_496 : i32
    %1989 = arith.index_cast %1988 : i32 to index
    %1990 = memref.load %arg2[%1989] : memref<128xi32, #tpu.memory_space<smem>>
    %1991 = arith.index_cast %1987 : i32 to index
    %c0_497 = arith.constant 0 : index
    %1992 = vector.load %arg3[%1991, %c0_497] : memref<64x32xf32, #tpu.memory_space<vmem>>, vector<1x32xf32>
    %1993 = vector.shape_cast %1992 : vector<1x32xf32> to vector<32xf32>
    %1994 = arith.index_cast %1990 : i32 to index
    %c0_498 = arith.constant 0 : index
    %1995 = vector.load %arg4[%1994, %c0_498] : memref<64x32xf32, #tpu.memory_space<vmem>>, vector<1x32xf32>
    %1996 = vector.shape_cast %1995 : vector<1x32xf32> to vector<32xf32>
    %1997 = arith.mulf %1993, %1996 : vector<32xf32>
    %c124 = arith.constant 124 : index
    %c0_499 = arith.constant 0 : index
    %1998 = vector.load %arg6[%c124, %c0_499] : memref<128x32xf32, #tpu.memory_space<vmem>>, vector<1x32xf32>
    %1999 = vector.shape_cast %1998 : vector<1x32xf32> to vector<32xf32>
    %2000 = vector.shape_cast %1997 : vector<32xf32> to vector<1x32xf32>
    tpu.vector_store %arg6[%c124, %c0_499], %2000 {strides = array<i32>} : memref<128x32xf32, #tpu.memory_space<vmem>>, vector<1x32xf32>,
    %c125_i32 = arith.constant 125 : i32
    %2001 = arith.addi %0, %c125_i32 : i32
    %2002 = arith.index_cast %2001 : i32 to index
    %2003 = memref.load %arg1[%2002] : memref<128xi32, #tpu.memory_space<smem>>
    %c125_i32_500 = arith.constant 125 : i32
    %2004 = arith.addi %0, %c125_i32_500 : i32
    %2005 = arith.index_cast %2004 : i32 to index
    %2006 = memref.load %arg2[%2005] : memref<128xi32, #tpu.memory_space<smem>>
    %2007 = arith.index_cast %2003 : i32 to index
    %c0_501 = arith.constant 0 : index
    %2008 = vector.load %arg3[%2007, %c0_501] : memref<64x32xf32, #tpu.memory_space<vmem>>, vector<1x32xf32>
    %2009 = vector.shape_cast %2008 : vector<1x32xf32> to vector<32xf32>
    %2010 = arith.index_cast %2006 : i32 to index
    %c0_502 = arith.constant 0 : index
    %2011 = vector.load %arg4[%2010, %c0_502] : memref<64x32xf32, #tpu.memory_space<vmem>>, vector<1x32xf32>
    %2012 = vector.shape_cast %2011 : vector<1x32xf32> to vector<32xf32>
    %2013 = arith.mulf %2009, %2012 : vector<32xf32>
    %c125 = arith.constant 125 : index
    %c0_503 = arith.constant 0 : index
    %2014 = vector.load %arg6[%c125, %c0_503] : memref<128x32xf32, #tpu.memory_space<vmem>>, vector<1x32xf32>
    %2015 = vector.shape_cast %2014 : vector<1x32xf32> to vector<32xf32>
    %2016 = vector.shape_cast %2013 : vector<32xf32> to vector<1x32xf32>
    tpu.vector_store %arg6[%c125, %c0_503], %2016 {strides = array<i32>} : memref<128x32xf32, #tpu.memory_space<vmem>>, vector<1x32xf32>,
    %c126_i32 = arith.constant 126 : i32
    %2017 = arith.addi %0, %c126_i32 : i32
    %2018 = arith.index_cast %2017 : i32 to index
    %2019 = memref.load %arg1[%2018] : memref<128xi32, #tpu.memory_space<smem>>
    %c126_i32_504 = arith.constant 126 : i32
    %2020 = arith.addi %0, %c126_i32_504 : i32
    %2021 = arith.index_cast %2020 : i32 to index
    %2022 = memref.load %arg2[%2021] : memref<128xi32, #tpu.memory_space<smem>>
    %2023 = arith.index_cast %2019 : i32 to index
    %c0_505 = arith.constant 0 : index
    %2024 = vector.load %arg3[%2023, %c0_505] : memref<64x32xf32, #tpu.memory_space<vmem>>, vector<1x32xf32>
    %2025 = vector.shape_cast %2024 : vector<1x32xf32> to vector<32xf32>
    %2026 = arith.index_cast %2022 : i32 to index
    %c0_506 = arith.constant 0 : index
    %2027 = vector.load %arg4[%2026, %c0_506] : memref<64x32xf32, #tpu.memory_space<vmem>>, vector<1x32xf32>
    %2028 = vector.shape_cast %2027 : vector<1x32xf32> to vector<32xf32>
    %2029 = arith.mulf %2025, %2028 : vector<32xf32>
    %c126 = arith.constant 126 : index
    %c0_507 = arith.constant 0 : index
    %2030 = vector.load %arg6[%c126, %c0_507] : memref<128x32xf32, #tpu.memory_space<vmem>>, vector<1x32xf32>
    %2031 = vector.shape_cast %2030 : vector<1x32xf32> to vector<32xf32>
    %2032 = vector.shape_cast %2029 : vector<32xf32> to vector<1x32xf32>
    tpu.vector_store %arg6[%c126, %c0_507], %2032 {strides = array<i32>} : memref<128x32xf32, #tpu.memory_space<vmem>>, vector<1x32xf32>,
    %c127_i32 = arith.constant 127 : i32
    %2033 = arith.addi %0, %c127_i32 : i32
    %2034 = arith.index_cast %2033 : i32 to index
    %2035 = memref.load %arg1[%2034] : memref<128xi32, #tpu.memory_space<smem>>
    %c127_i32_508 = arith.constant 127 : i32
    %2036 = arith.addi %0, %c127_i32_508 : i32
    %2037 = arith.index_cast %2036 : i32 to index
    %2038 = memref.load %arg2[%2037] : memref<128xi32, #tpu.memory_space<smem>>
    %2039 = arith.index_cast %2035 : i32 to index
    %c0_509 = arith.constant 0 : index
    %2040 = vector.load %arg3[%2039, %c0_509] : memref<64x32xf32, #tpu.memory_space<vmem>>, vector<1x32xf32>
    %2041 = vector.shape_cast %2040 : vector<1x32xf32> to vector<32xf32>
    %2042 = arith.index_cast %2038 : i32 to index
    %c0_510 = arith.constant 0 : index
    %2043 = vector.load %arg4[%2042, %c0_510] : memref<64x32xf32, #tpu.memory_space<vmem>>, vector<1x32xf32>
    %2044 = vector.shape_cast %2043 : vector<1x32xf32> to vector<32xf32>
    %2045 = arith.mulf %2041, %2044 : vector<32xf32>
    %c127 = arith.constant 127 : index
    %c0_511 = arith.constant 0 : index
    %2046 = vector.load %arg6[%c127, %c0_511] : memref<128x32xf32, #tpu.memory_space<vmem>>, vector<1x32xf32>
    %2047 = vector.shape_cast %2046 : vector<1x32xf32> to vector<32xf32>
    %2048 = vector.shape_cast %2045 : vector<32xf32> to vector<1x32xf32>
    tpu.vector_store %arg6[%c127, %c0_511], %2048 {strides = array<i32>} : memref<128x32xf32, #tpu.memory_space<vmem>>, vector<1x32xf32>,
    %c0_512 = arith.constant 0 : index
    %c0_513 = arith.constant 0 : index
    %2049 = vector.load %arg6[%c0_512, %c0_513] : memref<128x32xf32, #tpu.memory_space<vmem>>, vector<128x32xf32>
    %cst = arith.constant dense<0.000000e+00> : vector<128xf32>
    %2050 = vector.multi_reduction <add>, %2049, %cst [1] : vector<128x32xf32> to vector<128xf32>
    %2051 = vector.shape_cast %2050 : vector<128xf32> to vector<1x1x128xf32>
    %c0_514 = arith.constant 0 : index
    %c0_515 = arith.constant 0 : index
    %c0_516 = arith.constant 0 : index
    %2052 = vector.load %arg5[%c0_514, %c0_515, %c0_516] : memref<1x1x128xf32, #tpu.memory_space<vmem>>, vector<1x1x128xf32>
    tpu.vector_store %arg5[%c0_514, %c0_515, %c0_516], %2051 {strides = array<i32>} : memref<1x1x128xf32, #tpu.memory_space<vmem>>, vector<1x1x128xf32>,
    return
  }
  func.func @transform_0(%arg0: i32, %arg1: memref<128xi32, #tpu.memory_space<smem>>, %arg2: memref<128xi32, #tpu.memory_space<smem>>) -> (i32, i32) {
    %c0_i32 = arith.constant 0 : i32
    %c0_i32_0 = arith.constant 0 : i32
    %c0_i32_1 = arith.constant 0 : i32
    return %c0_i32, %c0_i32_0 : i32, i32
  }
  func.func @transform_1(%arg0: i32, %arg1: memref<128xi32, #tpu.memory_space<smem>>, %arg2: memref<128xi32, #tpu.memory_space<smem>>) -> (i32, i32) {
    %c0_i32 = arith.constant 0 : i32
    %c0_i32_0 = arith.constant 0 : i32
    %c0_i32_1 = arith.constant 0 : i32
    return %c0_i32, %c0_i32_0 : i32, i32
  }
  func.func @transform_2(%arg0: i32, %arg1: memref<128xi32, #tpu.memory_space<smem>>, %arg2: memref<128xi32, #tpu.memory_space<smem>>) -> (i32, i32, i32) {
    %c0_i32 = arith.constant 0 : i32
    %c0_i32_0 = arith.constant 0 : i32
    %c0_i32_1 = arith.constant 0 : i32
    return %arg0, %c0_i32, %c0_i32_0 : i32, i32, i32
  }
}

</mosaic_0001>

<bundles_post_ra>
// kernel: tpu_custom_call.1
= control target key start
LH: loop header
LB: loop body
LE: loop exit
PB: predicated region body
PF: predicated region fallthrough
CT: control target
= control target key end

     0   :  { %s3105_s0 = inlined_call_operand.vmem [shape: s32[128], index: 0, kind: input, shape index: {}]   ;;  %s3106_s2 = inlined_call_operand.vmem [shape: f32[64,32], index: 2, kind: input, shape index: {}]   ;;  %s3107_s3 = inlined_call_operand.vmem [shape: f32[64,32], index: 3, kind: input, shape index: {}]   ;;  %s3108_s4 = inlined_call_operand.hbm [shape: f32[1,1,128], index: 4, kind: output, shape index: {}]   ;;  %s3109_s1 = inlined_call_operand.vmem [shape: s32[128], index: 1, kind: input, shape index: {}]  }
   0x1   :  { %s9_s17 = sshll.u32 %s3105_s0, 4  ;;  %s13_s20 = sshll.u32 %s3109_s1, 4  ;;  %s10_s17 = int_to_ptr.vmem [resolvable:$true] %s9_s17  ;;  %s14_s20 = int_to_ptr.vmem [resolvable:$true] %s13_s20 }
   0x2   :  { %s1898_s21 = scalar_lea.vmem %s10_s17, 16  ;;  %p1903_p1 = scmp.lt.s32.totalorder %s10_s17, %s10_s17 }
   0x3   :  { %p1899_p0 = scmp.ne.s32.totalorder %s10_s17, %s1898_s21  ;;  %p1904_p2 = scmp.lt.s32.totalorder %s1898_s21, %s1898_s21 }
   0x5   :  { %p1905_p3 = por %p1904_p2, %p1903_p1 }
   0x7   :  { %p1906_p4 = pnand %p1905_p3, %p1899_p0 }
   0x9   :  { %1909 = shalt.err (!%p1906_p4)  }
   0xa   :  { %s1946_s22 = smov [#allocation4]   ;;  %s1910_s23 = scalar_lea.vmem %s14_s20, 16 }
   0xb   :  { %12 = dma.vmem_to_smem %s10_s17, 16, %s1946_s22, [#allocation3] }
   0xc   :  { %p1911_p5 = scmp.ne.s32.totalorder %s14_s20, %s1910_s23  ;;  %p1915_p6 = scmp.lt.s32.totalorder %s14_s20, %s14_s20 }
   0xd   :  { %p1916_p7 = scmp.lt.s32.totalorder %s1910_s23, %s1910_s23 }
   0xf   :  { %p1917_p8 = por %p1916_p7, %p1915_p6 }
  0x11   :  { %p1918_p9 = pnand %p1917_p8, %p1911_p5 }
  0x13   :  { %1921 = shalt.err (!%p1918_p9)  }
  0x14   :  { %s1947_s0 = smov [#allocation5]  }
  0x15   :  { %16 = dma.vmem_to_smem %s14_s20, 16, %s1947_s0, [#allocation3] }
  0x16   :  { %1942 = dma.done.wait [#allocation3], 32 }
  0x17   :  { %1943 = vsyncadd [#allocation3], 4294967264 }
  0x18   :  { %18 = sfence }
  0x19   :  { %s25_s1 = sld [smem:[#allocation4]] }
  0x1a   :  { %19 = vsyncpa [#allocation7], 0  ;;  %s26_s24 = sld [smem:[#allocation5]]  ;;  %vm32_vm0 = vcmask 253952   ;;  %vm1193_vm1 = vcmask 261120   ;;  %vm1269_vm2 = vcmask 130112  }
  0x1b   :  { %s1641_s25 = sld [smem:[#allocation4 + $0x1]]  ;;  %vm1276_vm3 = vcmask 195712   ;;  %vm1283_vm4 = vcmask 261312   ;;  %vm1290_vm5 = vcmask 326912   ;;  %vm1297_vm6 = vcmask 392512  }
  0x1c   :  { %s1642_s26 = sld [smem:[#allocation5 + $0x1]]  ;;  %vm1304_vm7 = vcmask 458112   ;;  %vm1311_vm8 = vcmask 523712   ;;  %vm1318_vm9 = vcmask 589312   ;;  %vm1325_vm10 = vcmask 654912  }
  0x1d   :  { %s1643_s27 = sld [smem:[#allocation4 + $0x2]]  ;;  %vm1332_vm11 = vcmask 720512   ;;  %vm1339_vm12 = vcmask 786112   ;;  %vm1346_vm13 = vcmask 851712   ;;  %vm1353_vm14 = vcmask 917312  }
  0x1e   :  { %s1644_s28 = sld [smem:[#allocation5 + $0x2]]  ;;  %vm1360_vm15 = vcmask 982912  }
  0x1f   :  { %s27_s5 = scalar_lea.vmem %s3106_s2, %s25_s1  ;;  %s1645_s6 = sld [smem:[#allocation4 + $0x3]] }
  0x20   :  { %v28_v0 = vld [vmem:[%s27_s5] sm:$0x1]  ;;  %s29_s9 = scalar_lea.vmem %s3107_s3, %s26_s24  ;;  %s1646_s10 = sld [smem:[#allocation5 + $0x3]] }
  0x21   :  { %v30_v1 = vld [vmem:[%s29_s9] sm:$0x1]  ;;  %s37_s13 = scalar_lea.vmem %s3106_s2, %s1641_s25  ;;  %s1647_s14 = sld [smem:[#allocation4 + $0x4]] }
  0x22   :  { %v31_v2 = vmul.f32 %v30_v1, %v28_v0  ;;  %v38_v3 = vld [vmem:[%s37_s13] sm:$0x1]  ;;  %s39_s17 = scalar_lea.vmem %s3107_s3, %s1642_s26  ;;  %s1648_s18 = sld [smem:[#allocation5 + $0x4]] }
  0x23   :  { %v40_v4 = vld [vmem:[%s39_s17] sm:$0x1]  ;;  %s46_s21 = scalar_lea.vmem %s3106_s2, %s1643_s27  ;;  %s1649_s22 = sld [smem:[#allocation4 + $0x5]] }
  0x24   :  { %33 = vst.msk [vmem:[#allocation2] sm:$0x1] %vm32_vm0, %v31_v2  ;;  %v41_v5 = vmul.f32 %v40_v4, %v38_v3  ;;  %v47_v6 = vld [vmem:[%s46_s21] sm:$0x1]  ;;  %s48_s1 = scalar_lea.vmem %s3107_s3, %s1644_s28  ;;  %s1650_s24 = sld [smem:[#allocation5 + $0x5]] }
  0x25   :  { %v49_v7 = vld [vmem:[%s48_s1] sm:$0x1]  ;;  %s55_s26 = scalar_lea.vmem %s3106_s2, %s1645_s6  ;;  %s1651_s30 = sld [smem:[#allocation4 + $0x6]] }
  0x26   :  { %42 = vst.msk [vmem:[#allocation2 + $0x1] sm:$0x1] %vm32_vm0, %v41_v5  ;;  %v50_v8 = vmul.f32 %v49_v7, %v47_v6  ;;  %v56_v9 = vld [vmem:[%s55_s26] sm:$0x1]  ;;  %s57_s7 = scalar_lea.vmem %s3107_s3, %s1646_s10  ;;  %s1652_s8 = sld [smem:[#allocation5 + $0x6]] }
  0x27   :  { %v58_v10 = vld [vmem:[%s57_s7] sm:$0x1]  ;;  %s64_s28 = scalar_lea.vmem %s3106_s2, %s1647_s14  ;;  %s1653_s12 = sld [smem:[#allocation4 + $0x7]] }
  0x28   :  { %51 = vst.msk [vmem:[#allocation2 + $0x2] sm:$0x1] %vm32_vm0, %v50_v8  ;;  %v59_v11 = vmul.f32 %v58_v10, %v56_v9  ;;  %v65_v12 = vld [vmem:[%s64_s28] sm:$0x1]  ;;  %s66_s15 = scalar_lea.vmem %s3107_s3, %s1648_s18  ;;  %s1654_s16 = sld [smem:[#allocation5 + $0x7]] }
  0x29   :  { %v67_v13 = vld [vmem:[%s66_s15] sm:$0x1]  ;;  %s73_s10 = scalar_lea.vmem %s3106_s2, %s1649_s22  ;;  %s1671_s20 = sld [smem:[#allocation4 + $0x10]] }
  0x2a   :  { %60 = vst.msk [vmem:[#allocation2 + $0x3] sm:$0x1] %vm32_vm0, %v59_v11  ;;  %v68_v14 = vmul.f32 %v67_v13, %v65_v12  ;;  %v74_v15 = vld [vmem:[%s73_s10] sm:$0x1]  ;;  %s75_s23 = scalar_lea.vmem %s3107_s3, %s1650_s24  ;;  %s1672_s0 = sld [smem:[#allocation5 + $0x10]] }
  0x2b   :  { %v76_v16 = vld [vmem:[%s75_s23] sm:$0x1]  ;;  %s82_s18 = scalar_lea.vmem %s3106_s2, %s1651_s30  ;;  %s1673_s29 = sld [smem:[#allocation4 + $0x11]] }
  0x2c   :  { %69 = vst.msk [vmem:[#allocation2 + $0x4] sm:$0x1] %vm32_vm0, %v68_v14  ;;  %v77_v17 = vmul.f32 %v76_v16, %v74_v15  ;;  %v83_v18 = vld [vmem:[%s82_s18] sm:$0x1]  ;;  %s84_s27 = scalar_lea.vmem %s3107_s3, %s1652_s8  ;;  %s1674_s5 = sld [smem:[#allocation5 + $0x11]] }
  0x2d   :  { %v85_v19 = vld [vmem:[%s84_s27] sm:$0x1]  ;;  %s91_s24 = scalar_lea.vmem %s3106_s2, %s1653_s12  ;;  %s1675_s11 = sld [smem:[#allocation4 + $0x12]] }
  0x2e   :  { %78 = vst.msk [vmem:[#allocation2 + $0x5] sm:$0x1] %vm32_vm0, %v77_v17  ;;  %v86_v20 = vmul.f32 %v85_v19, %v83_v18  ;;  %v92_v21 = vld [vmem:[%s91_s24] sm:$0x1]  ;;  %s93_s6 = scalar_lea.vmem %s3107_s3, %s1654_s16  ;;  %s1676_s13 = sld [smem:[#allocation5 + $0x12]] }
  0x2f   :  { %v94_v22 = vld [vmem:[%s93_s6] sm:$0x1]  ;;  %s172_s8 = scalar_lea.vmem %s3106_s2, %s1671_s20  ;;  %s1677_s19 = sld [smem:[#allocation4 + $0x13]] }
  0x30   :  { %87 = vst.msk [vmem:[#allocation2 + $0x6] sm:$0x1] %vm32_vm0, %v86_v20  ;;  %v95_v23 = vmul.f32 %v94_v22, %v92_v21  ;;  %v173_v24 = vld [vmem:[%s172_s8] sm:$0x1]  ;;  %s174_s14 = scalar_lea.vmem %s3107_s3, %s1672_s0  ;;  %s1678_s21 = sld [smem:[#allocation5 + $0x13]] }
  0x31   :  { %v175_v25 = vld [vmem:[%s174_s14] sm:$0x1]  ;;  %s181_s16 = scalar_lea.vmem %s3106_s2, %s1673_s29  ;;  %s1679_s25 = sld [smem:[#allocation4 + $0x14]] }
  0x32   :  { %96 = vst.msk [vmem:[#allocation2 + $0x7] sm:$0x1] %vm32_vm0, %v95_v23  ;;  %v176_v26 = vmul.f32 %v175_v25, %v173_v24  ;;  %v182_v27 = vld [vmem:[%s181_s16] sm:$0x1]  ;;  %s183_s22 = scalar_lea.vmem %s3107_s3, %s1674_s5  ;;  %s1680_s26 = sld [smem:[#allocation5 + $0x14]] }
  0x33   :  { %v184_v28 = vld [vmem:[%s183_s22] sm:$0x1]  ;;  %s190_s0 = scalar_lea.vmem %s3106_s2, %s1675_s11  ;;  %s2051_s9 = sld [smem:[#allocation4 + $0x15]] }
  0x34   :  { %177 = vst.msk [vmem:[#allocation2 + $0x10] sm:$0x1] %vm32_vm0, %v176_v26  ;;  %v185_v29 = vmul.f32 %v184_v28, %v182_v27  ;;  %v191_v30 = vld [vmem:[%s190_s0] sm:$0x1]  ;;  %s192_s30 = scalar_lea.vmem %s3107_s3, %s1676_s13  ;;  %s2057_s28 = sld [smem:[#allocation5 + $0x15]] }
  0x35   :  { %v193_v31 = vld [vmem:[%s192_s30] sm:$0x1]  ;;  %s199_s15 = scalar_lea.vmem %s3106_s2, %s1677_s19  ;;  %s2062_s17 = sld [smem:[#allocation4 + $0x16]] }
  0x36   :  { %186 = vst.msk [vmem:[#allocation2 + $0x11] sm:$0x1] %vm32_vm0, %v185_v29  ;;  %v194_v32 = vmul.f32 %v193_v31, %v191_v30  ;;  %v200_v33 = vld [vmem:[%s199_s15] sm:$0x1]  ;;  %s201_s12 = scalar_lea.vmem %s3107_s3, %s1678_s21  ;;  %s2068_s10 = sld [smem:[#allocation5 + $0x16]] }
  0x37   :  { %v202_v34 = vld [vmem:[%s201_s12] sm:$0x1]  ;;  %s208_s19 = scalar_lea.vmem %s3106_s2, %s1679_s25  ;;  %s2073_s23 = sld [smem:[#allocation4 + $0x17]] }
  0x38   :  { %195 = vst.msk [vmem:[#allocation2 + $0x12] sm:$0x1] %vm32_vm0, %v194_v32  ;;  %v203_v35 = vmul.f32 %v202_v34, %v200_v33  ;;  %v209_v36 = vld [vmem:[%s208_s19] sm:$0x1]  ;;  %s210_s21 = scalar_lea.vmem %s3107_s3, %s1680_s26  ;;  %s1686_s20 = sld [smem:[#allocation5 + $0x17]] }
  0x39   :  { %v1177_v37 = vld [vmem:[#allocation2] sm:$0xff]  ;;  %s217_s27 = scalar_lea.vmem %s3106_s2, %s2051_s9  ;;  %s2083_s25 = sld [smem:[#allocation4 + $0x8]] }
  0x3a   :  { %v211_v38 = vld [vmem:[%s210_s21] sm:$0x1]  ;;  %v1194_v39 = vsel %vm1193_vm1, %v1177_v37, 0.0  ;;  %204 = vst.msk [vmem:[#allocation2 + $0x13] sm:$0x1] %vm32_vm0, %v203_v35  ;;  %s219_s26 = scalar_lea.vmem %s3107_s3, %s2057_s28  ;;  %s1656_s29 = sld [smem:[#allocation5 + $0x8]] }
  0x3b   :  { %v212_v40 = vmul.f32 %v211_v38, %v209_v36  ;;  %v218_v41 = vld [vmem:[%s217_s27] sm:$0x1]  ;;  %1195 = vadd.xlane.f32.xlu0 %v1194_v39  ;;  %s226_s9 = scalar_lea.vmem %s3106_s2, %s2062_s17  ;;  %s1657_s5 = sld [smem:[#allocation4 + $0x9]] }
  0x3c   :  { %v220_v42 = vld [vmem:[%s219_s26] sm:$0x1]  ;;  %s228_s11 = scalar_lea.vmem %s3107_s3, %s2068_s10  ;;  %s1658_s8 = sld [smem:[#allocation5 + $0x9]] }
  0x3d   :  { %213 = vst.msk [vmem:[#allocation2 + $0x14] sm:$0x1] %vm32_vm0, %v212_v40  ;;  %v221_v43 = vmul.f32 %v220_v42, %v218_v41  ;;  %v227_v44 = vld [vmem:[%s226_s9] sm:$0x1]  ;;  %s235_s13 = scalar_lea.vmem %s3106_s2, %s2073_s23  ;;  %s1659_s14 = sld [smem:[#allocation4 + $0xa]] }
  0x3e   :  { %v229_v45 = vld [vmem:[%s228_s11] sm:$0x1]  ;;  %s237_s1 = scalar_lea.vmem %s3107_s3, %s1686_s20  ;;  %s1660_s16 = sld [smem:[#allocation5 + $0xa]] }
  0x3f   :  { %222 = vst.msk [vmem:[#allocation2 + $0x15] sm:$0x1] %vm32_vm0, %v221_v43  ;;  %v230_v46 = vmul.f32 %v229_v45, %v227_v44  ;;  %v236_v47 = vld [vmem:[%s235_s13] sm:$0x1]  ;;  %s100_s10 = scalar_lea.vmem %s3106_s2, %s2083_s25  ;;  %s1661_s22 = sld [smem:[#allocation4 + $0xb]] }
  0x40   :  { %v238_v48 = vld [vmem:[%s237_s1] sm:$0x1]  ;;  %s102_s7 = scalar_lea.vmem %s3107_s3, %s1656_s29  ;;  %s1662_s0 = sld [smem:[#allocation5 + $0xb]] }
  0x41   :  { %231 = vst.msk [vmem:[#allocation2 + $0x16] sm:$0x1] %vm32_vm0, %v230_v46  ;;  %v239_v49 = vmul.f32 %v238_v48, %v236_v47  ;;  %v101_v50 = vld [vmem:[%s100_s10] sm:$0x1]  ;;  %s109_s20 = scalar_lea.vmem %s3106_s2, %s1657_s5  ;;  %s1663_s30 = sld [smem:[#allocation4 + $0xc]] }
  0x42   :  { %v103_v51 = vld [vmem:[%s102_s7] sm:$0x1]  ;;  %s111_s6 = scalar_lea.vmem %s3107_s3, %s1658_s8  ;;  %s1664_s15 = sld [smem:[#allocation5 + $0xc]] }
  0x43   :  { %240 = vst.msk [vmem:[#allocation2 + $0x17] sm:$0x1] %vm32_vm0, %v239_v49  ;;  %v104_v52 = vmul.f32 %v103_v51, %v101_v50  ;;  %v110_v53 = vld [vmem:[%s109_s20] sm:$0x1]  ;;  %s118_s29 = scalar_lea.vmem %s3106_s2, %s1659_s14  ;;  %s2126_s12 = sld [smem:[#allocation4 + $0xd]] }
  0x44   :  { %v112_v54 = vld [vmem:[%s111_s6] sm:$0x1]  ;;  %s120_s17 = scalar_lea.vmem %s3107_s3, %s1660_s16  ;;  %s1666_s19 = sld [smem:[#allocation5 + $0xd]] }
  0x45   :  { %105 = vst.msk [vmem:[#allocation2 + $0x8] sm:$0x1] %vm32_vm0, %v104_v52  ;;  %v113_v55 = vmul.f32 %v112_v54, %v110_v53  ;;  %v119_v56 = vld [vmem:[%s118_s29] sm:$0x1]  ;;  %s127_s21 = scalar_lea.vmem %s3106_s2, %s1661_s22  ;;  %s2135_s18 = sld [smem:[#allocation4 + $0xe]] }
  0x46   :  { %v121_v57 = vld [vmem:[%s120_s17] sm:$0x1]  ;;  %s129_s23 = scalar_lea.vmem %s3107_s3, %s1662_s0  ;;  %s1668_s27 = sld [smem:[#allocation5 + $0xe]] }
  0x47   :  { %114 = vst.msk [vmem:[#allocation2 + $0x9] sm:$0x1] %vm32_vm0, %v113_v55  ;;  %v122_v58 = vmul.f32 %v121_v57, %v119_v56  ;;  %v128_v59 = vld [vmem:[%s127_s21] sm:$0x1]  ;;  %s136_s26 = scalar_lea.vmem %s3106_s2, %s1663_s30  ;;  %s2144_s24 = sld [smem:[#allocation4 + $0xf]] }
  0x48   :  { %v130_v60 = vld [vmem:[%s129_s23] sm:$0x1]  ;;  %s138_s25 = scalar_lea.vmem %s3107_s3, %s1664_s15  ;;  %s1670_s9 = sld [smem:[#allocation5 + $0xf]] }
  0x49   :  { %123 = vst.msk [vmem:[#allocation2 + $0xa] sm:$0x1] %vm32_vm0, %v122_v58  ;;  %v131_v61 = vmul.f32 %v130_v60, %v128_v59  ;;  %v137_v62 = vld [vmem:[%s136_s26] sm:$0x1]  ;;  %s145_s11 = scalar_lea.vmem %s3106_s2, %s2126_s12  ;;  %s2154_s28 = sld [smem:[#allocation4 + $0x18]] }
  0x4a   :  { %v1179_v63 = vld [vmem:[#allocation2 + $0x10] sm:$0xff]  ;;  %v139_v0 = vld [vmem:[%s138_s25] sm:$0x1]  ;;  %s147_s15 = scalar_lea.vmem %s3107_s3, %s1666_s19  ;;  %s1688_s5 = sld [smem:[#allocation5 + $0x18]] }
  0x4b   :  { %v1200_v1 = vsel %vm1193_vm1, %v1179_v63, 0.0  ;;  %132 = vst.msk [vmem:[#allocation2 + $0xb] sm:$0x1] %vm32_vm0, %v131_v61  ;;  %v140_v2 = vmul.f32 %v139_v0, %v137_v62  ;;  %v146_v3 = vld [vmem:[%s145_s11] sm:$0x1]  ;;  %s154_s12 = scalar_lea.vmem %s3106_s2, %s2135_s18  ;;  %s1689_s1 = sld [smem:[#allocation4 + $0x19]] }
  0x4c   :  { %1201 = vadd.xlane.f32.xlu1 %v1200_v1  ;;  %v148_v4 = vld [vmem:[%s147_s15] sm:$0x1]  ;;  %s156_s14 = scalar_lea.vmem %s3107_s3, %s1668_s27  ;;  %s1690_s10 = sld [smem:[#allocation5 + $0x19]] }
  0x4d   :  { %141 = vst.msk [vmem:[#allocation2 + $0xc] sm:$0x1] %vm32_vm0, %v140_v2  ;;  %v149_v5 = vmul.f32 %v148_v4, %v146_v3  ;;  %v155_v6 = vld [vmem:[%s154_s12] sm:$0x1]  ;;  %s163_s16 = scalar_lea.vmem %s3106_s2, %s2144_s24  ;;  %s1691_s7 = sld [smem:[#allocation4 + $0x1a]] }
  0x4e   :  { %v157_v7 = vld [vmem:[%s156_s14] sm:$0x1]  ;;  %s165_s22 = scalar_lea.vmem %s3107_s3, %s1670_s9  ;;  %s1692_s20 = sld [smem:[#allocation5 + $0x1a]] }
  0x4f   :  { %150 = vst.msk [vmem:[#allocation2 + $0xd] sm:$0x1] %vm32_vm0, %v149_v5  ;;  %v158_v8 = vmul.f32 %v157_v7, %v155_v6  ;;  %v164_v9 = vld [vmem:[%s163_s16] sm:$0x1]  ;;  %s244_s27 = scalar_lea.vmem %s3106_s2, %s2154_s28  ;;  %s1693_s6 = sld [smem:[#allocation4 + $0x1b]] }
  0x50   :  { %v166_v10 = vld [vmem:[%s165_s22] sm:$0x1]  ;;  %s246_s30 = scalar_lea.vmem %s3107_s3, %s1688_s5  ;;  %s1694_s29 = sld [smem:[#allocation5 + $0x1b]] }
  0x51   :  { %159 = vst.msk [vmem:[#allocation2 + $0xe] sm:$0x1] %vm32_vm0, %v158_v8  ;;  %v167_v11 = vmul.f32 %v166_v10, %v164_v9  ;;  %v245_v12 = vld [vmem:[%s244_s27] sm:$0x1]  ;;  %s253_s9 = scalar_lea.vmem %s3106_s2, %s1689_s1  ;;  %s1695_s17 = sld [smem:[#allocation4 + $0x1c]] }
  0x52   :  { %v247_v13 = vld [vmem:[%s246_s30] sm:$0x1]  ;;  %s255_s8 = scalar_lea.vmem %s3107_s3, %s1690_s10  ;;  %s1696_s21 = sld [smem:[#allocation5 + $0x1c]] }
  0x53   :  { %168 = vst.msk [vmem:[#allocation2 + $0xf] sm:$0x1] %vm32_vm0, %v167_v11  ;;  %v248_v14 = vmul.f32 %v247_v13, %v245_v12  ;;  %v254_v15 = vld [vmem:[%s253_s9] sm:$0x1]  ;;  %s262_s5 = scalar_lea.vmem %s3106_s2, %s1691_s7  ;;  %s2195_s23 = sld [smem:[#allocation4 + $0x1d]] }
  0x54   :  { %v256_v16 = vld [vmem:[%s255_s8] sm:$0x1]  ;;  %s264_s18 = scalar_lea.vmem %s3107_s3, %s1692_s20  ;;  %s1698_s26 = sld [smem:[#allocation5 + $0x1d]] }
  0x55   :  { %249 = vst.msk [vmem:[#allocation2 + $0x18] sm:$0x1] %vm32_vm0, %v248_v14  ;;  %v257_v17 = vmul.f32 %v256_v16, %v254_v15  ;;  %v263_v18 = vld [vmem:[%s262_s5] sm:$0x1]  ;;  %s271_s25 = scalar_lea.vmem %s3106_s2, %s1693_s6  ;;  %s2204_s0 = sld [smem:[#allocation4 + $0x1e]] }
  0x56   :  { %v265_v19 = vld [vmem:[%s264_s18] sm:$0x1]  ;;  %s273_s24 = scalar_lea.vmem %s3107_s3, %s1694_s29  ;;  %s1700_s11 = sld [smem:[#allocation5 + $0x1e]] }
  0x57   :  { %258 = vst.msk [vmem:[#allocation2 + $0x19] sm:$0x1] %vm32_vm0, %v257_v17  ;;  %v266_v20 = vmul.f32 %v265_v19, %v263_v18  ;;  %v272_v21 = vld [vmem:[%s271_s25] sm:$0x1]  ;;  %s280_s15 = scalar_lea.vmem %s3106_s2, %s1695_s17  ;;  %s2213_s13 = sld [smem:[#allocation4 + $0x1f]] }
  0x58   :  { %v274_v22 = vld [vmem:[%s273_s24] sm:$0x1]  ;;  %s282_s28 = scalar_lea.vmem %s3107_s3, %s1696_s21  ;;  %s1702_s12 = sld [smem:[#allocation5 + $0x1f]] }
  0x59   :  { %267 = vst.msk [vmem:[#allocation2 + $0x1a] sm:$0x1] %vm32_vm0, %v266_v20  ;;  %v275_v23 = vmul.f32 %v274_v22, %v272_v21  ;;  %v281_v24 = vld [vmem:[%s280_s15] sm:$0x1]  ;;  %s289_s14 = scalar_lea.vmem %s3106_s2, %s2195_s23  ;;  %s2223_s19 = sld [smem:[#allocation4 + $0x20]] }
  0x5a   :  { %v1178_v25 = vld [vmem:[#allocation2 + $0x8] sm:$0xff]  ;;  %v283_v26 = vld [vmem:[%s282_s28] sm:$0x1]  ;;  %s291_s21 = scalar_lea.vmem %s3107_s3, %s1698_s26  ;;  %s1704_s1 = sld [smem:[#allocation5 + $0x20]] }
  0x5b   :  { %v1197_v27 = vsel %vm1193_vm1, %v1178_v25, 0.0  ;;  %276 = vst.msk [vmem:[#allocation2 + $0x1b] sm:$0x1] %vm32_vm0, %v275_v23  ;;  %v284_v28 = vmul.f32 %v283_v26, %v281_v24  ;;  %v290_v29 = vld [vmem:[%s289_s14] sm:$0x1]  ;;  %s298_s23 = scalar_lea.vmem %s3106_s2, %s2204_s0  ;;  %s1705_s22 = sld [smem:[#allocation4 + $0x21]] }
  0x5c   :  { %1198 = vadd.xlane.f32.xlu0 %v1197_v27  ;;  %v292_v30 = vld [vmem:[%s291_s21] sm:$0x1]  ;;  %s300_s7 = scalar_lea.vmem %s3107_s3, %s1700_s11  ;;  %s1706_s27 = sld [smem:[#allocation5 + $0x21]] }
  0x5d   :  { %285 = vst.msk [vmem:[#allocation2 + $0x1c] sm:$0x1] %vm32_vm0, %v284_v28  ;;  %v293_v31 = vmul.f32 %v292_v30, %v290_v29  ;;  %v299_v32 = vld [vmem:[%s298_s23] sm:$0x1]  ;;  %s307_s20 = scalar_lea.vmem %s3106_s2, %s2213_s13  ;;  %s1707_s30 = sld [smem:[#allocation4 + $0x22]] }
  0x5e   :  { %v301_v33 = vld [vmem:[%s300_s7] sm:$0x1]  ;;  %s309_s6 = scalar_lea.vmem %s3107_s3, %s1702_s12  ;;  %s1708_s9 = sld [smem:[#allocation5 + $0x22]] }
  0x5f   :  { %294 = vst.msk [vmem:[#allocation2 + $0x1d] sm:$0x1] %vm32_vm0, %v293_v31  ;;  %v302_v34 = vmul.f32 %v301_v33, %v299_v32  ;;  %v308_v35 = vld [vmem:[%s307_s20] sm:$0x1]  ;;  %s316_s11 = scalar_lea.vmem %s3106_s2, %s2223_s19  ;;  %s1709_s8 = sld [smem:[#allocation4 + $0x23]] }
  0x60   :  { %v310_v36 = vld [vmem:[%s309_s6] sm:$0x1]  ;;  %s318_s17 = scalar_lea.vmem %s3107_s3, %s1704_s1  ;;  %s1710_s5 = sld [smem:[#allocation5 + $0x23]] }
  0x61   :  { %303 = vst.msk [vmem:[#allocation2 + $0x1e] sm:$0x1] %vm32_vm0, %v302_v34  ;;  %v311_v37 = vmul.f32 %v310_v36, %v308_v35  ;;  %v317_v38 = vld [vmem:[%s316_s11] sm:$0x1]  ;;  %s325_s12 = scalar_lea.vmem %s3106_s2, %s1705_s22  ;;  %s1711_s18 = sld [smem:[#allocation4 + $0x24]] }
  0x62   :  { %v319_v39 = vld [vmem:[%s318_s17] sm:$0x1]  ;;  %s327_s10 = scalar_lea.vmem %s3107_s3, %s1706_s27  ;;  %s1712_s25 = sld [smem:[#allocation5 + $0x24]] }
  0x63   :  { %312 = vst.msk [vmem:[#allocation2 + $0x1f] sm:$0x1] %vm32_vm0, %v311_v37  ;;  %v320_v40 = vmul.f32 %v319_v39, %v317_v38  ;;  %v326_v41 = vld [vmem:[%s325_s12] sm:$0x1]  ;;  %s334_s1 = scalar_lea.vmem %s3106_s2, %s1707_s30  ;;  %s2264_s24 = sld [smem:[#allocation4 + $0x25]] }
  0x64   :  { %v328_v42 = vld [vmem:[%s327_s10] sm:$0x1]  ;;  %s336_s0 = scalar_lea.vmem %s3107_s3, %s1708_s9  ;;  %s1714_s15 = sld [smem:[#allocation5 + $0x25]] }
  0x65   :  { %321 = vst.msk [vmem:[#allocation2 + $0x20] sm:$0x1] %vm32_vm0, %v320_v40  ;;  %v329_v43 = vmul.f32 %v328_v42, %v326_v41  ;;  %v335_v44 = vld [vmem:[%s334_s1] sm:$0x1]  ;;  %s343_s28 = scalar_lea.vmem %s3106_s2, %s1709_s8  ;;  %s2273_s29 = sld [smem:[#allocation4 + $0x26]] }
  0x66   :  { %v337_v45 = vld [vmem:[%s336_s0] sm:$0x1]  ;;  %s345_s13 = scalar_lea.vmem %s3107_s3, %s1710_s5  ;;  %s1716_s14 = sld [smem:[#allocation5 + $0x26]] }
  0x67   :  { %330 = vst.msk [vmem:[#allocation2 + $0x21] sm:$0x1] %vm32_vm0, %v329_v43  ;;  %v338_v46 = vmul.f32 %v337_v45, %v335_v44  ;;  %v344_v47 = vld [vmem:[%s343_s28] sm:$0x1]  ;;  %s352_s21 = scalar_lea.vmem %s3106_s2, %s1711_s18  ;;  %s2282_s16 = sld [smem:[#allocation4 + $0x27]] }
  0x68   :  { %v346_v48 = vld [vmem:[%s345_s13] sm:$0x1]  ;;  %s354_s19 = scalar_lea.vmem %s3107_s3, %s1712_s25  ;;  %s1718_s23 = sld [smem:[#allocation5 + $0x27]] }
  0x69   :  { %339 = vst.msk [vmem:[#allocation2 + $0x22] sm:$0x1] %vm32_vm0, %v338_v46  ;;  %v347_v49 = vmul.f32 %v346_v48, %v344_v47  ;;  %v353_v50 = vld [vmem:[%s352_s21] sm:$0x1]  ;;  %s361_s7 = scalar_lea.vmem %s3106_s2, %s2264_s24  ;;  %s2292_s26 = sld [smem:[#allocation4 + $0x28]] }
  0x6a   :  { %v1180_v51 = vld [vmem:[#allocation2 + $0x18] sm:$0xff]  ;;  %v355_v52 = vld [vmem:[%s354_s19] sm:$0x1]  ;;  %s363_s25 = scalar_lea.vmem %s3107_s3, %s1714_s15  ;;  %s1720_s22 = sld [smem:[#allocation5 + $0x28]] }
  0x6b   :  { %v1203_v53 = vsel %vm1193_vm1, %v1180_v51, 0.0  ;;  %348 = vst.msk [vmem:[#allocation2 + $0x23] sm:$0x1] %vm32_vm0, %v347_v49  ;;  %v356_v54 = vmul.f32 %v355_v52, %v353_v50  ;;  %v362_v55 = vld [vmem:[%s361_s7] sm:$0x1]  ;;  %s370_s24 = scalar_lea.vmem %s3106_s2, %s2273_s29  ;;  %s1721_s6 = sld [smem:[#allocation4 + $0x29]] }
  0x6c   :  { %1204 = vadd.xlane.f32.xlu1 %v1203_v53  ;;  %v364_v56 = vld [vmem:[%s363_s25] sm:$0x1]  ;;  %s372_s30 = scalar_lea.vmem %s3107_s3, %s1716_s14  ;;  %s1722_s11 = sld [smem:[#allocation5 + $0x29]] }
  0x6d   :  { %357 = vst.msk [vmem:[#allocation2 + $0x24] sm:$0x1] %vm32_vm0, %v356_v54  ;;  %v365_v57 = vmul.f32 %v364_v56, %v362_v55  ;;  %v371_v58 = vld [vmem:[%s370_s24] sm:$0x1]  ;;  %s379_s9 = scalar_lea.vmem %s3106_s2, %s2282_s16  ;;  %s1723_s17 = sld [smem:[#allocation4 + $0x2a]] }
  0x6e   :  { %v373_v59 = vld [vmem:[%s372_s30] sm:$0x1]  ;;  %s381_s8 = scalar_lea.vmem %s3107_s3, %s1718_s23  ;;  %s1724_s12 = sld [smem:[#allocation5 + $0x2a]] }
  0x6f   :  { %366 = vst.msk [vmem:[#allocation2 + $0x25] sm:$0x1] %vm32_vm0, %v365_v57  ;;  %v374_v60 = vmul.f32 %v373_v59, %v371_v58  ;;  %v380_v61 = vld [vmem:[%s379_s9] sm:$0x1]  ;;  %s388_s14 = scalar_lea.vmem %s3106_s2, %s2292_s26  ;;  %s1725_s10 = sld [smem:[#allocation4 + $0x2b]] }
  0x70   :  { %v382_v62 = vld [vmem:[%s381_s8] sm:$0x1]  ;;  %s390_s18 = scalar_lea.vmem %s3107_s3, %s1720_s22  ;;  %s1726_s1 = sld [smem:[#allocation5 + $0x2b]] }
  0x71   :  { %375 = vst.msk [vmem:[#allocation2 + $0x26] sm:$0x1] %vm32_vm0, %v374_v60  ;;  %v383_v63 = vmul.f32 %v382_v62, %v380_v61  ;;  %v389_v0 = vld [vmem:[%s388_s14] sm:$0x1]  ;;  %s397_s23 = scalar_lea.vmem %s3106_s2, %s1721_s6  ;;  %s1727_s0 = sld [smem:[#allocation4 + $0x2c]] }
  0x72   :  { %v391_v1 = vld [vmem:[%s390_s18] sm:$0x1]  ;;  %s399_s27 = scalar_lea.vmem %s3107_s3, %s1722_s11  ;;  %s1728_s28 = sld [smem:[#allocation5 + $0x2c]] }
  0x73   :  { %384 = vst.msk [vmem:[#allocation2 + $0x27] sm:$0x1] %vm32_vm0, %v383_v63  ;;  %v392_v2 = vmul.f32 %v391_v1, %v389_v0  ;;  %v398_v3 = vld [vmem:[%s397_s23] sm:$0x1]  ;;  %s406_s22 = scalar_lea.vmem %s3106_s2, %s1723_s17  ;;  %s2333_s13 = sld [smem:[#allocation4 + $0x2d]] }
  0x74   :  { %v400_v4 = vld [vmem:[%s399_s27] sm:$0x1]  ;;  %s408_s29 = scalar_lea.vmem %s3107_s3, %s1724_s12  ;;  %s1730_s21 = sld [smem:[#allocation5 + $0x2d]] }
  0x75   :  { %393 = vst.msk [vmem:[#allocation2 + $0x28] sm:$0x1] %vm32_vm0, %v392_v2  ;;  %v401_v5 = vmul.f32 %v400_v4, %v398_v3  ;;  %v407_v6 = vld [vmem:[%s406_s22] sm:$0x1]  ;;  %s415_s19 = scalar_lea.vmem %s3106_s2, %s1725_s10  ;;  %s2342_s5 = sld [smem:[#allocation4 + $0x2e]] }
  0x76   :  { %v409_v7 = vld [vmem:[%s408_s29] sm:$0x1]  ;;  %s417_s16 = scalar_lea.vmem %s3107_s3, %s1726_s1  ;;  %s1732_s7 = sld [smem:[#allocation5 + $0x2e]] }
  0x77   :  { %402 = vst.msk [vmem:[#allocation2 + $0x29] sm:$0x1] %vm32_vm0, %v401_v5  ;;  %v410_v8 = vmul.f32 %v409_v7, %v407_v6  ;;  %v416_v9 = vld [vmem:[%s415_s19] sm:$0x1]  ;;  %s424_s25 = scalar_lea.vmem %s3106_s2, %s1727_s0  ;;  %s2351_s20 = sld [smem:[#allocation4 + $0x2f]] }
  0x78   :  { %v418_v10 = vld [vmem:[%s417_s16] sm:$0x1]  ;;  %s426_s26 = scalar_lea.vmem %s3107_s3, %s1728_s28  ;;  %s1734_s24 = sld [smem:[#allocation5 + $0x2f]] }
  0x79   :  { %411 = vst.msk [vmem:[#allocation2 + $0x2a] sm:$0x1] %vm32_vm0, %v410_v8  ;;  %v419_v11 = vmul.f32 %v418_v10, %v416_v9  ;;  %v425_v12 = vld [vmem:[%s424_s25] sm:$0x1]  ;;  %s433_s30 = scalar_lea.vmem %s3106_s2, %s2333_s13  ;;  %s2361_s15 = sld [smem:[#allocation4 + $0x30]] }
  0x7a   :  { %v1181_v13 = vld [vmem:[#allocation2 + $0x20] sm:$0xff]  ;;  %s435_s28 = scalar_lea.vmem %s3107_s3, %s1730_s21  ;;  %s1736_s6 = sld [smem:[#allocation5 + $0x30]] }
  0x7b   :  { %v427_v14 = vld [vmem:[%s426_s26] sm:$0x1]  ;;  %v1206_v15 = vsel %vm1193_vm1, %v1181_v13, 0.0  ;;  %420 = vst.msk [vmem:[#allocation2 + $0x2b] sm:$0x1] %vm32_vm0, %v419_v11  ;;  %s442_s13 = scalar_lea.vmem %s3106_s2, %s2342_s5  ;;  %s1737_s8 = sld [smem:[#allocation4 + $0x31]] }
  0x7c   :  { %v428_v16 = vmul.f32 %v427_v14, %v425_v12  ;;  %v434_v17 = vld [vmem:[%s433_s30] sm:$0x1]  ;;  %1207 = vadd.xlane.f32.xlu0 %v1206_v15  ;;  %s444_s17 = scalar_lea.vmem %s3107_s3, %s1732_s7  ;;  %s1738_s14 = sld [smem:[#allocation5 + $0x31]] }
  0x7d   :  { %v436_v18 = vld [vmem:[%s435_s28] sm:$0x1]  ;;  %s451_s12 = scalar_lea.vmem %s3106_s2, %s2351_s20  ;;  %s1739_s18 = sld [smem:[#allocation4 + $0x32]] }
  0x7e   :  { %429 = vst.msk [vmem:[#allocation2 + $0x2c] sm:$0x1] %vm32_vm0, %v428_v16  ;;  %v437_v19 = vmul.f32 %v436_v18, %v434_v17  ;;  %v443_v20 = vld [vmem:[%s442_s13] sm:$0x1]  ;;  %s453_s10 = scalar_lea.vmem %s3107_s3, %s1734_s24  ;;  %s1740_s23 = sld [smem:[#allocation5 + $0x32]] }
  0x7f   :  { %v445_v21 = vld [vmem:[%s444_s17] sm:$0x1]  ;;  %s460_s7 = scalar_lea.vmem %s3106_s2, %s2361_s15  ;;  %s1741_s27 = sld [smem:[#allocation4 + $0x33]] }
  0x80   :  { %438 = vst.msk [vmem:[#allocation2 + $0x2d] sm:$0x1] %vm32_vm0, %v437_v19  ;;  %v446_v22 = vmul.f32 %v445_v21, %v443_v20  ;;  %v452_v23 = vld [vmem:[%s451_s12] sm:$0x1]  ;;  %s462_s0 = scalar_lea.vmem %s3107_s3, %s1736_s6  ;;  %s1742_s22 = sld [smem:[#allocation5 + $0x33]] }
  0x81   :  { %v454_v24 = vld [vmem:[%s453_s10] sm:$0x1]  ;;  %s469_s24 = scalar_lea.vmem %s3106_s2, %s1737_s8  ;;  %s1743_s29 = sld [smem:[#allocation4 + $0x34]] }
  0x82   :  { %447 = vst.msk [vmem:[#allocation2 + $0x2e] sm:$0x1] %vm32_vm0, %v446_v22  ;;  %v455_v25 = vmul.f32 %v454_v24, %v452_v23  ;;  %v461_v26 = vld [vmem:[%s460_s7] sm:$0x1]  ;;  %s471_s11 = scalar_lea.vmem %s3107_s3, %s1738_s14  ;;  %s1744_s19 = sld [smem:[#allocation5 + $0x34]] }
  0x83   :  { %v463_v27 = vld [vmem:[%s462_s0] sm:$0x1]  ;;  %s478_s6 = scalar_lea.vmem %s3106_s2, %s1739_s18  ;;  %s2402_s16 = sld [smem:[#allocation4 + $0x35]] }
  0x84   :  { %456 = vst.msk [vmem:[#allocation2 + $0x2f] sm:$0x1] %vm32_vm0, %v455_v25  ;;  %v464_v28 = vmul.f32 %v463_v27, %v461_v26  ;;  %v470_v29 = vld [vmem:[%s469_s24] sm:$0x1]  ;;  %s480_s5 = scalar_lea.vmem %s3107_s3, %s1740_s23  ;;  %s1746_s25 = sld [smem:[#allocation5 + $0x35]] }
  0x85   :  { %v472_v30 = vld [vmem:[%s471_s11] sm:$0x1]  ;;  %s487_s26 = scalar_lea.vmem %s3106_s2, %s1741_s27  ;;  %s2411_s1 = sld [smem:[#allocation4 + $0x36]] }
  0x86   :  { %465 = vst.msk [vmem:[#allocation2 + $0x30] sm:$0x1] %vm32_vm0, %v464_v28  ;;  %v473_v31 = vmul.f32 %v472_v30, %v470_v29  ;;  %v479_v32 = vld [vmem:[%s478_s6] sm:$0x1]  ;;  %s489_s20 = scalar_lea.vmem %s3107_s3, %s1742_s22  ;;  %s1748_s30 = sld [smem:[#allocation5 + $0x36]] }
  0x87   :  { %v481_v33 = vld [vmem:[%s480_s5] sm:$0x1]  ;;  %s496_s28 = scalar_lea.vmem %s3106_s2, %s1743_s29  ;;  %s2420_s9 = sld [smem:[#allocation4 + $0x37]] }
  0x88   :  { %474 = vst.msk [vmem:[#allocation2 + $0x31] sm:$0x1] %vm32_vm0, %v473_v31  ;;  %v482_v34 = vmul.f32 %v481_v33, %v479_v32  ;;  %v488_v35 = vld [vmem:[%s487_s26] sm:$0x1]  ;;  %s498_s15 = scalar_lea.vmem %s3107_s3, %s1744_s19  ;;  %s1750_s13 = sld [smem:[#allocation5 + $0x37]] }
  0x89   :  { %v490_v36 = vld [vmem:[%s489_s20] sm:$0x1]  ;;  %s505_s17 = scalar_lea.vmem %s3106_s2, %s2402_s16  ;;  %s2430_s21 = sld [smem:[#allocation4 + $0x38]] }
  0x8a   :  { %483 = vst.msk [vmem:[#allocation2 + $0x32] sm:$0x1] %vm32_vm0, %v482_v34  ;;  %v491_v37 = vmul.f32 %v490_v36, %v488_v35  ;;  %v497_v38 = vld [vmem:[%s496_s28] sm:$0x1]  ;;  %s507_s19 = scalar_lea.vmem %s3107_s3, %s1746_s25  ;;  %s1752_s8 = sld [smem:[#allocation5 + $0x38]] }
  0x8b   :  { %v1182_v39 = vld [vmem:[#allocation2 + $0x28] sm:$0xff]  ;;  %v499_v40 = vld [vmem:[%s498_s15] sm:$0x1]  ;;  %s514_s16 = scalar_lea.vmem %s3106_s2, %s2411_s1  ;;  %s1753_s10 = sld [smem:[#allocation4 + $0x39]] }
  0x8c   :  { %v1209_v41 = vsel %vm1193_vm1, %v1182_v39, 0.0  ;;  %492 = vst.msk [vmem:[#allocation2 + $0x33] sm:$0x1] %vm32_vm0, %v491_v37  ;;  %v500_v42 = vmul.f32 %v499_v40, %v497_v38  ;;  %v506_v43 = vld [vmem:[%s505_s17] sm:$0x1]  ;;  %s516_s18 = scalar_lea.vmem %s3107_s3, %s1748_s30  ;;  %s1754_s7 = sld [smem:[#allocation5 + $0x39]] }
  0x8d   :  { %1210 = vadd.xlane.f32.xlu1 %v1209_v41  ;;  %v508_v44 = vld [vmem:[%s507_s19] sm:$0x1]  ;;  %s523_s23 = scalar_lea.vmem %s3106_s2, %s2420_s9  ;;  %s1755_s0 = sld [smem:[#allocation4 + $0x3a]] }
  0x8e   :  { %501 = vst.msk [vmem:[#allocation2 + $0x34] sm:$0x1] %vm32_vm0, %v500_v42  ;;  %v509_v45 = vmul.f32 %v508_v44, %v506_v43  ;;  %v515_v46 = vld [vmem:[%s514_s16] sm:$0x1]  ;;  %s525_s27 = scalar_lea.vmem %s3107_s3, %s1750_s13  ;;  %s1756_s24 = sld [smem:[#allocation5 + $0x3a]] }
  0x8f   :  { %v517_v47 = vld [vmem:[%s516_s18] sm:$0x1]  ;;  %s532_s30 = scalar_lea.vmem %s3106_s2, %s2430_s21  ;;  %s1757_s11 = sld [smem:[#allocation4 + $0x3b]] }
  0x90   :  { %510 = vst.msk [vmem:[#allocation2 + $0x35] sm:$0x1] %vm32_vm0, %v509_v45  ;;  %v518_v48 = vmul.f32 %v517_v47, %v515_v46  ;;  %v524_v49 = vld [vmem:[%s523_s23] sm:$0x1]  ;;  %s534_s29 = scalar_lea.vmem %s3107_s3, %s1752_s8  ;;  %s1758_s6 = sld [smem:[#allocation5 + $0x3b]] }
  0x91   :  { %v526_v50 = vld [vmem:[%s525_s27] sm:$0x1]  ;;  %s541_s13 = scalar_lea.vmem %s3106_s2, %s1753_s10  ;;  %s1759_s5 = sld [smem:[#allocation4 + $0x3c]] }
  0x92   :  { %519 = vst.msk [vmem:[#allocation2 + $0x36] sm:$0x1] %vm32_vm0, %v518_v48  ;;  %v527_v51 = vmul.f32 %v526_v50, %v524_v49  ;;  %v533_v52 = vld [vmem:[%s532_s30] sm:$0x1]  ;;  %s543_s14 = scalar_lea.vmem %s3107_s3, %s1754_s7  ;;  %s1760_s26 = sld [smem:[#allocation5 + $0x3c]] }
  0x93   :  { %v535_v53 = vld [vmem:[%s534_s29] sm:$0x1]  ;;  %s550_s8 = scalar_lea.vmem %s3106_s2, %s1755_s0  ;;  %s2471_s20 = sld [smem:[#allocation4 + $0x3d]] }
  0x94   :  { %528 = vst.msk [vmem:[#allocation2 + $0x37] sm:$0x1] %vm32_vm0, %v527_v51  ;;  %v536_v54 = vmul.f32 %v535_v53, %v533_v52  ;;  %v542_v55 = vld [vmem:[%s541_s13] sm:$0x1]  ;;  %s552_s1 = scalar_lea.vmem %s3107_s3, %s1756_s24  ;;  %s1762_s28 = sld [smem:[#allocation5 + $0x3d]] }
  0x95   :  { %v544_v56 = vld [vmem:[%s543_s14] sm:$0x1]  ;;  %s559_s15 = scalar_lea.vmem %s3106_s2, %s1757_s11  ;;  %s2480_s22 = sld [smem:[#allocation4 + $0x3e]] }
  0x96   :  { %537 = vst.msk [vmem:[#allocation2 + $0x38] sm:$0x1] %vm32_vm0, %v536_v54  ;;  %v545_v57 = vmul.f32 %v544_v56, %v542_v55  ;;  %v551_v58 = vld [vmem:[%s550_s8] sm:$0x1]  ;;  %s561_s9 = scalar_lea.vmem %s3107_s3, %s1758_s6  ;;  %s1764_s17 = sld [smem:[#allocation5 + $0x3e]] }
  0x97   :  { %v553_v59 = vld [vmem:[%s552_s1] sm:$0x1]  ;;  %s568_s19 = scalar_lea.vmem %s3106_s2, %s1759_s5  ;;  %s2489_s12 = sld [smem:[#allocation4 + $0x3f]] }
  0x98   :  { %546 = vst.msk [vmem:[#allocation2 + $0x39] sm:$0x1] %vm32_vm0, %v545_v57  ;;  %v554_v60 = vmul.f32 %v553_v59, %v551_v58  ;;  %v560_v61 = vld [vmem:[%s559_s15] sm:$0x1]  ;;  %s570_s21 = scalar_lea.vmem %s3107_s3, %s1760_s26  ;;  %s1766_s16 = sld [smem:[#allocation5 + $0x3f]] }
  0x99   :  { %v562_v62 = vld [vmem:[%s561_s9] sm:$0x1]  ;;  %s577_s18 = scalar_lea.vmem %s3106_s2, %s2471_s20  ;;  %s2499_s25 = sld [smem:[#allocation4 + $0x40]] }
  0x9a   :  { %555 = vst.msk [vmem:[#allocation2 + $0x3a] sm:$0x1] %vm32_vm0, %v554_v60  ;;  %v563_v63 = vmul.f32 %v562_v62, %v560_v61  ;;  %v569_v0 = vld [vmem:[%s568_s19] sm:$0x1]  ;;  %s579_s26 = scalar_lea.vmem %s3107_s3, %s1762_s28  ;;  %s1768_s10 = sld [smem:[#allocation5 + $0x40]] }
  0x9b   :  { %v1183_v1 = vld [vmem:[#allocation2 + $0x30] sm:$0xff]  ;;  %v571_v2 = vld [vmem:[%s570_s21] sm:$0x1]  ;;  %s586_s20 = scalar_lea.vmem %s3106_s2, %s2480_s22  ;;  %s1769_s27 = sld [smem:[#allocation4 + $0x41]] }
  0x9c   :  { %v1212_v3 = vsel %vm1193_vm1, %v1183_v1, 0.0  ;;  %564 = vst.msk [vmem:[#allocation2 + $0x3b] sm:$0x1] %vm32_vm0, %v563_v63  ;;  %v572_v4 = vmul.f32 %v571_v2, %v569_v0  ;;  %v578_v5 = vld [vmem:[%s577_s18] sm:$0x1]  ;;  %s588_s0 = scalar_lea.vmem %s3107_s3, %s1764_s17  ;;  %s1770_s30 = sld [smem:[#allocation5 + $0x41]] }
  0x9d   :  { %1213 = vadd.xlane.f32.xlu0 %v1212_v3  ;;  %v580_v6 = vld [vmem:[%s579_s26] sm:$0x1]  ;;  %s595_s24 = scalar_lea.vmem %s3106_s2, %s2489_s12  ;;  %s1771_s29 = sld [smem:[#allocation4 + $0x42]] }
  0x9e   :  { %573 = vst.msk [vmem:[#allocation2 + $0x3c] sm:$0x1] %vm32_vm0, %v572_v4  ;;  %v581_v7 = vmul.f32 %v580_v6, %v578_v5  ;;  %v587_v8 = vld [vmem:[%s586_s20] sm:$0x1]  ;;  %s597_s11 = scalar_lea.vmem %s3107_s3, %s1766_s16  ;;  %s1772_s13 = sld [smem:[#allocation5 + $0x42]] }
  0x9f   :  { %v589_v9 = vld [vmem:[%s588_s0] sm:$0x1]  ;;  %s604_s17 = scalar_lea.vmem %s3106_s2, %s2499_s25  ;;  %s1773_s14 = sld [smem:[#allocation4 + $0x43]] }
  0xa0   :  { %582 = vst.msk [vmem:[#allocation2 + $0x3d] sm:$0x1] %vm32_vm0, %v581_v7  ;;  %v590_v10 = vmul.f32 %v589_v9, %v587_v8  ;;  %v596_v11 = vld [vmem:[%s595_s24] sm:$0x1]  ;;  %s606_s5 = scalar_lea.vmem %s3107_s3, %s1768_s10  ;;  %s1774_s8 = sld [smem:[#allocation5 + $0x43]] }
  0xa1   :  { %v598_v12 = vld [vmem:[%s597_s11] sm:$0x1]  ;;  %s613_s16 = scalar_lea.vmem %s3106_s2, %s1769_s27  ;;  %s1775_s1 = sld [smem:[#allocation4 + $0x44]] }
  0xa2   :  { %591 = vst.msk [vmem:[#allocation2 + $0x3e] sm:$0x1] %vm32_vm0, %v590_v10  ;;  %v599_v13 = vmul.f32 %v598_v12, %v596_v11  ;;  %v605_v14 = vld [vmem:[%s604_s17] sm:$0x1]  ;;  %s615_s7 = scalar_lea.vmem %s3107_s3, %s1770_s30  ;;  %s1776_s15 = sld [smem:[#allocation5 + $0x44]] }
  0xa3   :  { %v607_v15 = vld [vmem:[%s606_s5] sm:$0x1]  ;;  %s622_s10 = scalar_lea.vmem %s3106_s2, %s1771_s29  ;;  %s2540_s9 = sld [smem:[#allocation4 + $0x45]] }
  0xa4   :  { %600 = vst.msk [vmem:[#allocation2 + $0x3f] sm:$0x1] %vm32_vm0, %v599_v13  ;;  %v608_v16 = vmul.f32 %v607_v15, %v605_v14  ;;  %v614_v17 = vld [vmem:[%s613_s16] sm:$0x1]  ;;  %s624_s22 = scalar_lea.vmem %s3107_s3, %s1772_s13  ;;  %s1778_s19 = sld [smem:[#allocation5 + $0x45]] }
  0xa5   :  { %v616_v18 = vld [vmem:[%s615_s7] sm:$0x1]  ;;  %s631_s21 = scalar_lea.vmem %s3106_s2, %s1773_s14  ;;  %s2549_s6 = sld [smem:[#allocation4 + $0x46]] }
  0xa6   :  { %609 = vst.msk [vmem:[#allocation2 + $0x40] sm:$0x1] %vm32_vm0, %v608_v16  ;;  %v617_v19 = vmul.f32 %v616_v18, %v614_v17  ;;  %v623_v20 = vld [vmem:[%s622_s10] sm:$0x1]  ;;  %s633_s12 = scalar_lea.vmem %s3107_s3, %s1774_s8  ;;  %s1780_s18 = sld [smem:[#allocation5 + $0x46]] }
  0xa7   :  { %v625_v21 = vld [vmem:[%s624_s22] sm:$0x1]  ;;  %s640_s26 = scalar_lea.vmem %s3106_s2, %s1775_s1  ;;  %s2558_s23 = sld [smem:[#allocation4 + $0x47]] }
  0xa8   :  { %618 = vst.msk [vmem:[#allocation2 + $0x41] sm:$0x1] %vm32_vm0, %v617_v19  ;;  %v626_v22 = vmul.f32 %v625_v21, %v623_v20  ;;  %v632_v23 = vld [vmem:[%s631_s21] sm:$0x1]  ;;  %s642_s25 = scalar_lea.vmem %s3107_s3, %s1776_s15  ;;  %s1782_s20 = sld [smem:[#allocation5 + $0x47]] }
  0xa9   :  { %v634_v24 = vld [vmem:[%s633_s12] sm:$0x1]  ;;  %s649_s0 = scalar_lea.vmem %s3106_s2, %s2540_s9  ;;  %s2568_s28 = sld [smem:[#allocation4 + $0x48]] }
  0xaa   :  { %627 = vst.msk [vmem:[#allocation2 + $0x42] sm:$0x1] %vm32_vm0, %v626_v22  ;;  %v635_v25 = vmul.f32 %v634_v24, %v632_v23  ;;  %v641_v26 = vld [vmem:[%s640_s26] sm:$0x1]  ;;  %s651_s15 = scalar_lea.vmem %s3107_s3, %s1778_s19  ;;  %s1784_s27 = sld [smem:[#allocation5 + $0x48]] }
  0xab   :  { %v1184_v27 = vld [vmem:[#allocation2 + $0x38] sm:$0xff]  ;;  %v643_v28 = vld [vmem:[%s642_s25] sm:$0x1]  ;;  %s658_s9 = scalar_lea.vmem %s3106_s2, %s2549_s6  ;;  %s1785_s11 = sld [smem:[#allocation4 + $0x49]] }
  0xac   :  { %v1215_v29 = vsel %vm1193_vm1, %v1184_v27, 0.0  ;;  %636 = vst.msk [vmem:[#allocation2 + $0x43] sm:$0x1] %vm32_vm0, %v635_v25  ;;  %v644_v30 = vmul.f32 %v643_v28, %v641_v26  ;;  %v650_v31 = vld [vmem:[%s649_s0] sm:$0x1]  ;;  %s660_s29 = scalar_lea.vmem %s3107_s3, %s1780_s18  ;;  %s1786_s17 = sld [smem:[#allocation5 + $0x49]] }
  0xad   :  { %1216 = vadd.xlane.f32.xlu1 %v1215_v29  ;;  %v652_v32 = vld [vmem:[%s651_s15] sm:$0x1]  ;;  %s667_s13 = scalar_lea.vmem %s3106_s2, %s2558_s23  ;;  %s1787_s5 = sld [smem:[#allocation4 + $0x4a]] }
  0xae   :  { %645 = vst.msk [vmem:[#allocation2 + $0x44] sm:$0x1] %vm32_vm0, %v644_v30  ;;  %v653_v33 = vmul.f32 %v652_v32, %v650_v31  ;;  %v659_v34 = vld [vmem:[%s658_s9] sm:$0x1]  ;;  %s669_s14 = scalar_lea.vmem %s3107_s3, %s1782_s20  ;;  %s1788_s16 = sld [smem:[#allocation5 + $0x4a]] }
  0xaf   :  { %v661_v35 = vld [vmem:[%s660_s29] sm:$0x1]  ;;  %s676_s18 = scalar_lea.vmem %s3106_s2, %s2568_s28  ;;  %s1789_s7 = sld [smem:[#allocation4 + $0x4b]] }
  0xb0   :  { %654 = vst.msk [vmem:[#allocation2 + $0x45] sm:$0x1] %vm32_vm0, %v653_v33  ;;  %v662_v36 = vmul.f32 %v661_v35, %v659_v34  ;;  %v668_v37 = vld [vmem:[%s667_s13] sm:$0x1]  ;;  %s678_s1 = scalar_lea.vmem %s3107_s3, %s1784_s27  ;;  %s1790_s10 = sld [smem:[#allocation5 + $0x4b]] }
  0xb1   :  { %v670_v38 = vld [vmem:[%s669_s14] sm:$0x1]  ;;  %s685_s20 = scalar_lea.vmem %s3106_s2, %s1785_s11  ;;  %s1791_s22 = sld [smem:[#allocation4 + $0x4c]] }
  0xb2   :  { %663 = vst.msk [vmem:[#allocation2 + $0x46] sm:$0x1] %vm32_vm0, %v662_v36  ;;  %v671_v39 = vmul.f32 %v670_v38, %v668_v37  ;;  %v677_v40 = vld [vmem:[%s676_s18] sm:$0x1]  ;;  %s687_s30 = scalar_lea.vmem %s3107_s3, %s1786_s17  ;;  %s1792_s21 = sld [smem:[#allocation5 + $0x4c]] }
  0xb3   :  { %v679_v41 = vld [vmem:[%s678_s1] sm:$0x1]  ;;  %s694_s27 = scalar_lea.vmem %s3106_s2, %s1787_s5  ;;  %s2609_s12 = sld [smem:[#allocation4 + $0x4d]] }
  0xb4   :  { %672 = vst.msk [vmem:[#allocation2 + $0x47] sm:$0x1] %vm32_vm0, %v671_v39  ;;  %v680_v42 = vmul.f32 %v679_v41, %v677_v40  ;;  %v686_v43 = vld [vmem:[%s685_s20] sm:$0x1]  ;;  %s696_s6 = scalar_lea.vmem %s3107_s3, %s1788_s16  ;;  %s1794_s26 = sld [smem:[#allocation5 + $0x4d]] }
  0xb5   :  { %v688_v44 = vld [vmem:[%s687_s30] sm:$0x1]  ;;  %s703_s25 = scalar_lea.vmem %s3106_s2, %s1789_s7  ;;  %s2618_s8 = sld [smem:[#allocation4 + $0x4e]] }
  0xb6   :  { %681 = vst.msk [vmem:[#allocation2 + $0x48] sm:$0x1] %vm32_vm0, %v680_v42  ;;  %v689_v45 = vmul.f32 %v688_v44, %v686_v43  ;;  %v695_v46 = vld [vmem:[%s694_s27] sm:$0x1]  ;;  %s705_s23 = scalar_lea.vmem %s3107_s3, %s1790_s10  ;;  %s1796_s0 = sld [smem:[#allocation5 + $0x4e]] }
  0xb7   :  { %v697_v47 = vld [vmem:[%s696_s6] sm:$0x1]  ;;  %s712_s15 = scalar_lea.vmem %s3106_s2, %s1791_s22  ;;  %s2627_s24 = sld [smem:[#allocation4 + $0x4f]] }
  0xb8   :  { %690 = vst.msk [vmem:[#allocation2 + $0x49] sm:$0x1] %vm32_vm0, %v689_v45  ;;  %v698_v48 = vmul.f32 %v697_v47, %v695_v46  ;;  %v704_v49 = vld [vmem:[%s703_s25] sm:$0x1]  ;;  %s714_s28 = scalar_lea.vmem %s3107_s3, %s1792_s21  ;;  %s1798_s9 = sld [smem:[#allocation5 + $0x4f]] }
  0xb9   :  { %v706_v50 = vld [vmem:[%s705_s23] sm:$0x1]  ;;  %s721_s29 = scalar_lea.vmem %s3106_s2, %s2609_s12  ;;  %s2637_s19 = sld [smem:[#allocation4 + $0x50]] }
  0xba   :  { %699 = vst.msk [vmem:[#allocation2 + $0x4a] sm:$0x1] %vm32_vm0, %v698_v48  ;;  %v707_v51 = vmul.f32 %v706_v50, %v704_v49  ;;  %v713_v52 = vld [vmem:[%s712_s15] sm:$0x1]  ;;  %s723_s21 = scalar_lea.vmem %s3107_s3, %s1794_s26  ;;  %s1800_s11 = sld [smem:[#allocation5 + $0x50]] }
  0xbb   :  { %v1185_v53 = vld [vmem:[#allocation2 + $0x40] sm:$0xff]  ;;  %s730_s12 = scalar_lea.vmem %s3106_s2, %s2618_s8  ;;  %s1801_s14 = sld [smem:[#allocation4 + $0x51]] }
  0xbc   :  { %v715_v54 = vld [vmem:[%s714_s28] sm:$0x1]  ;;  %v1218_v55 = vsel %vm1193_vm1, %v1185_v53, 0.0  ;;  %708 = vst.msk [vmem:[#allocation2 + $0x4b] sm:$0x1] %vm32_vm0, %v707_v51  ;;  %s732_s5 = scalar_lea.vmem %s3107_s3, %s1796_s0  ;;  %s1802_s18 = sld [smem:[#allocation5 + $0x51]] }
  0xbd   :  { %v716_v56 = vmul.f32 %v715_v54, %v713_v52  ;;  %v722_v57 = vld [vmem:[%s721_s29] sm:$0x1]  ;;  %1219 = vadd.xlane.f32.xlu0 %v1218_v55  ;;  %s739_s16 = scalar_lea.vmem %s3106_s2, %s2627_s24  ;;  %s1803_s1 = sld [smem:[#allocation4 + $0x52]] }
  0xbe   :  { %v724_v58 = vld [vmem:[%s723_s21] sm:$0x1]  ;;  %s741_s7 = scalar_lea.vmem %s3107_s3, %s1798_s9  ;;  %s1804_s20 = sld [smem:[#allocation5 + $0x52]] }
  0xbf   :  { %717 = vst.msk [vmem:[#allocation2 + $0x4c] sm:$0x1] %vm32_vm0, %v716_v56  ;;  %v725_v59 = vmul.f32 %v724_v58, %v722_v57  ;;  %v731_v60 = vld [vmem:[%s730_s12] sm:$0x1]  ;;  %s748_s0 = scalar_lea.vmem %s3106_s2, %s2637_s19  ;;  %s1805_s30 = sld [smem:[#allocation4 + $0x53]] }
  0xc0   :  { %v733_v61 = vld [vmem:[%s732_s5] sm:$0x1]  ;;  %s750_s22 = scalar_lea.vmem %s3107_s3, %s1800_s11  ;;  %s1806_s27 = sld [smem:[#allocation5 + $0x53]] }
  0xc1   :  { %726 = vst.msk [vmem:[#allocation2 + $0x4d] sm:$0x1] %vm32_vm0, %v725_v59  ;;  %v734_v62 = vmul.f32 %v733_v61, %v731_v60  ;;  %v740_v63 = vld [vmem:[%s739_s16] sm:$0x1]  ;;  %s757_s9 = scalar_lea.vmem %s3106_s2, %s1801_s14  ;;  %s1807_s6 = sld [smem:[#allocation4 + $0x54]] }
  0xc2   :  { %v742_v0 = vld [vmem:[%s741_s7] sm:$0x1]  ;;  %s759_s17 = scalar_lea.vmem %s3107_s3, %s1802_s18  ;;  %s1808_s25 = sld [smem:[#allocation5 + $0x54]] }
  0xc3   :  { %735 = vst.msk [vmem:[#allocation2 + $0x4e] sm:$0x1] %vm32_vm0, %v734_v62  ;;  %v743_v1 = vmul.f32 %v742_v0, %v740_v63  ;;  %v749_v2 = vld [vmem:[%s748_s0] sm:$0x1]  ;;  %s766_s11 = scalar_lea.vmem %s3106_s2, %s1803_s1  ;;  %s2678_s23 = sld [smem:[#allocation4 + $0x55]] }
  0xc4   :  { %v751_v3 = vld [vmem:[%s750_s22] sm:$0x1]  ;;  %s768_s8 = scalar_lea.vmem %s3107_s3, %s1804_s20  ;;  %s1810_s15 = sld [smem:[#allocation5 + $0x55]] }
  0xc5   :  { %744 = vst.msk [vmem:[#allocation2 + $0x4f] sm:$0x1] %vm32_vm0, %v743_v1  ;;  %v752_v4 = vmul.f32 %v751_v3, %v749_v2  ;;  %v758_v5 = vld [vmem:[%s757_s9] sm:$0x1]  ;;  %s775_s28 = scalar_lea.vmem %s3106_s2, %s1805_s30  ;;  %s2687_s10 = sld [smem:[#allocation4 + $0x56]] }
  0xc6   :  { %v760_v6 = vld [vmem:[%s759_s17] sm:$0x1]  ;;  %s777_s24 = scalar_lea.vmem %s3107_s3, %s1806_s27  ;;  %s1812_s29 = sld [smem:[#allocation5 + $0x56]] }
  0xc7   :  { %753 = vst.msk [vmem:[#allocation2 + $0x50] sm:$0x1] %vm32_vm0, %v752_v4  ;;  %v761_v7 = vmul.f32 %v760_v6, %v758_v5  ;;  %v767_v8 = vld [vmem:[%s766_s11] sm:$0x1]  ;;  %s784_s21 = scalar_lea.vmem %s3106_s2, %s1807_s6  ;;  %s2696_s13 = sld [smem:[#allocation4 + $0x57]] }
  0xc8   :  { %v769_v9 = vld [vmem:[%s768_s8] sm:$0x1]  ;;  %s786_s19 = scalar_lea.vmem %s3107_s3, %s1808_s25  ;;  %s1814_s12 = sld [smem:[#allocation5 + $0x57]] }
  0xc9   :  { %762 = vst.msk [vmem:[#allocation2 + $0x51] sm:$0x1] %vm32_vm0, %v761_v7  ;;  %v770_v10 = vmul.f32 %v769_v9, %v767_v8  ;;  %v776_v11 = vld [vmem:[%s775_s28] sm:$0x1]  ;;  %s793_s5 = scalar_lea.vmem %s3106_s2, %s2678_s23  ;;  %s2706_s26 = sld [smem:[#allocation4 + $0x58]] }
  0xca   :  { %v778_v12 = vld [vmem:[%s777_s24] sm:$0x1]  ;;  %s795_s25 = scalar_lea.vmem %s3107_s3, %s1810_s15  ;;  %s1816_s14 = sld [smem:[#allocation5 + $0x58]] }
  0xcb   :  { %771 = vst.msk [vmem:[#allocation2 + $0x52] sm:$0x1] %vm32_vm0, %v770_v10  ;;  %v779_v13 = vmul.f32 %v778_v12, %v776_v11  ;;  %v785_v14 = vld [vmem:[%s784_s21] sm:$0x1]  ;;  %s802_s23 = scalar_lea.vmem %s3106_s2, %s2687_s10  ;;  %s1817_s7 = sld [smem:[#allocation4 + $0x59]] }
  0xcc   :  { %v1186_v15 = vld [vmem:[#allocation2 + $0x48] sm:$0xff]  ;;  %v787_v16 = vld [vmem:[%s786_s19] sm:$0x1]  ;;  %s804_s1 = scalar_lea.vmem %s3107_s3, %s1812_s29  ;;  %s1818_s0 = sld [smem:[#allocation5 + $0x59]] }
  0xcd   :  { %v1221_v17 = vsel %vm1193_vm1, %v1186_v15, 0.0  ;;  %780 = vst.msk [vmem:[#allocation2 + $0x53] sm:$0x1] %vm32_vm0, %v779_v13  ;;  %v788_v18 = vmul.f32 %v787_v16, %v785_v14  ;;  %v794_v19 = vld [vmem:[%s793_s5] sm:$0x1]  ;;  %s811_s20 = scalar_lea.vmem %s3106_s2, %s2696_s13  ;;  %s1819_s22 = sld [smem:[#allocation4 + $0x5a]] }
  0xce   :  { %1222 = vadd.xlane.f32.xlu1 %v1221_v17  ;;  %v796_v20 = vld [vmem:[%s795_s25] sm:$0x1]  ;;  %s813_s30 = scalar_lea.vmem %s3107_s3, %s1814_s12  ;;  %s1820_s9 = sld [smem:[#allocation5 + $0x5a]] }
  0xcf   :  { %789 = vst.msk [vmem:[#allocation2 + $0x54] sm:$0x1] %vm32_vm0, %v788_v18  ;;  %v797_v21 = vmul.f32 %v796_v20, %v794_v19  ;;  %v803_v22 = vld [vmem:[%s802_s23] sm:$0x1]  ;;  %s820_s29 = scalar_lea.vmem %s3106_s2, %s2706_s26  ;;  %s1821_s17 = sld [smem:[#allocation4 + $0x5b]] }
  0xd0   :  { %v805_v23 = vld [vmem:[%s804_s1] sm:$0x1]  ;;  %s822_s6 = scalar_lea.vmem %s3107_s3, %s1816_s14  ;;  %s1822_s11 = sld [smem:[#allocation5 + $0x5b]] }
  0xd1   :  { %798 = vst.msk [vmem:[#allocation2 + $0x55] sm:$0x1] %vm32_vm0, %v797_v21  ;;  %v806_v24 = vmul.f32 %v805_v23, %v803_v22  ;;  %v812_v25 = vld [vmem:[%s811_s20] sm:$0x1]  ;;  %s829_s12 = scalar_lea.vmem %s3106_s2, %s1817_s7  ;;  %s1823_s8 = sld [smem:[#allocation4 + $0x5c]] }
  0xd2   :  { %v814_v26 = vld [vmem:[%s813_s30] sm:$0x1]  ;;  %s831_s18 = scalar_lea.vmem %s3107_s3, %s1818_s0  ;;  %s1824_s28 = sld [smem:[#allocation5 + $0x5c]] }
  0xd3   :  { %807 = vst.msk [vmem:[#allocation2 + $0x56] sm:$0x1] %vm32_vm0, %v806_v24  ;;  %v815_v27 = vmul.f32 %v814_v26, %v812_v25  ;;  %v821_v28 = vld [vmem:[%s820_s29] sm:$0x1]  ;;  %s838_s14 = scalar_lea.vmem %s3106_s2, %s1819_s22  ;;  %s2747_s24 = sld [smem:[#allocation4 + $0x5d]] }
  0xd4   :  { %v823_v29 = vld [vmem:[%s822_s6] sm:$0x1]  ;;  %s840_s10 = scalar_lea.vmem %s3107_s3, %s1820_s9  ;;  %s1826_s21 = sld [smem:[#allocation5 + $0x5d]] }
  0xd5   :  { %816 = vst.msk [vmem:[#allocation2 + $0x57] sm:$0x1] %vm32_vm0, %v815_v27  ;;  %v824_v30 = vmul.f32 %v823_v29, %v821_v28  ;;  %v830_v31 = vld [vmem:[%s829_s12] sm:$0x1]  ;;  %s847_s19 = scalar_lea.vmem %s3106_s2, %s1821_s17  ;;  %s2756_s27 = sld [smem:[#allocation4 + $0x5e]] }
  0xd6   :  { %v832_v32 = vld [vmem:[%s831_s18] sm:$0x1]  ;;  %s849_s13 = scalar_lea.vmem %s3107_s3, %s1822_s11  ;;  %s1828_s5 = sld [smem:[#allocation5 + $0x5e]] }
  0xd7   :  { %825 = vst.msk [vmem:[#allocation2 + $0x58] sm:$0x1] %vm32_vm0, %v824_v30  ;;  %v833_v33 = vmul.f32 %v832_v32, %v830_v31  ;;  %v839_v34 = vld [vmem:[%s838_s14] sm:$0x1]  ;;  %s856_s25 = scalar_lea.vmem %s3106_s2, %s1823_s8  ;;  %s2765_s16 = sld [smem:[#allocation4 + $0x5f]] }
  0xd8   :  { %v841_v35 = vld [vmem:[%s840_s10] sm:$0x1]  ;;  %s858_s26 = scalar_lea.vmem %s3107_s3, %s1824_s28  ;;  %s1830_s23 = sld [smem:[#allocation5 + $0x5f]] }
  0xd9   :  { %834 = vst.msk [vmem:[#allocation2 + $0x59] sm:$0x1] %vm32_vm0, %v833_v33  ;;  %v842_v36 = vmul.f32 %v841_v35, %v839_v34  ;;  %v848_v37 = vld [vmem:[%s847_s19] sm:$0x1]  ;;  %s865_s1 = scalar_lea.vmem %s3106_s2, %s2747_s24  ;;  %s2775_s15 = sld [smem:[#allocation4 + $0x60]] }
  0xda   :  { %v850_v38 = vld [vmem:[%s849_s13] sm:$0x1]  ;;  %s867_s28 = scalar_lea.vmem %s3107_s3, %s1826_s21  ;;  %s1832_s7 = sld [smem:[#allocation5 + $0x60]] }
  0xdb   :  { %843 = vst.msk [vmem:[#allocation2 + $0x5a] sm:$0x1] %vm32_vm0, %v842_v36  ;;  %v851_v39 = vmul.f32 %v850_v38, %v848_v37  ;;  %v857_v40 = vld [vmem:[%s856_s25] sm:$0x1]  ;;  %s874_s24 = scalar_lea.vmem %s3106_s2, %s2756_s27  ;;  %s1833_s30 = sld [smem:[#allocation4 + $0x61]] }
  0xdc   :  { %v1187_v41 = vld [vmem:[#allocation2 + $0x50] sm:$0xff]  ;;  %v859_v42 = vld [vmem:[%s858_s26] sm:$0x1]  ;;  %s876_s22 = scalar_lea.vmem %s3107_s3, %s1828_s5  ;;  %s1834_s29 = sld [smem:[#allocation5 + $0x61]] }
  0xdd   :  { %v1224_v43 = vsel %vm1193_vm1, %v1187_v41, 0.0  ;;  %852 = vst.msk [vmem:[#allocation2 + $0x5b] sm:$0x1] %vm32_vm0, %v851_v39  ;;  %v860_v44 = vmul.f32 %v859_v42, %v857_v40  ;;  %v866_v45 = vld [vmem:[%s865_s1] sm:$0x1]  ;;  %s883_s9 = scalar_lea.vmem %s3106_s2, %s2765_s16  ;;  %s1835_s6 = sld [smem:[#allocation4 + $0x62]] }
  0xde   :  { %1225 = vadd.xlane.f32.xlu0 %v1224_v43  ;;  %v868_v46 = vld [vmem:[%s867_s28] sm:$0x1]  ;;  %s885_s17 = scalar_lea.vmem %s3107_s3, %s1830_s23  ;;  %s1836_s12 = sld [smem:[#allocation5 + $0x62]] }
  0xdf   :  { %861 = vst.msk [vmem:[#allocation2 + $0x5c] sm:$0x1] %vm32_vm0, %v860_v44  ;;  %v869_v47 = vmul.f32 %v868_v46, %v866_v45  ;;  %v875_v48 = vld [vmem:[%s874_s24] sm:$0x1]  ;;  %s892_s5 = scalar_lea.vmem %s3106_s2, %s2775_s15  ;;  %s1837_s18 = sld [smem:[#allocation4 + $0x63]] }
  0xe0   :  { %v877_v49 = vld [vmem:[%s876_s22] sm:$0x1]  ;;  %s894_s8 = scalar_lea.vmem %s3107_s3, %s1832_s7  ;;  %s1838_s14 = sld [smem:[#allocation5 + $0x63]] }
  0xe1   :  { %870 = vst.msk [vmem:[#allocation2 + $0x5d] sm:$0x1] %vm32_vm0, %v869_v47  ;;  %v878_v50 = vmul.f32 %v877_v49, %v875_v48  ;;  %v884_v51 = vld [vmem:[%s883_s9] sm:$0x1]  ;;  %s901_s23 = scalar_lea.vmem %s3106_s2, %s1833_s30  ;;  %s1839_s10 = sld [smem:[#allocation4 + $0x64]] }
  0xe2   :  { %v886_v52 = vld [vmem:[%s885_s17] sm:$0x1]  ;;  %s903_s0 = scalar_lea.vmem %s3107_s3, %s1834_s29  ;;  %s1840_s19 = sld [smem:[#allocation5 + $0x64]] }
  0xe3   :  { %879 = vst.msk [vmem:[#allocation2 + $0x5e] sm:$0x1] %vm32_vm0, %v878_v50  ;;  %v887_v53 = vmul.f32 %v886_v52, %v884_v51  ;;  %v893_v54 = vld [vmem:[%s892_s5] sm:$0x1]  ;;  %s910_s7 = scalar_lea.vmem %s3106_s2, %s1835_s6  ;;  %s2816_s13 = sld [smem:[#allocation4 + $0x65]] }
  0xe4   :  { %v895_v55 = vld [vmem:[%s894_s8] sm:$0x1]  ;;  %s912_s27 = scalar_lea.vmem %s3107_s3, %s1836_s12  ;;  %s1842_s25 = sld [smem:[#allocation5 + $0x65]] }
  0xe5   :  { %888 = vst.msk [vmem:[#allocation2 + $0x5f] sm:$0x1] %vm32_vm0, %v887_v53  ;;  %v896_v56 = vmul.f32 %v895_v55, %v893_v54  ;;  %v902_v57 = vld [vmem:[%s901_s23] sm:$0x1]  ;;  %s919_s26 = scalar_lea.vmem %s3106_s2, %s1837_s18  ;;  %s2825_s11 = sld [smem:[#allocation4 + $0x66]] }
  0xe6   :  { %v904_v58 = vld [vmem:[%s903_s0] sm:$0x1]  ;;  %s921_s16 = scalar_lea.vmem %s3107_s3, %s1838_s14  ;;  %s1844_s1 = sld [smem:[#allocation5 + $0x66]] }
  0xe7   :  { %897 = vst.msk [vmem:[#allocation2 + $0x60] sm:$0x1] %vm32_vm0, %v896_v56  ;;  %v905_v59 = vmul.f32 %v904_v58, %v902_v57  ;;  %v911_v60 = vld [vmem:[%s910_s7] sm:$0x1]  ;;  %s928_s28 = scalar_lea.vmem %s3106_s2, %s1839_s10  ;;  %s2834_s20 = sld [smem:[#allocation4 + $0x67]] }
  0xe8   :  { %v913_v61 = vld [vmem:[%s912_s27] sm:$0x1]  ;;  %s930_s15 = scalar_lea.vmem %s3107_s3, %s1840_s19  ;;  %s1846_s24 = sld [smem:[#allocation5 + $0x67]] }
  0xe9   :  { %906 = vst.msk [vmem:[#allocation2 + $0x61] sm:$0x1] %vm32_vm0, %v905_v59  ;;  %v914_v62 = vmul.f32 %v913_v61, %v911_v60  ;;  %v920_v63 = vld [vmem:[%s919_s26] sm:$0x1]  ;;  %s937_s22 = scalar_lea.vmem %s3106_s2, %s2816_s13  ;;  %s2844_s21 = sld [smem:[#allocation4 + $0x68]] }
  0xea   :  { %v922_v0 = vld [vmem:[%s921_s16] sm:$0x1]  ;;  %s939_s19 = scalar_lea.vmem %s3107_s3, %s1842_s25  ;;  %s1848_s30 = sld [smem:[#allocation5 + $0x68]] }
  0xeb   :  { %915 = vst.msk [vmem:[#allocation2 + $0x62] sm:$0x1] %vm32_vm0, %v914_v62  ;;  %v923_v1 = vmul.f32 %v922_v0, %v920_v63  ;;  %v929_v2 = vld [vmem:[%s928_s28] sm:$0x1]  ;;  %s946_s13 = scalar_lea.vmem %s3106_s2, %s2825_s11  ;;  %s1849_s17 = sld [smem:[#allocation4 + $0x69]] }
  0xec   :  { %v1188_v3 = vld [vmem:[#allocation2 + $0x58] sm:$0xff]  ;;  %v931_v4 = vld [vmem:[%s930_s15] sm:$0x1]  ;;  %s948_s6 = scalar_lea.vmem %s3107_s3, %s1844_s1  ;;  %s1850_s5 = sld [smem:[#allocation5 + $0x69]] }
  0xed   :  { %v1227_v5 = vsel %vm1193_vm1, %v1188_v3, 0.0  ;;  %924 = vst.msk [vmem:[#allocation2 + $0x63] sm:$0x1] %vm32_vm0, %v923_v1  ;;  %v932_v6 = vmul.f32 %v931_v4, %v929_v2  ;;  %v938_v7 = vld [vmem:[%s937_s22] sm:$0x1]  ;;  %s955_s12 = scalar_lea.vmem %s3106_s2, %s2834_s20  ;;  %s1851_s8 = sld [smem:[#allocation4 + $0x6a]] }
  0xee   :  { %1228 = vadd.xlane.f32.xlu1 %v1227_v5  ;;  %v940_v8 = vld [vmem:[%s939_s19] sm:$0x1]  ;;  %s957_s18 = scalar_lea.vmem %s3107_s3, %s1846_s24  ;;  %s1852_s23 = sld [smem:[#allocation5 + $0x6a]] }
  0xef   :  { %933 = vst.msk [vmem:[#allocation2 + $0x64] sm:$0x1] %vm32_vm0, %v932_v6  ;;  %v941_v9 = vmul.f32 %v940_v8, %v938_v7  ;;  %v947_v10 = vld [vmem:[%s946_s13] sm:$0x1]  ;;  %s964_s1 = scalar_lea.vmem %s3106_s2, %s2844_s21  ;;  %s1853_s0 = sld [smem:[#allocation4 + $0x6b]] }
  0xf0   :  { %v949_v11 = vld [vmem:[%s948_s6] sm:$0x1]  ;;  %s966_s10 = scalar_lea.vmem %s3107_s3, %s1848_s30  ;;  %s1854_s7 = sld [smem:[#allocation5 + $0x6b]] }
  0xf1   :  { %942 = vst.msk [vmem:[#allocation2 + $0x65] sm:$0x1] %vm32_vm0, %v941_v9  ;;  %v950_v12 = vmul.f32 %v949_v11, %v947_v10  ;;  %v956_v13 = vld [vmem:[%s955_s12] sm:$0x1]  ;;  %s973_s24 = scalar_lea.vmem %s3106_s2, %s1849_s17  ;;  %s1855_s27 = sld [smem:[#allocation4 + $0x6c]] }
  0xf2   :  { %v958_v14 = vld [vmem:[%s957_s18] sm:$0x1]  ;;  %s975_s29 = scalar_lea.vmem %s3107_s3, %s1850_s5  ;;  %s1856_s26 = sld [smem:[#allocation5 + $0x6c]] }
  0xf3   :  { %951 = vst.msk [vmem:[#allocation2 + $0x66] sm:$0x1] %vm32_vm0, %v950_v12  ;;  %v959_v15 = vmul.f32 %v958_v14, %v956_v13  ;;  %v965_v16 = vld [vmem:[%s964_s1] sm:$0x1]  ;;  %s982_s30 = scalar_lea.vmem %s3106_s2, %s1851_s8  ;;  %s2885_s16 = sld [smem:[#allocation4 + $0x6d]] }
  0xf4   :  { %v967_v17 = vld [vmem:[%s966_s10] sm:$0x1]  ;;  %s984_s11 = scalar_lea.vmem %s3107_s3, %s1852_s23  ;;  %s1858_s28 = sld [smem:[#allocation5 + $0x6d]] }
  0xf5   :  { %960 = vst.msk [vmem:[#allocation2 + $0x67] sm:$0x1] %vm32_vm0, %v959_v15  ;;  %v968_v18 = vmul.f32 %v967_v17, %v965_v16  ;;  %v974_v19 = vld [vmem:[%s973_s24] sm:$0x1]  ;;  %s991_s15 = scalar_lea.vmem %s3106_s2, %s1853_s0  ;;  %s2894_s14 = sld [smem:[#allocation4 + $0x6e]] }
  0xf6   :  { %v976_v20 = vld [vmem:[%s975_s29] sm:$0x1]  ;;  %s993_s20 = scalar_lea.vmem %s3107_s3, %s1854_s7  ;;  %s1860_s22 = sld [smem:[#allocation5 + $0x6e]] }
  0xf7   :  { %969 = vst.msk [vmem:[#allocation2 + $0x68] sm:$0x1] %vm32_vm0, %v968_v18  ;;  %v977_v21 = vmul.f32 %v976_v20, %v974_v19  ;;  %v983_v22 = vld [vmem:[%s982_s30] sm:$0x1]  ;;  %s1000_s19 = scalar_lea.vmem %s3106_s2, %s1855_s27  ;;  %s2903_s9 = sld [smem:[#allocation4 + $0x6f]] }
  0xf8   :  { %v985_v23 = vld [vmem:[%s984_s11] sm:$0x1]  ;;  %s1002_s21 = scalar_lea.vmem %s3107_s3, %s1856_s26  ;;  %s1862_s13 = sld [smem:[#allocation5 + $0x6f]] }
  0xf9   :  { %978 = vst.msk [vmem:[#allocation2 + $0x69] sm:$0x1] %vm32_vm0, %v977_v21  ;;  %v986_v24 = vmul.f32 %v985_v23, %v983_v22  ;;  %v992_v25 = vld [vmem:[%s991_s15] sm:$0x1]  ;;  %s1009_s6 = scalar_lea.vmem %s3106_s2, %s2885_s16  ;;  %s2913_s25 = sld [smem:[#allocation4 + $0x70]] }
  0xfa   :  { %v994_v26 = vld [vmem:[%s993_s20] sm:$0x1]  ;;  %s1011_s26 = scalar_lea.vmem %s3107_s3, %s1858_s28  ;;  %s1864_s17 = sld [smem:[#allocation5 + $0x70]] }
  0xfb   :  { %987 = vst.msk [vmem:[#allocation2 + $0x6a] sm:$0x1] %vm32_vm0, %v986_v24  ;;  %v995_v27 = vmul.f32 %v994_v26, %v992_v25  ;;  %v1001_v28 = vld [vmem:[%s1000_s19] sm:$0x1]  ;;  %s1018_s16 = scalar_lea.vmem %s3106_s2, %s2894_s14  ;;  %s1865_s18 = sld [smem:[#allocation4 + $0x71]] }
  0xfc   :  { %v1189_v29 = vld [vmem:[#allocation2 + $0x60] sm:$0xff]  ;;  %s1020_s8 = scalar_lea.vmem %s3107_s3, %s1860_s22  ;;  %s1866_s1 = sld [smem:[#allocation5 + $0x71]] }
  0xfd   :  { %v1003_v30 = vld [vmem:[%s1002_s21] sm:$0x1]  ;;  %v1230_v31 = vsel %vm1193_vm1, %v1189_v29, 0.0  ;;  %996 = vst.msk [vmem:[#allocation2 + $0x6b] sm:$0x1] %vm32_vm0, %v995_v27  ;;  %s1027_s23 = scalar_lea.vmem %s3106_s2, %s2903_s9  ;;  %s1867_s10 = sld [smem:[#allocation4 + $0x72]] }
  0xfe   :  { %v1004_v32 = vmul.f32 %v1003_v30, %v1001_v28  ;;  %v1010_v33 = vld [vmem:[%s1009_s6] sm:$0x1]  ;;  %1231 = vadd.xlane.f32.xlu0 %v1230_v31  ;;  %s1029_s0 = scalar_lea.vmem %s3107_s3, %s1862_s13  ;;  %s1868_s24 = sld [smem:[#allocation5 + $0x72]] }
  0xff   :  { %v1012_v34 = vld [vmem:[%s1011_s26] sm:$0x1]  ;;  %s1036_s22 = scalar_lea.vmem %s3106_s2, %s2913_s25  ;;  %s1869_s29 = sld [smem:[#allocation4 + $0x73]] }
 0x100   :  { %1005 = vst.msk [vmem:[#allocation2 + $0x6c] sm:$0x1] %vm32_vm0, %v1004_v32  ;;  %v1013_v35 = vmul.f32 %v1012_v34, %v1010_v33  ;;  %v1019_v36 = vld [vmem:[%s1018_s16] sm:$0x1]  ;;  %s1038_s27 = scalar_lea.vmem %s3107_s3, %s1864_s17  ;;  %s1870_s30 = sld [smem:[#allocation5 + $0x73]]  ;;  %v1196_v32 = vpop.xlane.xlu0 %1195  ;;  %v1258_v33 = vlaneseq  ;;  %v1202_v34 = vpop.xlane.xlu1 %1201 }
 0x101   :  { %v1021_v37 = vld [vmem:[%s1020_s8] sm:$0x1]  ;;  %s1045_s13 = scalar_lea.vmem %s3106_s2, %s1865_s18  ;;  %s1871_s11 = sld [smem:[#allocation4 + $0x74]] }
 0x102   :  { %1014 = vst.msk [vmem:[#allocation2 + $0x6d] sm:$0x1] %vm32_vm0, %v1013_v35  ;;  %v1022_v38 = vmul.f32 %v1021_v37, %v1019_v36  ;;  %v1028_v39 = vld [vmem:[%s1027_s23] sm:$0x1]  ;;  %s1047_s5 = scalar_lea.vmem %s3107_s3, %s1866_s1  ;;  %s1872_s15 = sld [smem:[#allocation5 + $0x74]]  ;;  %v3066_v35 = vand.u32 127, %v1258_v33 }
 0x103   :  { %v1030_v40 = vld [vmem:[%s1029_s0] sm:$0x1]  ;;  %s1054_s17 = scalar_lea.vmem %s3106_s2, %s1867_s10  ;;  %s2954_s20 = sld [smem:[#allocation4 + $0x75]] }
 0x104   :  { %1023 = vst.msk [vmem:[#allocation2 + $0x6e] sm:$0x1] %vm32_vm0, %v1022_v38  ;;  %v1031_v41 = vmul.f32 %v1030_v40, %v1028_v39  ;;  %v1037_v42 = vld [vmem:[%s1036_s22] sm:$0x1]  ;;  %s1056_s14 = scalar_lea.vmem %s3107_s3, %s1868_s24  ;;  %s1874_s19 = sld [smem:[#allocation5 + $0x75]]  ;;  %v1199_v36 = vpop.xlane.xlu0 %1198  ;;  %v1264_v37 = vadd.s32 4294967288, %v3066_v35  ;;  %v1205_v39 = vpop.xlane.xlu1 %1204 }
 0x105   :  { %v1039_v43 = vld [vmem:[%s1038_s27] sm:$0x1]  ;;  %s1063_s21 = scalar_lea.vmem %s3106_s2, %s1869_s29  ;;  %s2963_s7 = sld [smem:[#allocation4 + $0x76]]  ;;  %v3069_v38 = vshrl.u32 %v1258_v33, 7 }
 0x106   :  { %1032 = vst.msk [vmem:[#allocation2 + $0x6f] sm:$0x1] %vm32_vm0, %v1031_v41  ;;  %v1040_v44 = vmul.f32 %v1039_v43, %v1037_v42  ;;  %v1046_v45 = vld [vmem:[%s1045_s13] sm:$0x1]  ;;  %s1065_s9 = scalar_lea.vmem %s3107_s3, %s1870_s30  ;;  %s1876_s6 = sld [smem:[#allocation5 + $0x76]]  ;;  %v1271_v42 = vadd.s32 4294967280, %v3066_v35 }
 0x107   :  { %v1048_v46 = vld [vmem:[%s1047_s5] sm:$0x1]  ;;  %s1072_s26 = scalar_lea.vmem %s3106_s2, %s1871_s11  ;;  %s2972_s12 = sld [smem:[#allocation4 + $0x77]]  ;;  %v1267_v40 = vsub.s32 %v1264_v37, %v3069_v38  ;;  %v1262_v43 = vsub.s32 %v3066_v35, %v3069_v38 }
 0x108   :  { %1041 = vst.msk [vmem:[#allocation2 + $0x70] sm:$0x1] %vm32_vm0, %v1040_v44  ;;  %v1049_v47 = vmul.f32 %v1048_v46, %v1046_v45  ;;  %v1055_v48 = vld [vmem:[%s1054_s17] sm:$0x1]  ;;  %s1074_s25 = scalar_lea.vmem %s3107_s3, %s1872_s15  ;;  %s1878_s16 = sld [smem:[#allocation5 + $0x77]]  ;;  %v1208_v41 = vpop.xlane.xlu0 %1207  ;;  %v1278_v44 = vadd.s32 4294967272, %v3066_v35  ;;  %v1274_v46 = vsub.s32 %v1271_v42, %v3069_v38 }
 0x109   :  { %v1057_v49 = vld [vmem:[%s1056_s14] sm:$0x1]  ;;  %s1081_s8 = scalar_lea.vmem %s3106_s2, %s2954_s20  ;;  %s2982_s28 = sld [smem:[#allocation4 + $0x78]]  ;;  %v1268_v45 = vrot.slane %v1199_v36, %v1267_v40  ;;  %v1362_v40 = vadd.s32 4294967176, %v3066_v35 }
 0x10a   :  { %1050 = vst.msk [vmem:[#allocation2 + $0x71] sm:$0x1] %vm32_vm0, %v1049_v47  ;;  %v1058_v50 = vmul.f32 %v1057_v49, %v1055_v48  ;;  %v1064_v51 = vld [vmem:[%s1063_s21] sm:$0x1]  ;;  %s1083_s15 = scalar_lea.vmem %s3107_s3, %s1874_s19  ;;  %s1880_s18 = sld [smem:[#allocation5 + $0x78]]  ;;  %v1285_v47 = vadd.s32 4294967264, %v3066_v35  ;;  %v1263_v49 = vrot.slane %v1196_v32, %v1262_v43 }
 0x10b   :  { %v1066_v52 = vld [vmem:[%s1065_s9] sm:$0x1]  ;;  %s1090_s20 = scalar_lea.vmem %s3106_s2, %s2963_s7  ;;  %s1881_s0 = sld [smem:[#allocation4 + $0x79]] }
 0x10c   :  { %1059 = vst.msk [vmem:[#allocation2 + $0x72] sm:$0x1] %vm32_vm0, %v1058_v50  ;;  %v1067_v53 = vmul.f32 %v1066_v52, %v1064_v51  ;;  %v1073_v54 = vld [vmem:[%s1072_s26] sm:$0x1]  ;;  %s1092_s10 = scalar_lea.vmem %s3107_s3, %s1876_s6  ;;  %s1882_s22 = sld [smem:[#allocation5 + $0x79]]  ;;  %v1281_v50 = vsub.s32 %v1278_v44, %v3069_v38  ;;  %v1270_v52 = vsel %vm1269_vm2, %v1268_v45, %v1263_v49  ;;  %v1365_v45 = vsub.s32 %v1362_v40, %v3069_v38 }
 0x10d   :  { %v1190_v55 = vld [vmem:[#allocation2 + $0x68] sm:$0xff]  ;;  %v1075_v56 = vld [vmem:[%s1074_s25] sm:$0x1]  ;;  %s1099_s24 = scalar_lea.vmem %s3106_s2, %s2972_s12  ;;  %s1883_s27 = sld [smem:[#allocation4 + $0x7a]] }
 0x10e   :  { %v1233_v57 = vsel %vm1193_vm1, %v1190_v55, 0.0  ;;  %1068 = vst.msk [vmem:[#allocation2 + $0x73] sm:$0x1] %vm32_vm0, %v1067_v53  ;;  %v1076_v58 = vmul.f32 %v1075_v56, %v1073_v54  ;;  %v1082_v59 = vld [vmem:[%s1081_s8] sm:$0x1]  ;;  %s1101_s29 = scalar_lea.vmem %s3107_s3, %s1878_s16  ;;  %s1884_s13 = sld [smem:[#allocation5 + $0x7a]]  ;;  %v1275_v54 = vrot.slane %v1202_v34, %v1274_v46  ;;  %v1288_v55 = vsub.s32 %v1285_v47, %v3069_v38 }
 0x10f   :  { %1234 = vadd.xlane.f32.xlu1 %v1233_v57  ;;  %v1084_v60 = vld [vmem:[%s1083_s15] sm:$0x1]  ;;  %s1108_s6 = scalar_lea.vmem %s3106_s2, %s2982_s28  ;;  %s1885_s5 = sld [smem:[#allocation4 + $0x7b]]  ;;  %v1292_v53 = vadd.s32 4294967256, %v3066_v35  ;;  %v1299_v56 = vadd.s32 4294967248, %v3066_v35  ;;  %v1282_v57 = vrot.slane %v1205_v39, %v1281_v50 }
 0x110   :  { %1077 = vst.msk [vmem:[#allocation2 + $0x74] sm:$0x1] %vm32_vm0, %v1076_v58  ;;  %v1085_v61 = vmul.f32 %v1084_v60, %v1082_v59  ;;  %v1091_v62 = vld [vmem:[%s1090_s20] sm:$0x1]  ;;  %s1110_s11 = scalar_lea.vmem %s3107_s3, %s1880_s18  ;;  %s1886_s17 = sld [smem:[#allocation5 + $0x7b]]  ;;  %v1277_v58 = vsel %vm1276_vm3, %v1275_v54, %v1270_v52 }
 0x111   :  { %v1093_v63 = vld [vmem:[%s1092_s10] sm:$0x1]  ;;  %s1117_s16 = scalar_lea.vmem %s3106_s2, %s1881_s0  ;;  %s1887_s14 = sld [smem:[#allocation4 + $0x7c]]  ;;  %v1295_v60 = vsub.s32 %v1292_v53, %v3069_v38 }
 0x112   :  { %1086 = vst.msk [vmem:[#allocation2 + $0x75] sm:$0x1] %vm32_vm0, %v1085_v61  ;;  %v1094_v0 = vmul.f32 %v1093_v63, %v1091_v62  ;;  %v1100_v1 = vld [vmem:[%s1099_s24] sm:$0x1]  ;;  %s1119_s1 = scalar_lea.vmem %s3107_s3, %s1882_s22  ;;  %s1888_s21 = sld [smem:[#allocation5 + $0x7c]]  ;;  %v1306_v61 = vadd.s32 4294967240, %v3066_v35  ;;  %v1289_v63 = vrot.slane %v1208_v41, %v1288_v55 }
 0x113   :  { %v1102_v2 = vld [vmem:[%s1101_s29] sm:$0x1]  ;;  %s1126_s18 = scalar_lea.vmem %s3106_s2, %s1883_s27  ;;  %s1889_s9 = sld [smem:[#allocation4 + $0x7d]] }
 0x114   :  { %1095 = vst.msk [vmem:[#allocation2 + $0x76] sm:$0x1] %vm32_vm0, %v1094_v0  ;;  %v1103_v3 = vmul.f32 %v1102_v2, %v1100_v1  ;;  %v1109_v4 = vld [vmem:[%s1108_s6] sm:$0x1]  ;;  %s1128_s7 = scalar_lea.vmem %s3107_s3, %s1884_s13  ;;  %s1890_s26 = sld [smem:[#allocation5 + $0x7d]]  ;;  %v1302_v0 = vsub.s32 %v1299_v56, %v3069_v38  ;;  %v1313_v1 = vadd.s32 4294967232, %v3066_v35  ;;  %v1284_v2 = vsel %vm1283_vm4, %v1282_v57, %v1277_v58 }
 0x115   :  { %v1111_v5 = vld [vmem:[%s1110_s11] sm:$0x1]  ;;  %s1135_s22 = scalar_lea.vmem %s3106_s2, %s1885_s5  ;;  %s1891_s30 = sld [smem:[#allocation4 + $0x7e]] }
 0x116   :  { %1104 = vst.msk [vmem:[#allocation2 + $0x77] sm:$0x1] %vm32_vm0, %v1103_v3  ;;  %v1112_v6 = vmul.f32 %v1111_v5, %v1109_v4  ;;  %v1118_v7 = vld [vmem:[%s1117_s16] sm:$0x1]  ;;  %s1137_s12 = scalar_lea.vmem %s3107_s3, %s1886_s17  ;;  %s1892_s8 = sld [smem:[#allocation5 + $0x7e]]  ;;  %v1211_v48 = vpop.xlane.xlu1 %1210  ;;  %v1309_v4 = vsub.s32 %v1306_v61, %v3069_v38  ;;  %v1320_v5 = vadd.s32 4294967224, %v3066_v35 }
 0x117   :  { %v1120_v8 = vld [vmem:[%s1119_s1] sm:$0x1]  ;;  %s1144_s13 = scalar_lea.vmem %s3106_s2, %s1887_s14  ;;  %s1893_s23 = sld [smem:[#allocation4 + $0x7f]]  ;;  %v1296_v3 = vrot.slane %v1211_v48, %v1295_v60 }
 0x118   :  { %1113 = vst.msk [vmem:[#allocation2 + $0x78] sm:$0x1] %vm32_vm0, %v1112_v6  ;;  %v1121_v9 = vmul.f32 %v1120_v8, %v1118_v7  ;;  %v1127_v10 = vld [vmem:[%s1126_s18] sm:$0x1]  ;;  %s1146_s28 = scalar_lea.vmem %s3107_s3, %s1888_s21  ;;  %s1894_s20 = sld [smem:[#allocation5 + $0x7f]]  ;;  %v1291_v6 = vsel %vm1290_vm5, %v1289_v63, %v1284_v2  ;;  %v1316_v8 = vsub.s32 %v1313_v1, %v3069_v38 }
 0x119   :  { %v1129_v11 = vld [vmem:[%s1128_s7] sm:$0x1]  ;;  %s1153_s10 = scalar_lea.vmem %s3106_s2, %s1889_s9 }
 0x11a   :  { %1122 = vst.msk [vmem:[#allocation2 + $0x79] sm:$0x1] %vm32_vm0, %v1121_v9  ;;  %v1130_v12 = vmul.f32 %v1129_v11, %v1127_v10  ;;  %v1136_v13 = vld [vmem:[%s1135_s22] sm:$0x1]  ;;  %s1155_s18 = scalar_lea.vmem %s3107_s3, %s1890_s26  ;;  %v1327_v10 = vadd.s32 4294967216, %v3066_v35 }
 0x11b   :  { %v1138_v14 = vld [vmem:[%s1137_s12] sm:$0x1]  ;;  %s1162_s24 = scalar_lea.vmem %s3106_s2, %s1891_s30 }
 0x11c   :  { %1131 = vst.msk [vmem:[#allocation2 + $0x7a] sm:$0x1] %vm32_vm0, %v1130_v12  ;;  %v1139_v15 = vmul.f32 %v1138_v14, %v1136_v13  ;;  %v1145_v16 = vld [vmem:[%s1144_s13] sm:$0x1]  ;;  %s1164_s29 = scalar_lea.vmem %s3107_s3, %s1892_s8  ;;  %v1298_v12 = vsel %vm1297_vm6, %v1296_v3, %v1291_v6  ;;  %v1323_v14 = vsub.s32 %v1320_v5, %v3069_v38 }
 0x11d   :  { %v1191_v17 = vld [vmem:[#allocation2 + $0x70] sm:$0xff]  ;;  %v1147_v18 = vld [vmem:[%s1146_s28] sm:$0x1]  ;;  %s1171_s27 = scalar_lea.vmem %s3106_s2, %s1893_s23  ;;  %s1948_s2 = smov [#allocation6]  }
 0x11e   :  { %v1236_v19 = vsel %vm1193_vm1, %v1191_v17, 0.0  ;;  %1140 = vst.msk [vmem:[#allocation2 + $0x7b] sm:$0x1] %vm32_vm0, %v1139_v15  ;;  %v1148_v20 = vmul.f32 %v1147_v18, %v1145_v16  ;;  %v1154_v21 = vld [vmem:[%s1153_s10] sm:$0x1]  ;;  %s1173_s30 = scalar_lea.vmem %s3107_s3, %s1894_s20  ;;  %v1334_v15 = vadd.s32 4294967208, %v3066_v35  ;;  %v1330_v18 = vsub.s32 %v1327_v10, %v3069_v38 }
 0x11f   :  { %1237 = vadd.xlane.f32.xlu0 %v1236_v19  ;;  %v1156_v22 = vld [vmem:[%s1155_s18] sm:$0x1]  ;;  %v1341_v19 = vadd.s32 4294967200, %v3066_v35  ;;  %s1377_s3 = sshll.u32 %s1948_s2, 4  ;;  %s1378_s3 = int_to_ptr.vmem [resolvable:$true] %s1377_s3 }
 0x120   :  { %1149 = vst.msk [vmem:[#allocation2 + $0x7c] sm:$0x1] %vm32_vm0, %v1148_v20  ;;  %v1157_v23 = vmul.f32 %v1156_v22, %v1154_v21  ;;  %v1163_v24 = vld [vmem:[%s1162_s24] sm:$0x1]  ;;  %s1922_s12 = scalar_lea.vmem %s1378_s3, 16  ;;  %s1926_s8 = scalar_lea.vmem %s1378_s3, 32 }
 0x121   :  { %v1165_v25 = vld [vmem:[%s1164_s29] sm:$0x1]  ;;  %p1923_p10 = scmp.ne.s32.totalorder %s1378_s3, %s1922_s12  ;;  %p1927_p11 = scmp.lt.s32.totalorder %s1378_s3, %s1378_s3 }
 0x122   :  { %1158 = vst.msk [vmem:[#allocation2 + $0x7d] sm:$0x1] %vm32_vm0, %v1157_v23  ;;  %v1166_v26 = vmul.f32 %v1165_v25, %v1163_v24  ;;  %v1172_v27 = vld [vmem:[%s1171_s27] sm:$0x1]  ;;  %v1337_v23 = vsub.s32 %v1334_v15, %v3069_v38  ;;  %v1348_v25 = vadd.s32 4294967192, %v3066_v35  ;;  %p1928_p12 = scmp.lt.s32.totalorder %s1926_s8, %s1922_s12 }
 0x123   :  { %v1174_v28 = vld [vmem:[%s1173_s30] sm:$0x1] }
 0x124   :  { %1167 = vst.msk [vmem:[#allocation2 + $0x7e] sm:$0x1] %vm32_vm0, %v1166_v26  ;;  %v1175_v29 = vmul.f32 %v1174_v28, %v1172_v27  ;;  %v1344_v28 = vsub.s32 %v1341_v19, %v3069_v38  ;;  %v1351_v32 = vsub.s32 %v1348_v25, %v3069_v38  ;;  %p1929_p13 = por %p1928_p12, %p1927_p11 }
 0x126   :  { %1176 = vst.msk [vmem:[#allocation2 + $0x7f] sm:$0x1] %vm32_vm0, %v1175_v29  ;;  %v1214_v51 = vpop.xlane.xlu0 %1213  ;;  %v1355_v29 = vadd.s32 4294967184, %v3066_v35  ;;  %vm1367_vm0 = vcmask 1048512   ;;  %p1930_p0 = pnand %p1929_p13, %p1923_p10 }
 0x127   :  { %v1303_v7 = vrot.slane %v1214_v51, %v1302_v0 }
 0x128   :  { %v1358_v37 = vsub.s32 %v1355_v29, %v3069_v38 }
 0x129   :  { %v1305_v16 = vsel %vm1304_vm7, %v1303_v7, %v1298_v12 }
 0x12d   :  { %v1192_v30 = vld [vmem:[#allocation2 + $0x78] sm:$0xff] }
 0x12e   :  { %v1239_v31 = vsel %vm1193_vm1, %v1192_v30, 0.0 }
 0x12f   :  { %1240 = vadd.xlane.f32.xlu1 %v1239_v31 }
 0x136   :  { %v1217_v59 = vpop.xlane.xlu1 %1216 }
 0x137   :  { %v1310_v13 = vrot.slane %v1217_v59, %v1309_v4 }
 0x139   :  { %v1312_v21 = vsel %vm1311_vm8, %v1310_v13, %v1305_v16 }
 0x146   :  { %v1220_v62 = vpop.xlane.xlu0 %1219 }
 0x147   :  { %v1317_v17 = vrot.slane %v1220_v62, %v1316_v8 }
 0x149   :  { %v1319_v26 = vsel %vm1318_vm9, %v1317_v17, %v1312_v21 }
 0x157   :  { %v1223_v9 = vpop.xlane.xlu1 %1222 }
 0x158   :  { %v1324_v22 = vrot.slane %v1223_v9, %v1323_v14 }
 0x15a   :  { %v1326_v30 = vsel %vm1325_vm10, %v1324_v22, %v1319_v26 }
 0x167   :  { %v1226_v11 = vpop.xlane.xlu0 %1225 }
 0x168   :  { %v1331_v27 = vrot.slane %v1226_v11, %v1330_v18 }
 0x16a   :  { %v1333_v33 = vsel %vm1332_vm11, %v1331_v27, %v1326_v30 }
 0x177   :  { %v1229_v20 = vpop.xlane.xlu1 %1228 }
 0x178   :  { %v1338_v31 = vrot.slane %v1229_v20, %v1337_v23 }
 0x17a   :  { %v1340_v41 = vsel %vm1339_vm12, %v1338_v31, %v1333_v33 }
 0x187   :  { %v1232_v24 = vpop.xlane.xlu0 %1231 }
 0x188   :  { %v1345_v34 = vrot.slane %v1232_v24, %v1344_v28 }
 0x18a   :  { %v1347_v43 = vsel %vm1346_vm13, %v1345_v34, %v1340_v41 }
 0x198   :  { %v1235_v36 = vpop.xlane.xlu1 %1234 }
 0x199   :  { %v1352_v42 = vrot.slane %v1235_v36, %v1351_v32 }
 0x19b   :  { %v1354_v46 = vsel %vm1353_vm14, %v1352_v42, %v1347_v43 }
 0x1a8   :  { %v1238_v39 = vpop.xlane.xlu0 %1237 }
 0x1a9   :  { %v1359_v44 = vrot.slane %v1238_v39, %v1358_v37 }
 0x1ab   :  { %v1361_v48 = vsel %vm1360_vm15, %v1359_v44, %v1354_v46 }
 0x1b8   :  { %v1241_v47 = vpop.xlane.xlu1 %1240 }
 0x1b9   :  { %v1366_v49 = vrot.slane %v1241_v47, %v1365_v45 }
 0x1bb   :  { %v1368_v50 = vsel %vm1367_vm0, %v1366_v49, %v1361_v48 }
 0x1bc   :  { %1370 = vst [vmem:[#allocation6] sm:$0x1] %v1368_v50 }
 0x1bd   :  { %1933 = shalt.err (!%p1930_p0)
}
 0x1be   :  { %1380 = dma.vmem_to_hbm [thread:$0]  %s1378_s3, 16, %s3108_s4, [#allocation7]  }
 0x1bf   :  { %1944 = dma.done.wait [#allocation7], 16  }
 0x1c0   :  { %1945 = vsyncadd [#allocation7], 4294967280 }
 0x1c1   :  { %1384 = vsyncpa [#allocation7], 1 }

</bundles_post_ra>
